<compile_context>
chip_gen: v7x
topology: tpu7x:2x2x1
jax: 0.10.0
libtpu: 0.0.40
codegen_flags: <defaults>
</compile_context>

<pallas_src>
import jax
import jax.numpy as jnp
from jax.experimental import pallas as pl
from jax.experimental.pallas import tpu as pltpu


def _vmem_limit_bytes():
    """Generation-aware VMEM limit (stay well under physical capacity)."""
    cap = 64 << 20  # conservative fallback (v7x physical)
    try:
        info = pltpu.get_tpu_info()
        cap = int(getattr(info, "vmem_capacity_bytes", cap))
    except Exception:
        pass
    return min(96 << 20, max(32 << 20, cap - (16 << 20)))


_VMEM_LIMIT = _vmem_limit_bytes()


def _pick_tile_n(n):
    """Point-dim tile: a multiple of 128, as large as possible up to 1024,
    chosen as a divisor of N rounded up to 128 (bounds edge-padding waste)."""
    n128 = -(-n // 128) * 128
    for t in (1024, 512, 256, 128):
        if n128 % t == 0:
            return t
    return 128


def _pick_block_b(b, tile_n):
    """Batch elements packed per Tnet3 block so block_b * tile_n ~<= 1024."""
    cap = max(1, 1024 // tile_n)
    for d in range(min(b, cap), 0, -1):
        if b % d == 0:
            return d
    return 1


# ----------------------------------------------------------------------------
# Kernel 1: Tnet(k=3) point MLP  3->64->128->1024 (conv + folded BN + relu),
#           several batch elements packed per block, running max over point
#           tiles accumulated directly in the resident output block.  conv3's
#           folded bias + relu are applied once after the max.
# ----------------------------------------------------------------------------
def _tnet3_point_kernel(x_ref, w1, b1, w2, b2, w3, b3, out_ref):
    nt = pl.program_id(1)
    bb, tn, kk = x_ref.shape
    x = x_ref[...].reshape(bb * tn, kk)                               # bf16
    h = jnp.maximum(
        jnp.dot(x, w1[...], preferred_element_type=jnp.float32) + b1[...], 0.0)
    h = jnp.maximum(
        jnp.dot(h.astype(jnp.bfloat16), w2[...],
                preferred_element_type=jnp.float32) + b2[...], 0.0)
    y = jnp.dot(h.astype(jnp.bfloat16), w3[...],
                preferred_element_type=jnp.float32)                   # (bb*tn,1024)
    tmax = jnp.max(y.reshape(bb, tn, -1), axis=1, keepdims=True)      # (bb,1,1024)

    @pl.when(nt == 0)
    def _():
        out_ref[...] = tmax

    @pl.when(nt != 0)
    def _():
        out_ref[...] = jnp.maximum(out_ref[...], tmax)

    @pl.when(nt == pl.num_programs(1) - 1)
    def _():
        out_ref[...] = jnp.maximum(out_ref[...] + b3[...], 0.0)      # relu(bn3)


# ----------------------------------------------------------------------------
# Kernel 2: Tnet(k=64) point MLP.  The (N,64) conv1 feature `xb` is recomputed
#           in VMEM from the raw points:  xb = relu(x @ (M3 @ W1') + b1')
#           (fused per-batch weight fw1 precomputed outside), so it never
#           round-trips HBM.  Then 64->64->128->1024 and a running max.
# ----------------------------------------------------------------------------
def _tnet64_point_kernel(x_ref, fw1_ref, cb1, w1, b1, w2, b2, w3, b3, out_ref):
    nt = pl.program_id(1)
    x = x_ref[0]                                                      # (tn,3) bf16
    xb = jnp.maximum(
        jnp.dot(x, fw1_ref[0], preferred_element_type=jnp.float32) + cb1[...],
        0.0)                                                          # (tn,64) f32
    h = jnp.maximum(
        jnp.dot(xb.astype(jnp.bfloat16), w1[...],
                preferred_element_type=jnp.float32) + b1[...], 0.0)
    h = jnp.maximum(
        jnp.dot(h.astype(jnp.bfloat16), w2[...],
                preferred_element_type=jnp.float32) + b2[...], 0.0)
    y = jnp.dot(h.astype(jnp.bfloat16), w3[...],
                preferred_element_type=jnp.float32)                   # (tn,1024)
    tmax = jnp.max(y, axis=0, keepdims=True)

    @pl.when(nt == 0)
    def _():
        out_ref[0] = tmax

    @pl.when(nt != 0)
    def _():
        out_ref[0] = jnp.maximum(out_ref[0], tmax)

    @pl.when(nt == pl.num_programs(1) - 1)
    def _():
        out_ref[0] = jnp.maximum(out_ref[0] + b3[...], 0.0)          # relu(bn3)


# ----------------------------------------------------------------------------
# Kernel 3: Transform tail.  Recompute xb = relu(x @ fw1 + b1'), then
#           relu(xb @ (M64 @ W2') + b2') -> conv3 -> running max over points.
#           The (N,64)/(N,128)/(N,1024) intermediates never leave VMEM; bn3's
#           bias is added once after the max (no relu in the reference).
# ----------------------------------------------------------------------------
def _final_conv_max_kernel(x_ref, fw1_ref, cb1, fw2_ref, cb2, w3, b3, out_ref):
    nt = pl.program_id(1)
    x = x_ref[0]                                                      # (tn,3) bf16
    xb = jnp.maximum(
        jnp.dot(x, fw1_ref[0], preferred_element_type=jnp.float32) + cb1[...],
        0.0)
    z = jnp.maximum(
        jnp.dot(xb.astype(jnp.bfloat16), fw2_ref[0],
                preferred_element_type=jnp.float32) + cb2[...], 0.0)  # (tn,128)
    y = jnp.dot(z.astype(jnp.bfloat16), w3[...],
                preferred_element_type=jnp.float32)                   # (tn,1024)
    tmax = jnp.max(y, axis=0, keepdims=True)

    @pl.when(nt == 0)
    def _():
        out_ref[0] = tmax

    @pl.when(nt != 0)
    def _():
        out_ref[0] = jnp.maximum(out_ref[0], tmax)

    @pl.when(nt == pl.num_programs(1) - 1)
    def _():
        out_ref[0] = out_ref[0] + b3[...]                             # bn3, no relu


# ----------------------------------------------------------------------------
# Pallas wrappers
# ----------------------------------------------------------------------------
def tnet3_point_pool(x, point_params, tile_n, block_b):
    """x: (B, Np, 3) bf16 -> (B, 1024) pooled Tnet(k=3) point features."""
    B, Np, k = x.shape
    w1, b1, w2, b2, w3, b3 = point_params
    pooled = pl.pallas_call(
        _tnet3_point_kernel,
        out_shape=jax.ShapeDtypeStruct((B, 1, 1024), jnp.float32),
        grid_spec=pltpu.PrefetchScalarGridSpec(
            num_scalar_prefetch=0,
            grid=(B // block_b, Np // tile_n),
            in_specs=[
                pl.BlockSpec((block_b, tile_n, k), lambda b, n: (b, n, 0)),
                pl.BlockSpec(w1.shape, lambda b, n: (0, 0)),
                pl.BlockSpec(b1.shape, lambda b, n: (0, 0)),
                pl.BlockSpec(w2.shape, lambda b, n: (0, 0)),
                pl.BlockSpec(b2.shape, lambda b, n: (0, 0)),
                pl.BlockSpec(w3.shape, lambda b, n: (0, 0)),
                pl.BlockSpec(b3.shape, lambda b, n: (0, 0)),
            ],
            out_specs=pl.BlockSpec((block_b, 1, 1024), lambda b, n: (b, 0, 0)),
        ),
        compiler_params=pltpu.CompilerParams(
            dimension_semantics=("parallel", "arbitrary"),
            vmem_limit_bytes=_VMEM_LIMIT),
    )(x, w1.astype(jnp.bfloat16), b1, w2.astype(jnp.bfloat16), b2,
      w3.astype(jnp.bfloat16), b3)
    return pooled.reshape(B, 1024)


def tnet64_point_pool(x, fw1, cb1, point_params, tile_n):
    """x: (B, Np, 3) bf16, fw1: (B, 3, 64) bf16 -> (B, 1024) pooled features."""
    B, Np, kin = x.shape
    w1, b1, w2, b2, w3, b3 = point_params
    pooled = pl.pallas_call(
        _tnet64_point_kernel,
        out_shape=jax.ShapeDtypeStruct((B, 1, 1024), jnp.float32),
        grid_spec=pltpu.PrefetchScalarGridSpec(
            num_scalar_prefetch=0,
            grid=(B, Np // tile_n),
            in_specs=[
                pl.BlockSpec((1, tile_n, kin), lambda b, n: (b, n, 0)),
                pl.BlockSpec((1, kin, 64), lambda b, n: (b, 0, 0)),
                pl.BlockSpec(cb1.shape, lambda b, n: (0, 0)),
                pl.BlockSpec(w1.shape, lambda b, n: (0, 0)),
                pl.BlockSpec(b1.shape, lambda b, n: (0, 0)),
                pl.BlockSpec(w2.shape, lambda b, n: (0, 0)),
                pl.BlockSpec(b2.shape, lambda b, n: (0, 0)),
                pl.BlockSpec(w3.shape, lambda b, n: (0, 0)),
                pl.BlockSpec(b3.shape, lambda b, n: (0, 0)),
            ],
            out_specs=pl.BlockSpec((1, 1, 1024), lambda b, n: (b, 0, 0)),
        ),
        compiler_params=pltpu.CompilerParams(
            dimension_semantics=("parallel", "arbitrary"),
            vmem_limit_bytes=_VMEM_LIMIT),
    )(x, fw1, cb1, w1.astype(jnp.bfloat16), b1, w2.astype(jnp.bfloat16), b2,
      w3.astype(jnp.bfloat16), b3)
    return pooled.reshape(B, 1024)


def final_conv_max(x, fw1, cb1, fw2, cb2, w3, b3, tile_n):
    """max_n( bn3(conv3( relu(bn2(conv2( relu(bn1(conv1(x@M3))) @ M64 ))) )) )."""
    B, Np, kin = x.shape
    c3 = w3.shape[1]
    out = pl.pallas_call(
        _final_conv_max_kernel,
        out_shape=jax.ShapeDtypeStruct((B, 1, c3), jnp.float32),
        grid_spec=pltpu.PrefetchScalarGridSpec(
            num_scalar_prefetch=0,
            grid=(B, Np // tile_n),
            in_specs=[
                pl.BlockSpec((1, tile_n, kin), lambda b, n: (b, n, 0)),
                pl.BlockSpec((1, kin, 64), lambda b, n: (b, 0, 0)),
                pl.BlockSpec(cb1.shape, lambda b, n: (0, 0)),
                pl.BlockSpec((1, 64, 128), lambda b, n: (b, 0, 0)),
                pl.BlockSpec(cb2.shape, lambda b, n: (0, 0)),
                pl.BlockSpec(w3.shape, lambda b, n: (0, 0)),
                pl.BlockSpec(b3.shape, lambda b, n: (0, 0)),
            ],
            out_specs=pl.BlockSpec((1, 1, c3), lambda b, n: (b, 0, 0)),
        ),
        compiler_params=pltpu.CompilerParams(
            dimension_semantics=("parallel", "arbitrary"),
            vmem_limit_bytes=_VMEM_LIMIT),
    )(x, fw1, cb1, fw2, cb2, w3.astype(jnp.bfloat16), b3)
    return out.reshape(B, c3)


def tnet_fc_head(pooled, fc_params, k):
    """Tiny FC head (fc1/fc2/fc3, BN folded) in plain XLA: M=B rows give <1/64
    MXU occupancy, so a dedicated pallas_call costs more than it computes."""
    fw1, fb1, fw2, fb2, fw3, fb3 = fc_params
    h = jnp.maximum(pooled @ fw1 + fb1, 0.0)
    h = jnp.maximum(h @ fw2 + fb2, 0.0)
    flat = h @ fw3 + fb3
    return flat.reshape(-1, k, k) + jnp.eye(k, dtype=jnp.float32)[None, :, :]


# ----------------------------------------------------------------------------
# Deterministic parameter init (synthetic; mirrors the nn.Module shapes).
# BatchNorm (eval mode, fresh running stats) is folded into the weights.
# ----------------------------------------------------------------------------
def _init_linear(key, cin, cout):
    kw, kb = jax.random.split(key)
    bound = 1.0 / float(cin) ** 0.5
    W = jax.random.uniform(kw, (cin, cout), jnp.float32, -bound, bound)
    b = jax.random.uniform(kb, (1, cout), jnp.float32, -bound, bound)
    return W, b


def _init_layer_folded(key, cin, cout, eps=1e-5):
    """Conv1d(cin,cout,1)/Linear(cin,cout) with eval-mode BatchNorm folded in."""
    W, b = _init_linear(key, cin, cout)
    gamma = jnp.ones((1, cout), jnp.float32)
    beta = jnp.zeros((1, cout), jnp.float32)
    rmean = jnp.zeros((1, cout), jnp.float32)
    rvar = jnp.ones((1, cout), jnp.float32)
    scale = gamma / jnp.sqrt(rvar + eps)
    shift = beta - rmean * scale
    return (W * scale, b * scale + shift)


def init_tnet_params(key, k):
    keys = jax.random.split(key, 6)
    point = (_init_layer_folded(keys[0], k, 64)
             + _init_layer_folded(keys[1], 64, 128)
             + _init_layer_folded(keys[2], 128, 1024))
    fc = (_init_layer_folded(keys[3], 1024, 512)
          + _init_layer_folded(keys[4], 512, 256)
          + _init_linear(keys[5], 256, k * k))        # fc3 has no BN
    return {"point": point, "fc": fc}


def init_transform_params(key):
    k_t3, k_t64, k_c1, k_c2, k_c3 = jax.random.split(key, 5)
    return {
        "tnet3": init_tnet_params(k_t3, 3),
        "tnet64": init_tnet_params(k_t64, 64),
        "conv1": _init_layer_folded(k_c1, 3, 64),
        "conv2": _init_layer_folded(k_c2, 64, 128),
        "conv3": _init_layer_folded(k_c3, 128, 1024),
    }


# ----------------------------------------------------------------------------
# Transform.forward
# ----------------------------------------------------------------------------
@jax.jit
def transform_forward(x_ncw, params):
    """x_ncw: (B, 3, N) exactly like the PyTorch module input."""
    x = jnp.transpose(x_ncw, (0, 2, 1)).astype(jnp.float32)        # (B, N, 3)
    B, N, _ = x.shape

    tile = _pick_tile_n(N)
    pad = (-N) % tile
    if pad:
        # Duplicated points cannot change any output: every N-dependent path
        # ends in a max-pool and no per-point rows are returned.
        x = jnp.pad(x, ((0, 0), (0, pad), (0, 0)), mode="edge")
    x16 = x.astype(jnp.bfloat16)        # bf16 matmul operands, f32 accumulate
    block_b = _pick_block_b(B, tile)

    # ---- Tnet(k=3): Pallas point MLP + XLA FC head --------------------------
    p3 = params["tnet3"]
    pooled3 = tnet3_point_pool(x16, p3["point"], tile, block_b)
    matrix3x3 = tnet_fc_head(pooled3, p3["fc"], 3)                 # (B, 3, 3)

    # Fold the 3x3 input transform into conv1:  (x @ M3) @ W1 = x @ (M3 @ W1).
    w1c, b1c = params["conv1"]
    fw1 = jnp.einsum("bij,jk->bik", matrix3x3, w1c).astype(jnp.bfloat16)

    # ---- Tnet(k=64) on the in-VMEM-recomputed conv1 features ----------------
    p64 = params["tnet64"]
    pooled64 = tnet64_point_pool(x16, fw1, b1c, p64["point"], tile)
    matrix64x64 = tnet_fc_head(pooled64, p64["fc"], 64)            # (B, 64, 64)

    # Fold the 64x64 feature transform into conv2.
    w2c, b2c = params["conv2"]
    w3c, b3c = params["conv3"]
    fw2 = jnp.einsum("bij,jk->bik", matrix64x64, w2c).astype(jnp.bfloat16)

    output = final_conv_max(x16, fw1, b1c, fw2, b2c, w3c, b3c, tile)  # (B,1024)
    return output, matrix3x3, matrix64x64


if __name__ == "__main__":
    B, N = 2, 128  # batch of 2 point clouds, 128 points each, 3 input coords
    key = jax.random.PRNGKey(0)
    k_in, k_params = jax.random.split(key)

    x_ncw = jax.random.normal(k_in, (B, 3, N), dtype=jnp.float32)  # PyTorch NCW
    params = init_transform_params(k_params)

    out, m3, m64 = transform_forward(x_ncw, params)
    jax.block_until_ready((out, m3, m64))

    assert out.shape == (B, 1024)
    assert m3.shape == (B, 3, 3)
    assert m64.shape == (B, 64, 64)
    assert out.dtype == jnp.float32
    print("KERNEL_OK")
</pallas_src>

<mosaic_0001>
module attributes {stable_mosaic.version = 11 : i64} {
  func.func @_tnet3_point_kernel(%arg0: i32, %arg1: i32, %arg2: memref<2x128x3xbf16, #tpu.memory_space<vmem>>, %arg3: memref<3x64xbf16, #tpu.memory_space<vmem>>, %arg4: memref<1x64xf32, #tpu.memory_space<vmem>>, %arg5: memref<64x128xbf16, #tpu.memory_space<vmem>>, %arg6: memref<1x128xf32, #tpu.memory_space<vmem>>, %arg7: memref<128x1024xbf16, #tpu.memory_space<vmem>>, %arg8: memref<1x1024xf32, #tpu.memory_space<vmem>>, %arg9: memref<2x1x1024xf32, #tpu.memory_space<vmem>>) attributes {dimension_semantics = [#tpu.dimension_semantics<parallel>, #tpu.dimension_semantics<arbitrary>], iteration_bounds = array<i64: 1, 1>, scalar_prefetch = 0 : i64, scratch_operands = 0 : i64, tpu.core_type = #tpu.core_type<tc>, window_params = [{transform_indices = @transform_0, window_bounds = array<i64: 2, 128, 3>}, {pipeline_mode = #tpu.pipeline_mode<synchronous>, transform_indices = @transform_1, window_bounds = array<i64: 3, 64>}, {pipeline_mode = #tpu.pipeline_mode<synchronous>, transform_indices = @transform_2, window_bounds = array<i64: 1, 64>}, {pipeline_mode = #tpu.pipeline_mode<synchronous>, transform_indices = @transform_3, window_bounds = array<i64: 64, 128>}, {pipeline_mode = #tpu.pipeline_mode<synchronous>, transform_indices = @transform_4, window_bounds = array<i64: 1, 128>}, {pipeline_mode = #tpu.pipeline_mode<synchronous>, transform_indices = @transform_5, window_bounds = array<i64: 128, 1024>}, {pipeline_mode = #tpu.pipeline_mode<synchronous>, transform_indices = @transform_6, window_bounds = array<i64: 1, 1024>}, {transform_indices = @transform_7, window_bounds = array<i64: 2, 1, 1024>}]} {
    %c0 = arith.constant 0 : index
    %c0_0 = arith.constant 0 : index
    %c0_1 = arith.constant 0 : index
    %0 = vector.load %arg2[%c0, %c0_0, %c0_1] : memref<2x128x3xbf16, #tpu.memory_space<vmem>>, vector<2x128x3xbf16>
    %1 = vector.shape_cast %0 : vector<2x128x3xbf16> to vector<256x3xbf16>
    %c0_2 = arith.constant 0 : index
    %c0_3 = arith.constant 0 : index
    %2 = vector.load %arg3[%c0_2, %c0_3] : memref<3x64xbf16, #tpu.memory_space<vmem>>, vector<3x64xbf16>
    %cst = arith.constant dense<0.000000e+00> : vector<256x64xf32>
    %3 = tpu.matmul %1, %2, %cst {dimension_numbers = #tpu.dot_dimension_numbers<[1], [0], [0], [1], [0, 0, 1, 1], [], []>} : vector<256x3xbf16>, vector<3x64xbf16>, vector<256x64xf32> -> vector<256x64xf32>
    %c0_4 = arith.constant 0 : index
    %c0_5 = arith.constant 0 : index
    %4 = vector.load %arg4[%c0_4, %c0_5] : memref<1x64xf32, #tpu.memory_space<vmem>>, vector<1x64xf32>
    %5 = vector.broadcast %4 : vector<1x64xf32> to vector<256x64xf32>
    %6 = arith.addf %3, %5 : vector<256x64xf32>
    %cst_6 = arith.constant 0.000000e+00 : f32
    %7 = vector.broadcast %cst_6 : f32 to vector<256x64xf32>
    %8 = arith.maximumf %6, %7 : vector<256x64xf32>
    %9 = arith.truncf %8 : vector<256x64xf32> to vector<256x64xbf16>
    %c0_7 = arith.constant 0 : index
    %c0_8 = arith.constant 0 : index
    %10 = vector.load %arg5[%c0_7, %c0_8] : memref<64x128xbf16, #tpu.memory_space<vmem>>, vector<64x128xbf16>
    %cst_9 = arith.constant dense<0.000000e+00> : vector<256x128xf32>
    %11 = tpu.matmul %9, %10, %cst_9 {dimension_numbers = #tpu.dot_dimension_numbers<[1], [0], [0], [1], [0, 0, 1, 1], [], []>} : vector<256x64xbf16>, vector<64x128xbf16>, vector<256x128xf32> -> vector<256x128xf32>
    %c0_10 = arith.constant 0 : index
    %c0_11 = arith.constant 0 : index
    %12 = vector.load %arg6[%c0_10, %c0_11] : memref<1x128xf32, #tpu.memory_space<vmem>>, vector<1x128xf32>
    %13 = vector.broadcast %12 : vector<1x128xf32> to vector<256x128xf32>
    %14 = arith.addf %11, %13 : vector<256x128xf32>
    %cst_12 = arith.constant 0.000000e+00 : f32
    %15 = vector.broadcast %cst_12 : f32 to vector<256x128xf32>
    %16 = arith.maximumf %14, %15 : vector<256x128xf32>
    %17 = arith.truncf %16 : vector<256x128xf32> to vector<256x128xbf16>
    %c0_13 = arith.constant 0 : index
    %c0_14 = arith.constant 0 : index
    %18 = vector.load %arg7[%c0_13, %c0_14] : memref<128x1024xbf16, #tpu.memory_space<vmem>>, vector<128x1024xbf16>
    %cst_15 = arith.constant dense<0.000000e+00> : vector<256x1024xf32>
    %19 = tpu.matmul %17, %18, %cst_15 {dimension_numbers = #tpu.dot_dimension_numbers<[1], [0], [0], [1], [0, 0, 1, 1], [], []>} : vector<256x128xbf16>, vector<128x1024xbf16>, vector<256x1024xf32> -> vector<256x1024xf32>
    %20 = vector.shape_cast %19 : vector<256x1024xf32> to vector<2x128x1024xf32>
    %cst_16 = arith.constant dense<0xFF800000> : vector<2x1024xf32>
    %21 = vector.multi_reduction <maximumf>, %20, %cst_16 [1] : vector<2x128x1024xf32> to vector<2x1024xf32>
    %22 = vector.shape_cast %21 : vector<2x1024xf32> to vector<2x1x1024xf32>
    %c0_i32 = arith.constant 0 : i32
    %23 = arith.cmpi eq, %arg1, %c0_i32 : i32
    %24 = arith.extui %23 : i1 to i32
    %c0_i32_17 = arith.constant 0 : i32
    %25 = arith.cmpi ne, %24, %c0_i32_17 : i32
    scf.if %25 {
      %c0_22 = arith.constant 0 : index
      %c0_23 = arith.constant 0 : index
      %c0_24 = arith.constant 0 : index
      %32 = vector.load %arg9[%c0_22, %c0_23, %c0_24] : memref<2x1x1024xf32, #tpu.memory_space<vmem>>, vector<2x1x1024xf32>
      tpu.vector_store %arg9[%c0_22, %c0_23, %c0_24], %22 {strides = array<i32>} : memref<2x1x1024xf32, #tpu.memory_space<vmem>>, vector<2x1x1024xf32>,
    } else {
    }
    %c0_i32_18 = arith.constant 0 : i32
    %26 = arith.cmpi ne, %arg1, %c0_i32_18 : i32
    %27 = arith.extui %26 : i1 to i32
    %c0_i32_19 = arith.constant 0 : i32
    %28 = arith.cmpi ne, %27, %c0_i32_19 : i32
    scf.if %28 {
      %c0_22 = arith.constant 0 : index
      %c0_23 = arith.constant 0 : index
      %c0_24 = arith.constant 0 : index
      %32 = vector.load %arg9[%c0_22, %c0_23, %c0_24] : memref<2x1x1024xf32, #tpu.memory_space<vmem>>, vector<2x1x1024xf32>
      %33 = arith.maximumf %32, %22 : vector<2x1x1024xf32>
      %c0_25 = arith.constant 0 : index
      %c0_26 = arith.constant 0 : index
      %c0_27 = arith.constant 0 : index
      %34 = vector.load %arg9[%c0_25, %c0_26, %c0_27] : memref<2x1x1024xf32, #tpu.memory_space<vmem>>, vector<2x1x1024xf32>
      tpu.vector_store %arg9[%c0_25, %c0_26, %c0_27], %33 {strides = array<i32>} : memref<2x1x1024xf32, #tpu.memory_space<vmem>>, vector<2x1x1024xf32>,
    } else {
    }
    %c0_i32_20 = arith.constant 0 : i32
    %29 = arith.cmpi eq, %arg1, %c0_i32_20 : i32
    %30 = arith.extui %29 : i1 to i32
    %c0_i32_21 = arith.constant 0 : i32
    %31 = arith.cmpi ne, %30, %c0_i32_21 : i32
    scf.if %31 {
      %c0_22 = arith.constant 0 : index
      %c0_23 = arith.constant 0 : index
      %c0_24 = arith.constant 0 : index
      %32 = vector.load %arg9[%c0_22, %c0_23, %c0_24] : memref<2x1x1024xf32, #tpu.memory_space<vmem>>, vector<2x1x1024xf32>
      %c0_25 = arith.constant 0 : index
      %c0_26 = arith.constant 0 : index
      %33 = vector.load %arg8[%c0_25, %c0_26] : memref<1x1024xf32, #tpu.memory_space<vmem>>, vector<1x1024xf32>
      %34 = vector.shape_cast %33 : vector<1x1024xf32> to vector<1x1x1024xf32>
      %35 = vector.broadcast %34 : vector<1x1x1024xf32> to vector<2x1x1024xf32>
      %36 = arith.addf %32, %35 : vector<2x1x1024xf32>
      %cst_27 = arith.constant 0.000000e+00 : f32
      %37 = vector.broadcast %cst_27 : f32 to vector<2x1x1024xf32>
      %38 = arith.maximumf %36, %37 : vector<2x1x1024xf32>
      %c0_28 = arith.constant 0 : index
      %c0_29 = arith.constant 0 : index
      %c0_30 = arith.constant 0 : index
      %39 = vector.load %arg9[%c0_28, %c0_29, %c0_30] : memref<2x1x1024xf32, #tpu.memory_space<vmem>>, vector<2x1x1024xf32>
      tpu.vector_store %arg9[%c0_28, %c0_29, %c0_30], %38 {strides = array<i32>} : memref<2x1x1024xf32, #tpu.memory_space<vmem>>, vector<2x1x1024xf32>,
    } else {
    }
    return
  }
  func.func @transform_0(%arg0: i32, %arg1: i32) -> (i32, i32, i32) {
    %c0_i32 = arith.constant 0 : i32
    %c0_i32_0 = arith.constant 0 : i32
    return %arg0, %arg1, %c0_i32 : i32, i32, i32
  }
  func.func @transform_1(%arg0: i32, %arg1: i32) -> (i32, i32) {
    %c0_i32 = arith.constant 0 : i32
    %c0_i32_0 = arith.constant 0 : i32
    %c0_i32_1 = arith.constant 0 : i32
    return %c0_i32, %c0_i32_0 : i32, i32
  }
  func.func @transform_2(%arg0: i32, %arg1: i32) -> (i32, i32) {
    %c0_i32 = arith.constant 0 : i32
    %c0_i32_0 = arith.constant 0 : i32
    %c0_i32_1 = arith.constant 0 : i32
    return %c0_i32, %c0_i32_0 : i32, i32
  }
  func.func @transform_3(%arg0: i32, %arg1: i32) -> (i32, i32) {
    %c0_i32 = arith.constant 0 : i32
    %c0_i32_0 = arith.constant 0 : i32
    %c0_i32_1 = arith.constant 0 : i32
    return %c0_i32, %c0_i32_0 : i32, i32
  }
  func.func @transform_4(%arg0: i32, %arg1: i32) -> (i32, i32) {
    %c0_i32 = arith.constant 0 : i32
    %c0_i32_0 = arith.constant 0 : i32
    %c0_i32_1 = arith.constant 0 : i32
    return %c0_i32, %c0_i32_0 : i32, i32
  }
  func.func @transform_5(%arg0: i32, %arg1: i32) -> (i32, i32) {
    %c0_i32 = arith.constant 0 : i32
    %c0_i32_0 = arith.constant 0 : i32
    %c0_i32_1 = arith.constant 0 : i32
    return %c0_i32, %c0_i32_0 : i32, i32
  }
  func.func @transform_6(%arg0: i32, %arg1: i32) -> (i32, i32) {
    %c0_i32 = arith.constant 0 : i32
    %c0_i32_0 = arith.constant 0 : i32
    %c0_i32_1 = arith.constant 0 : i32
    return %c0_i32, %c0_i32_0 : i32, i32
  }
  func.func @transform_7(%arg0: i32, %arg1: i32) -> (i32, i32, i32) {
    %c0_i32 = arith.constant 0 : i32
    %c0_i32_0 = arith.constant 0 : i32
    %c0_i32_1 = arith.constant 0 : i32
    return %arg0, %c0_i32, %c0_i32_0 : i32, i32, i32
  }
}

module attributes {stable_mosaic.version = 11 : i64} {
  func.func @_tnet64_point_kernel(%arg0: i32, %arg1: i32, %arg2: memref<1x128x3xbf16, #tpu.memory_space<vmem>>, %arg3: memref<1x3x64xbf16, #tpu.memory_space<vmem>>, %arg4: memref<1x64xf32, #tpu.memory_space<vmem>>, %arg5: memref<64x64xbf16, #tpu.memory_space<vmem>>, %arg6: memref<1x64xf32, #tpu.memory_space<vmem>>, %arg7: memref<64x128xbf16, #tpu.memory_space<vmem>>, %arg8: memref<1x128xf32, #tpu.memory_space<vmem>>, %arg9: memref<128x1024xbf16, #tpu.memory_space<vmem>>, %arg10: memref<1x1024xf32, #tpu.memory_space<vmem>>, %arg11: memref<1x1x1024xf32, #tpu.memory_space<vmem>>) attributes {dimension_semantics = [#tpu.dimension_semantics<parallel>, #tpu.dimension_semantics<arbitrary>], iteration_bounds = array<i64: 2, 1>, scalar_prefetch = 0 : i64, scratch_operands = 0 : i64, tpu.core_type = #tpu.core_type<tc>, window_params = [{transform_indices = @transform_0, window_bounds = array<i64: 1, 128, 3>}, {transform_indices = @transform_1, window_bounds = array<i64: 1, 3, 64>}, {pipeline_mode = #tpu.pipeline_mode<synchronous>, transform_indices = @transform_2, window_bounds = array<i64: 1, 64>}, {pipeline_mode = #tpu.pipeline_mode<synchronous>, transform_indices = @transform_3, window_bounds = array<i64: 64, 64>}, {pipeline_mode = #tpu.pipeline_mode<synchronous>, transform_indices = @transform_4, window_bounds = array<i64: 1, 64>}, {pipeline_mode = #tpu.pipeline_mode<synchronous>, transform_indices = @transform_5, window_bounds = array<i64: 64, 128>}, {pipeline_mode = #tpu.pipeline_mode<synchronous>, transform_indices = @transform_6, window_bounds = array<i64: 1, 128>}, {pipeline_mode = #tpu.pipeline_mode<synchronous>, transform_indices = @transform_7, window_bounds = array<i64: 128, 1024>}, {pipeline_mode = #tpu.pipeline_mode<synchronous>, transform_indices = @transform_8, window_bounds = array<i64: 1, 1024>}, {transform_indices = @transform_9, window_bounds = array<i64: 1, 1, 1024>}]} {
    %c0 = arith.constant 0 : index
    %c0_0 = arith.constant 0 : index
    %c0_1 = arith.constant 0 : index
    %0 = vector.load %arg2[%c0, %c0_0, %c0_1] : memref<1x128x3xbf16, #tpu.memory_space<vmem>>, vector<1x128x3xbf16>
    %1 = vector.shape_cast %0 : vector<1x128x3xbf16> to vector<128x3xbf16>
    %c0_2 = arith.constant 0 : index
    %c0_3 = arith.constant 0 : index
    %c0_4 = arith.constant 0 : index
    %2 = vector.load %arg3[%c0_2, %c0_3, %c0_4] : memref<1x3x64xbf16, #tpu.memory_space<vmem>>, vector<1x3x64xbf16>
    %3 = vector.shape_cast %2 : vector<1x3x64xbf16> to vector<3x64xbf16>
    %cst = arith.constant dense<0.000000e+00> : vector<128x64xf32>
    %4 = tpu.matmul %1, %3, %cst {dimension_numbers = #tpu.dot_dimension_numbers<[1], [0], [0], [1], [0, 0, 1, 1], [], []>} : vector<128x3xbf16>, vector<3x64xbf16>, vector<128x64xf32> -> vector<128x64xf32>
    %c0_5 = arith.constant 0 : index
    %c0_6 = arith.constant 0 : index
    %5 = vector.load %arg4[%c0_5, %c0_6] : memref<1x64xf32, #tpu.memory_space<vmem>>, vector<1x64xf32>
    %6 = vector.broadcast %5 : vector<1x64xf32> to vector<128x64xf32>
    %7 = arith.addf %4, %6 : vector<128x64xf32>
    %cst_7 = arith.constant 0.000000e+00 : f32
    %8 = vector.broadcast %cst_7 : f32 to vector<128x64xf32>
    %9 = arith.maximumf %7, %8 : vector<128x64xf32>
    %10 = arith.truncf %9 : vector<128x64xf32> to vector<128x64xbf16>
    %c0_8 = arith.constant 0 : index
    %c0_9 = arith.constant 0 : index
    %11 = vector.load %arg5[%c0_8, %c0_9] : memref<64x64xbf16, #tpu.memory_space<vmem>>, vector<64x64xbf16>
    %cst_10 = arith.constant dense<0.000000e+00> : vector<128x64xf32>
    %12 = tpu.matmul %10, %11, %cst_10 {dimension_numbers = #tpu.dot_dimension_numbers<[1], [0], [0], [1], [0, 0, 1, 1], [], []>} : vector<128x64xbf16>, vector<64x64xbf16>, vector<128x64xf32> -> vector<128x64xf32>
    %c0_11 = arith.constant 0 : index
    %c0_12 = arith.constant 0 : index
    %13 = vector.load %arg6[%c0_11, %c0_12] : memref<1x64xf32, #tpu.memory_space<vmem>>, vector<1x64xf32>
    %14 = vector.broadcast %13 : vector<1x64xf32> to vector<128x64xf32>
    %15 = arith.addf %12, %14 : vector<128x64xf32>
    %cst_13 = arith.constant 0.000000e+00 : f32
    %16 = vector.broadcast %cst_13 : f32 to vector<128x64xf32>
    %17 = arith.maximumf %15, %16 : vector<128x64xf32>
    %18 = arith.truncf %17 : vector<128x64xf32> to vector<128x64xbf16>
    %c0_14 = arith.constant 0 : index
    %c0_15 = arith.constant 0 : index
    %19 = vector.load %arg7[%c0_14, %c0_15] : memref<64x128xbf16, #tpu.memory_space<vmem>>, vector<64x128xbf16>
    %cst_16 = arith.constant dense<0.000000e+00> : vector<128x128xf32>
    %20 = tpu.matmul %18, %19, %cst_16 {dimension_numbers = #tpu.dot_dimension_numbers<[1], [0], [0], [1], [0, 0, 1, 1], [], []>} : vector<128x64xbf16>, vector<64x128xbf16>, vector<128x128xf32> -> vector<128x128xf32>
    %c0_17 = arith.constant 0 : index
    %c0_18 = arith.constant 0 : index
    %21 = vector.load %arg8[%c0_17, %c0_18] : memref<1x128xf32, #tpu.memory_space<vmem>>, vector<1x128xf32>
    %22 = vector.broadcast %21 : vector<1x128xf32> to vector<128x128xf32>
    %23 = arith.addf %20, %22 : vector<128x128xf32>
    %cst_19 = arith.constant 0.000000e+00 : f32
    %24 = vector.broadcast %cst_19 : f32 to vector<128x128xf32>
    %25 = arith.maximumf %23, %24 : vector<128x128xf32>
    %26 = arith.truncf %25 : vector<128x128xf32> to vector<128x128xbf16>
    %c0_20 = arith.constant 0 : index
    %c0_21 = arith.constant 0 : index
    %27 = vector.load %arg9[%c0_20, %c0_21] : memref<128x1024xbf16, #tpu.memory_space<vmem>>, vector<128x1024xbf16>
    %cst_22 = arith.constant dense<0.000000e+00> : vector<128x1024xf32>
    %28 = tpu.matmul %26, %27, %cst_22 {dimension_numbers = #tpu.dot_dimension_numbers<[1], [0], [0], [1], [0, 0, 1, 1], [], []>} : vector<128x128xbf16>, vector<128x1024xbf16>, vector<128x1024xf32> -> vector<128x1024xf32>
    %cst_23 = arith.constant dense<0xFF800000> : vector<1024xf32>
    %29 = vector.multi_reduction <maximumf>, %28, %cst_23 [0] : vector<128x1024xf32> to vector<1024xf32>
    %30 = vector.shape_cast %29 : vector<1024xf32> to vector<1x1024xf32>
    %c0_i32 = arith.constant 0 : i32
    %31 = arith.cmpi eq, %arg1, %c0_i32 : i32
    %32 = arith.extui %31 : i1 to i32
    %c0_i32_24 = arith.constant 0 : i32
    %33 = arith.cmpi ne, %32, %c0_i32_24 : i32
    scf.if %33 {
      %c0_29 = arith.constant 0 : index
      %c0_30 = arith.constant 0 : index
      %c0_31 = arith.constant 0 : index
      %40 = vector.load %arg11[%c0_29, %c0_30, %c0_31] : memref<1x1x1024xf32, #tpu.memory_space<vmem>>, vector<1x1x1024xf32>
      %41 = vector.shape_cast %40 : vector<1x1x1024xf32> to vector<1x1024xf32>
      %42 = vector.shape_cast %30 : vector<1x1024xf32> to vector<1x1x1024xf32>
      tpu.vector_store %arg11[%c0_29, %c0_30, %c0_31], %42 {strides = array<i32>} : memref<1x1x1024xf32, #tpu.memory_space<vmem>>, vector<1x1x1024xf32>,
    } else {
    }
    %c0_i32_25 = arith.constant 0 : i32
    %34 = arith.cmpi ne, %arg1, %c0_i32_25 : i32
    %35 = arith.extui %34 : i1 to i32
    %c0_i32_26 = arith.constant 0 : i32
    %36 = arith.cmpi ne, %35, %c0_i32_26 : i32
    scf.if %36 {
      %c0_29 = arith.constant 0 : index
      %c0_30 = arith.constant 0 : index
      %c0_31 = arith.constant 0 : index
      %40 = vector.load %arg11[%c0_29, %c0_30, %c0_31] : memref<1x1x1024xf32, #tpu.memory_space<vmem>>, vector<1x1x1024xf32>
      %41 = vector.shape_cast %40 : vector<1x1x1024xf32> to vector<1x1024xf32>
      %42 = arith.maximumf %41, %30 : vector<1x1024xf32>
      %c0_32 = arith.constant 0 : index
      %c0_33 = arith.constant 0 : index
      %c0_34 = arith.constant 0 : index
      %43 = vector.load %arg11[%c0_32, %c0_33, %c0_34] : memref<1x1x1024xf32, #tpu.memory_space<vmem>>, vector<1x1x1024xf32>
      %44 = vector.shape_cast %43 : vector<1x1x1024xf32> to vector<1x1024xf32>
      %45 = vector.shape_cast %42 : vector<1x1024xf32> to vector<1x1x1024xf32>
      tpu.vector_store %arg11[%c0_32, %c0_33, %c0_34], %45 {strides = array<i32>} : memref<1x1x1024xf32, #tpu.memory_space<vmem>>, vector<1x1x1024xf32>,
    } else {
    }
    %c0_i32_27 = arith.constant 0 : i32
    %37 = arith.cmpi eq, %arg1, %c0_i32_27 : i32
    %38 = arith.extui %37 : i1 to i32
    %c0_i32_28 = arith.constant 0 : i32
    %39 = arith.cmpi ne, %38, %c0_i32_28 : i32
    scf.if %39 {
      %c0_29 = arith.constant 0 : index
      %c0_30 = arith.constant 0 : index
      %c0_31 = arith.constant 0 : index
      %40 = vector.load %arg11[%c0_29, %c0_30, %c0_31] : memref<1x1x1024xf32, #tpu.memory_space<vmem>>, vector<1x1x1024xf32>
      %41 = vector.shape_cast %40 : vector<1x1x1024xf32> to vector<1x1024xf32>
      %c0_32 = arith.constant 0 : index
      %c0_33 = arith.constant 0 : index
      %42 = vector.load %arg10[%c0_32, %c0_33] : memref<1x1024xf32, #tpu.memory_space<vmem>>, vector<1x1024xf32>
      %43 = arith.addf %41, %42 : vector<1x1024xf32>
      %cst_34 = arith.constant 0.000000e+00 : f32
      %44 = vector.broadcast %cst_34 : f32 to vector<1x1024xf32>
      %45 = arith.maximumf %43, %44 : vector<1x1024xf32>
      %c0_35 = arith.constant 0 : index
      %c0_36 = arith.constant 0 : index
      %c0_37 = arith.constant 0 : index
      %46 = vector.load %arg11[%c0_35, %c0_36, %c0_37] : memref<1x1x1024xf32, #tpu.memory_space<vmem>>, vector<1x1x1024xf32>
      %47 = vector.shape_cast %46 : vector<1x1x1024xf32> to vector<1x1024xf32>
      %48 = vector.shape_cast %45 : vector<1x1024xf32> to vector<1x1x1024xf32>
      tpu.vector_store %arg11[%c0_35, %c0_36, %c0_37], %48 {strides = array<i32>} : memref<1x1x1024xf32, #tpu.memory_space<vmem>>, vector<1x1x1024xf32>,
    } else {
    }
    return
  }
  func.func @transform_0(%arg0: i32, %arg1: i32) -> (i32, i32, i32) {
    %c0_i32 = arith.constant 0 : i32
    %c0_i32_0 = arith.constant 0 : i32
    return %arg0, %arg1, %c0_i32 : i32, i32, i32
  }
  func.func @transform_1(%arg0: i32, %arg1: i32) -> (i32, i32, i32) {
    %c0_i32 = arith.constant 0 : i32
    %c0_i32_0 = arith.constant 0 : i32
    %c0_i32_1 = arith.constant 0 : i32
    return %arg0, %c0_i32, %c0_i32_0 : i32, i32, i32
  }
  func.func @transform_2(%arg0: i32, %arg1: i32) -> (i32, i32) {
    %c0_i32 = arith.constant 0 : i32
    %c0_i32_0 = arith.constant 0 : i32
    %c0_i32_1 = arith.constant 0 : i32
    return %c0_i32, %c0_i32_0 : i32, i32
  }
  func.func @transform_3(%arg0: i32, %arg1: i32) -> (i32, i32) {
    %c0_i32 = arith.constant 0 : i32
    %c0_i32_0 = arith.constant 0 : i32
    %c0_i32_1 = arith.constant 0 : i32
    return %c0_i32, %c0_i32_0 : i32, i32
  }
  func.func @transform_4(%arg0: i32, %arg1: i32) -> (i32, i32) {
    %c0_i32 = arith.constant 0 : i32
    %c0_i32_0 = arith.constant 0 : i32
    %c0_i32_1 = arith.constant 0 : i32
    return %c0_i32, %c0_i32_0 : i32, i32
  }
  func.func @transform_5(%arg0: i32, %arg1: i32) -> (i32, i32) {
    %c0_i32 = arith.constant 0 : i32
    %c0_i32_0 = arith.constant 0 : i32
    %c0_i32_1 = arith.constant 0 : i32
    return %c0_i32, %c0_i32_0 : i32, i32
  }
  func.func @transform_6(%arg0: i32, %arg1: i32) -> (i32, i32) {
    %c0_i32 = arith.constant 0 : i32
    %c0_i32_0 = arith.constant 0 : i32
    %c0_i32_1 = arith.constant 0 : i32
    return %c0_i32, %c0_i32_0 : i32, i32
  }
  func.func @transform_7(%arg0: i32, %arg1: i32) -> (i32, i32) {
    %c0_i32 = arith.constant 0 : i32
    %c0_i32_0 = arith.constant 0 : i32
    %c0_i32_1 = arith.constant 0 : i32
    return %c0_i32, %c0_i32_0 : i32, i32
  }
  func.func @transform_8(%arg0: i32, %arg1: i32) -> (i32, i32) {
    %c0_i32 = arith.constant 0 : i32
    %c0_i32_0 = arith.constant 0 : i32
    %c0_i32_1 = arith.constant 0 : i32
    return %c0_i32, %c0_i32_0 : i32, i32
  }
  func.func @transform_9(%arg0: i32, %arg1: i32) -> (i32, i32, i32) {
    %c0_i32 = arith.constant 0 : i32
    %c0_i32_0 = arith.constant 0 : i32
    %c0_i32_1 = arith.constant 0 : i32
    return %arg0, %c0_i32, %c0_i32_0 : i32, i32, i32
  }
}

module attributes {stable_mosaic.version = 11 : i64} {
  func.func @_final_conv_max_kernel(%arg0: i32, %arg1: i32, %arg2: memref<1x128x3xbf16, #tpu.memory_space<vmem>>, %arg3: memref<1x3x64xbf16, #tpu.memory_space<vmem>>, %arg4: memref<1x64xf32, #tpu.memory_space<vmem>>, %arg5: memref<1x64x128xbf16, #tpu.memory_space<vmem>>, %arg6: memref<1x128xf32, #tpu.memory_space<vmem>>, %arg7: memref<128x1024xbf16, #tpu.memory_space<vmem>>, %arg8: memref<1x1024xf32, #tpu.memory_space<vmem>>, %arg9: memref<1x1x1024xf32, #tpu.memory_space<vmem>>) attributes {dimension_semantics = [#tpu.dimension_semantics<parallel>, #tpu.dimension_semantics<arbitrary>], iteration_bounds = array<i64: 2, 1>, scalar_prefetch = 0 : i64, scratch_operands = 0 : i64, tpu.core_type = #tpu.core_type<tc>, window_params = [{transform_indices = @transform_0, window_bounds = array<i64: 1, 128, 3>}, {transform_indices = @transform_1, window_bounds = array<i64: 1, 3, 64>}, {pipeline_mode = #tpu.pipeline_mode<synchronous>, transform_indices = @transform_2, window_bounds = array<i64: 1, 64>}, {transform_indices = @transform_3, window_bounds = array<i64: 1, 64, 128>}, {pipeline_mode = #tpu.pipeline_mode<synchronous>, transform_indices = @transform_4, window_bounds = array<i64: 1, 128>}, {pipeline_mode = #tpu.pipeline_mode<synchronous>, transform_indices = @transform_5, window_bounds = array<i64: 128, 1024>}, {pipeline_mode = #tpu.pipeline_mode<synchronous>, transform_indices = @transform_6, window_bounds = array<i64: 1, 1024>}, {transform_indices = @transform_7, window_bounds = array<i64: 1, 1, 1024>}]} {
    %c0 = arith.constant 0 : index
    %c0_0 = arith.constant 0 : index
    %c0_1 = arith.constant 0 : index
    %0 = vector.load %arg2[%c0, %c0_0, %c0_1] : memref<1x128x3xbf16, #tpu.memory_space<vmem>>, vector<1x128x3xbf16>
    %1 = vector.shape_cast %0 : vector<1x128x3xbf16> to vector<128x3xbf16>
    %c0_2 = arith.constant 0 : index
    %c0_3 = arith.constant 0 : index
    %c0_4 = arith.constant 0 : index
    %2 = vector.load %arg3[%c0_2, %c0_3, %c0_4] : memref<1x3x64xbf16, #tpu.memory_space<vmem>>, vector<1x3x64xbf16>
    %3 = vector.shape_cast %2 : vector<1x3x64xbf16> to vector<3x64xbf16>
    %cst = arith.constant dense<0.000000e+00> : vector<128x64xf32>
    %4 = tpu.matmul %1, %3, %cst {dimension_numbers = #tpu.dot_dimension_numbers<[1], [0], [0], [1], [0, 0, 1, 1], [], []>} : vector<128x3xbf16>, vector<3x64xbf16>, vector<128x64xf32> -> vector<128x64xf32>
    %c0_5 = arith.constant 0 : index
    %c0_6 = arith.constant 0 : index
    %5 = vector.load %arg4[%c0_5, %c0_6] : memref<1x64xf32, #tpu.memory_space<vmem>>, vector<1x64xf32>
    %6 = vector.broadcast %5 : vector<1x64xf32> to vector<128x64xf32>
    %7 = arith.addf %4, %6 : vector<128x64xf32>
    %cst_7 = arith.constant 0.000000e+00 : f32
    %8 = vector.broadcast %cst_7 : f32 to vector<128x64xf32>
    %9 = arith.maximumf %7, %8 : vector<128x64xf32>
    %10 = arith.truncf %9 : vector<128x64xf32> to vector<128x64xbf16>
    %c0_8 = arith.constant 0 : index
    %c0_9 = arith.constant 0 : index
    %c0_10 = arith.constant 0 : index
    %11 = vector.load %arg5[%c0_8, %c0_9, %c0_10] : memref<1x64x128xbf16, #tpu.memory_space<vmem>>, vector<1x64x128xbf16>
    %12 = vector.shape_cast %11 : vector<1x64x128xbf16> to vector<64x128xbf16>
    %cst_11 = arith.constant dense<0.000000e+00> : vector<128x128xf32>
    %13 = tpu.matmul %10, %12, %cst_11 {dimension_numbers = #tpu.dot_dimension_numbers<[1], [0], [0], [1], [0, 0, 1, 1], [], []>} : vector<128x64xbf16>, vector<64x128xbf16>, vector<128x128xf32> -> vector<128x128xf32>
    %c0_12 = arith.constant 0 : index
    %c0_13 = arith.constant 0 : index
    %14 = vector.load %arg6[%c0_12, %c0_13] : memref<1x128xf32, #tpu.memory_space<vmem>>, vector<1x128xf32>
    %15 = vector.broadcast %14 : vector<1x128xf32> to vector<128x128xf32>
    %16 = arith.addf %13, %15 : vector<128x128xf32>
    %cst_14 = arith.constant 0.000000e+00 : f32
    %17 = vector.broadcast %cst_14 : f32 to vector<128x128xf32>
    %18 = arith.maximumf %16, %17 : vector<128x128xf32>
    %19 = arith.truncf %18 : vector<128x128xf32> to vector<128x128xbf16>
    %c0_15 = arith.constant 0 : index
    %c0_16 = arith.constant 0 : index
    %20 = vector.load %arg7[%c0_15, %c0_16] : memref<128x1024xbf16, #tpu.memory_space<vmem>>, vector<128x1024xbf16>
    %cst_17 = arith.constant dense<0.000000e+00> : vector<128x1024xf32>
    %21 = tpu.matmul %19, %20, %cst_17 {dimension_numbers = #tpu.dot_dimension_numbers<[1], [0], [0], [1], [0, 0, 1, 1], [], []>} : vector<128x128xbf16>, vector<128x1024xbf16>, vector<128x1024xf32> -> vector<128x1024xf32>
    %cst_18 = arith.constant dense<0xFF800000> : vector<1024xf32>
    %22 = vector.multi_reduction <maximumf>, %21, %cst_18 [0] : vector<128x1024xf32> to vector<1024xf32>
    %23 = vector.shape_cast %22 : vector<1024xf32> to vector<1x1024xf32>
    %c0_i32 = arith.constant 0 : i32
    %24 = arith.cmpi eq, %arg1, %c0_i32 : i32
    %25 = arith.extui %24 : i1 to i32
    %c0_i32_19 = arith.constant 0 : i32
    %26 = arith.cmpi ne, %25, %c0_i32_19 : i32
    scf.if %26 {
      %c0_24 = arith.constant 0 : index
      %c0_25 = arith.constant 0 : index
      %c0_26 = arith.constant 0 : index
      %33 = vector.load %arg9[%c0_24, %c0_25, %c0_26] : memref<1x1x1024xf32, #tpu.memory_space<vmem>>, vector<1x1x1024xf32>
      %34 = vector.shape_cast %33 : vector<1x1x1024xf32> to vector<1x1024xf32>
      %35 = vector.shape_cast %23 : vector<1x1024xf32> to vector<1x1x1024xf32>
      tpu.vector_store %arg9[%c0_24, %c0_25, %c0_26], %35 {strides = array<i32>} : memref<1x1x1024xf32, #tpu.memory_space<vmem>>, vector<1x1x1024xf32>,
    } else {
    }
    %c0_i32_20 = arith.constant 0 : i32
    %27 = arith.cmpi ne, %arg1, %c0_i32_20 : i32
    %28 = arith.extui %27 : i1 to i32
    %c0_i32_21 = arith.constant 0 : i32
    %29 = arith.cmpi ne, %28, %c0_i32_21 : i32
    scf.if %29 {
      %c0_24 = arith.constant 0 : index
      %c0_25 = arith.constant 0 : index
      %c0_26 = arith.constant 0 : index
      %33 = vector.load %arg9[%c0_24, %c0_25, %c0_26] : memref<1x1x1024xf32, #tpu.memory_space<vmem>>, vector<1x1x1024xf32>
      %34 = vector.shape_cast %33 : vector<1x1x1024xf32> to vector<1x1024xf32>
      %35 = arith.maximumf %34, %23 : vector<1x1024xf32>
      %c0_27 = arith.constant 0 : index
      %c0_28 = arith.constant 0 : index
      %c0_29 = arith.constant 0 : index
      %36 = vector.load %arg9[%c0_27, %c0_28, %c0_29] : memref<1x1x1024xf32, #tpu.memory_space<vmem>>, vector<1x1x1024xf32>
      %37 = vector.shape_cast %36 : vector<1x1x1024xf32> to vector<1x1024xf32>
      %38 = vector.shape_cast %35 : vector<1x1024xf32> to vector<1x1x1024xf32>
      tpu.vector_store %arg9[%c0_27, %c0_28, %c0_29], %38 {strides = array<i32>} : memref<1x1x1024xf32, #tpu.memory_space<vmem>>, vector<1x1x1024xf32>,
    } else {
    }
    %c0_i32_22 = arith.constant 0 : i32
    %30 = arith.cmpi eq, %arg1, %c0_i32_22 : i32
    %31 = arith.extui %30 : i1 to i32
    %c0_i32_23 = arith.constant 0 : i32
    %32 = arith.cmpi ne, %31, %c0_i32_23 : i32
    scf.if %32 {
      %c0_24 = arith.constant 0 : index
      %c0_25 = arith.constant 0 : index
      %c0_26 = arith.constant 0 : index
      %33 = vector.load %arg9[%c0_24, %c0_25, %c0_26] : memref<1x1x1024xf32, #tpu.memory_space<vmem>>, vector<1x1x1024xf32>
      %34 = vector.shape_cast %33 : vector<1x1x1024xf32> to vector<1x1024xf32>
      %c0_27 = arith.constant 0 : index
      %c0_28 = arith.constant 0 : index
      %35 = vector.load %arg8[%c0_27, %c0_28] : memref<1x1024xf32, #tpu.memory_space<vmem>>, vector<1x1024xf32>
      %36 = arith.addf %34, %35 : vector<1x1024xf32>
      %c0_29 = arith.constant 0 : index
      %c0_30 = arith.constant 0 : index
      %c0_31 = arith.constant 0 : index
      %37 = vector.load %arg9[%c0_29, %c0_30, %c0_31] : memref<1x1x1024xf32, #tpu.memory_space<vmem>>, vector<1x1x1024xf32>
      %38 = vector.shape_cast %37 : vector<1x1x1024xf32> to vector<1x1024xf32>
      %39 = vector.shape_cast %36 : vector<1x1024xf32> to vector<1x1x1024xf32>
      tpu.vector_store %arg9[%c0_29, %c0_30, %c0_31], %39 {strides = array<i32>} : memref<1x1x1024xf32, #tpu.memory_space<vmem>>, vector<1x1x1024xf32>,
    } else {
    }
    return
  }
  func.func @transform_0(%arg0: i32, %arg1: i32) -> (i32, i32, i32) {
    %c0_i32 = arith.constant 0 : i32
    %c0_i32_0 = arith.constant 0 : i32
    return %arg0, %arg1, %c0_i32 : i32, i32, i32
  }
  func.func @transform_1(%arg0: i32, %arg1: i32) -> (i32, i32, i32) {
    %c0_i32 = arith.constant 0 : i32
    %c0_i32_0 = arith.constant 0 : i32
    %c0_i32_1 = arith.constant 0 : i32
    return %arg0, %c0_i32, %c0_i32_0 : i32, i32, i32
  }
  func.func @transform_2(%arg0: i32, %arg1: i32) -> (i32, i32) {
    %c0_i32 = arith.constant 0 : i32
    %c0_i32_0 = arith.constant 0 : i32
    %c0_i32_1 = arith.constant 0 : i32
    return %c0_i32, %c0_i32_0 : i32, i32
  }
  func.func @transform_3(%arg0: i32, %arg1: i32) -> (i32, i32, i32) {
    %c0_i32 = arith.constant 0 : i32
    %c0_i32_0 = arith.constant 0 : i32
    %c0_i32_1 = arith.constant 0 : i32
    return %arg0, %c0_i32, %c0_i32_0 : i32, i32, i32
  }
  func.func @transform_4(%arg0: i32, %arg1: i32) -> (i32, i32) {
    %c0_i32 = arith.constant 0 : i32
    %c0_i32_0 = arith.constant 0 : i32
    %c0_i32_1 = arith.constant 0 : i32
    return %c0_i32, %c0_i32_0 : i32, i32
  }
  func.func @transform_5(%arg0: i32, %arg1: i32) -> (i32, i32) {
    %c0_i32 = arith.constant 0 : i32
    %c0_i32_0 = arith.constant 0 : i32
    %c0_i32_1 = arith.constant 0 : i32
    return %c0_i32, %c0_i32_0 : i32, i32
  }
  func.func @transform_6(%arg0: i32, %arg1: i32) -> (i32, i32) {
    %c0_i32 = arith.constant 0 : i32
    %c0_i32_0 = arith.constant 0 : i32
    %c0_i32_1 = arith.constant 0 : i32
    return %c0_i32, %c0_i32_0 : i32, i32
  }
  func.func @transform_7(%arg0: i32, %arg1: i32) -> (i32, i32, i32) {
    %c0_i32 = arith.constant 0 : i32
    %c0_i32_0 = arith.constant 0 : i32
    %c0_i32_1 = arith.constant 0 : i32
    return %arg0, %c0_i32, %c0_i32_0 : i32, i32, i32
  }
}

</mosaic_0001>

<bundles_post_ra>
// kernel: transform_forward.4
= control target key start
LH: loop header
LB: loop body
LE: loop exit
PB: predicated region body
PF: predicated region fallthrough
CT: control target
= control target key end

     0   :  { %s2522_s30 = smov 0   ;;  %s2524_s10 = smov 0   ;;  %s2953_s0 = inlined_call_operand.vmem [shape: bf16[2,128,3], index: 0, kind: input, shape index: {}]   ;;  %s2954_s1 = inlined_call_operand.vmem [shape: bf16[2,3,64], index: 1, kind: input, shape index: {}]   ;;  %s2955_s2 = inlined_call_operand.vmem [shape: f32[1,64], index: 2, kind: input, shape index: {}]   ;;  %s2956_s3 = inlined_call_operand.vmem [shape: bf16[64,64], index: 3, kind: input, shape index: {}]   ;;  %s2957_s4 = inlined_call_operand.vmem [shape: f32[1,64], index: 4, kind: input, shape index: {}]   ;;  %s2958_s5 = inlined_call_operand.vmem [shape: bf16[64,128], index: 5, kind: input, shape index: {}]   ;;  %s2959_s6 = inlined_call_operand.vmem [shape: f32[1,128], index: 6, kind: input, shape index: {}]   ;;  %s2960_s7 = inlined_call_operand.vmem [shape: bf16[128,1024], index: 7, kind: input, shape index: {}]   ;;  %s2961_s8 = inlined_call_operand.vmem [shape: f32[1,1024], index: 8, kind: input, shape index: {}]   ;;  %s2962_s9 = inlined_call_operand.vmem [shape: f32[2,1,1024], index: 9, kind: output, shape index: {}]  }
   0x1   :  { %s2526_s11 = smov 0  }
   0x2 LB: > { %s31_s12 = sadd.s32 1, %s2463_s10  ;;  %p2186_p0 = scmp.ge.s32.totalorder %s2467_s11, 1  ;;  %s2467_s11 = sphi %s2526_s11, %s19_s11   ;;  %s2463_s10 = sphi %s2524_s10, %s2964_s10   ;;  %s2459_s30 = sphi %s2522_s30, %s2963_s30  }
   0x3   : > { %p33_p1 = scmp.ge.s32.totalorder %s31_s12, 2  ;;  %p315_p2 = scmp.lt.s32.totalorder %s2467_s11, 3 }
   0x5   : > { %s2966_s12 = smov (%p33_p1, %s31_s12), 0  ;;  %p316_p3 = pnand %p2186_p0, %p315_p2 }
   0x6   : > { %p359_p4 = scmp.lt.s32.totalorder (!%p316_p3), %s2459_s30, 1  ;;  %vm466_vm0 = vcmask (!%p316_p3), 1040384   ;;  %vm467_vm1 = vcmask (!%p316_p3), 1041408   ;;  %v2469_v0 = vmov (!%p316_p3), 65535   ;;  %vm441_vm2 = vcmask (!%p316_p3), 23552   ;;  %v2437_v3 = vld [vmem:[%s2956_s3] sm:$0xff] (!%p316_p3)  }
   0x7   : > { %319 = sbr.rel (%p316_p3) target bundleno = 1053 (0x41d), region = 56  ;;  %v468_v1 = vsel (!%p316_p3), %vm466_vm0, 4294967295, %v2469_v0  ;;  %v2438_v9 = vld [vmem:[%s2956_s3 + $0x8] sm:$0xff] (!%p316_p3)   ;;  %v2439_v15 = vld [vmem:[%s2956_s3 + $0x10] sm:$0xff] (!%p316_p3)   ;;  %v2440_v16 = vld [vmem:[%s2956_s3 + $0x18] sm:$0xff] (!%p316_p3)   ;;  %vm633_vm3 = vcmask (!%p316_p3), 523264  }
   0x8   : > { %v469_v2 = vsel (!%p316_p3), %vm467_vm1, %v468_v1, 0  ;;  %v2441_v17 = vld [vmem:[%s2958_s5] sm:$0xff] (!%p316_p3)   ;;  %v2442_v18 = vld [vmem:[%s2958_s5 + $0x8] sm:$0xff] (!%p316_p3)  }
   0x9   : > { %v2191_v19 = vld [vmem:[%s2955_s2] ss:$0 sm:$0xff] (!%p316_p3) }
   0xe   : > { %s2968_s30 = smov (!%p359_p4, %s2459_s30), 1 }
   0xf   : > { %s2300_s13 = sshll.u32 %s2968_s30, 6  ;;  %s2189_s14 = sshll.u32 %s2968_s30, 1 }
  0x10   : > { %s366_s17 = scalar_lea.vmem %s2953_s0, %s2300_s13  ;;  %s371_s20 = scalar_lea.vmem %s2954_s1, %s2189_s14 }
  0x11   : > { %v393_v4 = vld [vmem:[%s371_s20] sm:$0x3]  ;;  %v2430_v7 = vld [vmem:[%s366_s17 + $0x8] sm:$0xff]   ;;  %v2431_v8 = vld [vmem:[%s366_s17 + $0x10] sm:$0xff]   ;;  %s2190_s20 = sshll.u32 %s2968_s30, 3 }
  0x12   : > { %v2429_v5 = vld [vmem:[%s366_s17] sm:$0xff]   ;;  %v471_v6 = vand.u32 %v469_v2, %v393_v4  ;;  %v2434_v11 = vld [vmem:[%s366_s17 + $0x28] sm:$0xff]   ;;  %v2435_v12 = vld [vmem:[%s366_s17 + $0x30] sm:$0xff]   ;;  %s375_s23 = scalar_lea.vmem %s2962_s9, %s2190_s20 }
  0x13   : > { %2336 = vmatprep.mubr.msk.bf16.mxu0 %vm441_vm2, %v2429_v5  ;;  %v2433_v10 = vld [vmem:[%s366_s17 + $0x20] sm:$0xff]   ;;  %v2432_v13 = vld [vmem:[%s366_s17 + $0x18] sm:$0xff]  }
  0x14   : > { %2334 = vmatprep.subr.bf16.mxu0 %v471_v6  ;;  %2400 = vmatprep.subr.bf16.mxu1 %v471_v6  ;;  %v2436_v14 = vld [vmem:[%s366_s17 + $0x38] sm:$0xff]  }
  0x15   : > { %2335 = vmatpush3.bf16.msra.mxu0 %v471_v6  ;;  %2401 = vmatpush3.bf16.msra.mxu1 %v471_v6 }
  0x16   : > { %2352 = vmatprep.subr.bf16.mxu1 %v2437_v3  ;;  %2344 = vmatprep.mubr.msk.bf16.mxu1 %vm441_vm2, %v2433_v10 }
  0x17   : > { %2376 = vmatprep.subr.bf16.mxu0 %v2441_v17 }
  0x18   : > { %2337 = vmatmul.mubr.msk.bf16.vlgmr.msra.gmra.mrb[0].mxu0 %vm441_vm2, %v2430_v7  ;;  %2345 = vmatmul.mubr.msk.bf16.vlgmr.msra.gmra.mrb[0].mxu1 %vm441_vm2, %v2434_v11 }
  0x19   : > { %2340 = vmatprep.mubr.msk.bf16.mxu0 %vm441_vm2, %v2431_v8  ;;  %2348 = vmatprep.mubr.msk.bf16.mxu1 %vm441_vm2, %v2435_v12  ;;  %v2443_v12 = vld [vmem:[%s2958_s5 + $0x10] sm:$0xff]  }
  0x1a   : > { %2353 = vmatpush3.bf16.msra.mxu1 %v2437_v3  ;;  %2377 = vmatpush3.bf16.msra.mxu0 %v2441_v17 }
  0x1b   : > { %2354 = vmatprep.subr.bf16.mxu1 %v2438_v9  ;;  %2378 = vmatprep.subr.bf16.mxu0 %v2442_v18 }
  0x1e   : > { %2355 = vmatpush3.bf16.msra.mxu1 %v2438_v9  ;;  %2379 = vmatpush3.bf16.msra.mxu0 %v2442_v18 }
  0x1f   : > { %2356 = vmatprep.subr.bf16.mxu1 %v2439_v15  ;;  %2380 = vmatprep.subr.bf16.mxu0 %v2443_v12 }
  0x20   : > { %2341 = vmatmul.mubr.msk.bf16.gmra.mrb[4].mxu0 %vm441_vm2, %v2432_v13  ;;  %2349 = vmatmul.mubr.msk.bf16.gmra.mrb[4].mxu1 %vm441_vm2, %v2436_v14  ;;  %v2444_v13 = vld [vmem:[%s2958_s5 + $0x18] sm:$0xff]   ;;  %v963_v14 = vld [vmem:[%s2960_s7] sm:$0xff] }
  0x22   : > { %2357 = vmatpush3.bf16.msra.mxu1 %v2439_v15  ;;  %2381 = vmatpush3.bf16.msra.mxu0 %v2443_v12  ;;  %v967_v15 = vld [vmem:[%s2960_s7 + $0x20] sm:$0xff]  ;;  %v988_v12 = vld [vmem:[%s2960_s7 + $0xc8] sm:$0xff] }
  0x23   : > { %2358 = vmatprep.subr.bf16.mxu1 %v2440_v16  ;;  %2382 = vmatprep.subr.bf16.mxu0 %v2444_v13  ;;  %v2234_v17 = vcombine.low %v963_v14, %v967_v15  ;;  %v2235_v18 = vcombine.high %v963_v14, %v967_v15 }
  0x26   : > { %2359 = vmatpush3.bf16.msra.mxu1 %v2440_v16  ;;  %2383 = vmatpush3.bf16.msra.mxu0 %v2444_v13  ;;  %v2602_v16 = vld [vmem:[%s2960_s7 + $0x8] sm:$0xff] }
  0x27   : > { %1347 = vmatprep.subr.bf16.mxu1 %v2235_v18  ;;  %v992_v13 = vld [vmem:[%s2960_s7 + $0xe8] sm:$0xff] }
  0xeb   : > { %v2338_v20 = vpop.f32.mrb[0].mxu0  ;;  %v2346_v23 = vpop.f32.mrb[0].mxu1 }
  0xec   : > { %v516_v21 = vadd.f32 %v2338_v20, %v2191_v19  ;;  %v507_v22 = vpop.f32.mrb[1].mxu0  ;;  %v548_v26 = vadd.f32 %v2346_v23, %v2191_v19  ;;  %v539_v27 = vpop.f32.mrb[1].mxu1  ;;  %v971_v20 = vld [vmem:[%s2960_s7 + $0x40] sm:$0xff] }
  0xed   : > { %v508_v24 = vadd.f32 %v2191_v19, %v507_v22  ;;  %v2339_v25 = vpop.f32.mrb[2].mxu0  ;;  %v540_v30 = vadd.f32 %v2191_v19, %v539_v27  ;;  %v2347_v31 = vpop.f32.mrb[2].mxu1 }
  0xee   : > { %v519_v28 = vadd.f32 %v2339_v25, %v2191_v19  ;;  %v510_v29 = vpop.f32.mrb[3].mxu0  ;;  %v580_v33 = vmax.f32 %v548_v26, 0.0  ;;  %v551_v34 = vadd.f32 %v2347_v31, %v2191_v19  ;;  %v542_v35 = vpop.f32.mrb[3].mxu1  ;;  %v572_v36 = vmax.f32 %v516_v21, 0.0  ;;  %v975_v21 = vld [vmem:[%s2960_s7 + $0x60] sm:$0xff] }
  0xef   : > { %v511_v32 = vadd.f32 %v2191_v19, %v510_v29  ;;  %v578_v38 = vmax.f32 %v540_v30, 0.0  ;;  %v543_v39 = vadd.f32 %v2191_v19, %v542_v35  ;;  %v570_v40 = vmax.f32 %v508_v24, 0.0  ;;  %v979_v25 = vld [vmem:[%s2960_s7 + $0x80] sm:$0xff] }
  0xf0   : > { %v573_v37 = vmax.f32 %v519_v28, 0.0  ;;  %v581_v42 = vmax.f32 %v551_v34, 0.0  ;;  %v2243_v24 = vcombine.high %v971_v20, %v975_v21  ;;  %v983_v26 = vld [vmem:[%s2960_s7 + $0xa0] sm:$0xff]  ;;  %v2242_v27 = vcombine.low %v971_v20, %v975_v21 }
  0xf1   : > { %v571_v41 = vmax.f32 %v511_v32, 0.0  ;;  %v579_v44 = vmax.f32 %v543_v39, 0.0  ;;  %v2251_v28 = vcombine.high %v979_v25, %v983_v26  ;;  %v987_v29 = vld [vmem:[%s2960_s7 + $0xc0] sm:$0xff]  ;;  %v2250_v31 = vcombine.low %v979_v25, %v983_v26 }
  0xf2   : > { %v587_v43 = vpack.c.bf16 %v573_v37, %v572_v36  ;;  %v591_v47 = vpack.c.bf16 %v581_v42, %v580_v33  ;;  %v991_v30 = vld [vmem:[%s2960_s7 + $0xe0] sm:$0xff]  ;;  %v2261_v20 = vcombine.high %v988_v12, %v992_v13 }
  0xf3   : > { %v586_v45 = vpack.c.bf16 %v571_v41, %v570_v40  ;;  %v2342_v46 = vpop.f32.mrb[4].mxu0  ;;  %v590_v50 = vpack.c.bf16 %v579_v44, %v578_v38  ;;  %v2350_v51 = vpop.f32.mrb[4].mxu1  ;;  %v2259_v32 = vcombine.high %v987_v29, %v991_v30  ;;  %v995_v33 = vld [vmem:[%s2960_s7 + $0x100] sm:$0xff]  ;;  %v2258_v35 = vcombine.low %v987_v29, %v991_v30 }
  0xf4   : > { %v532_v48 = vadd.f32 %v2342_v46, %v2191_v19  ;;  %v523_v49 = vpop.f32.mrb[5].mxu0  ;;  %v564_v54 = vadd.f32 %v2350_v51, %v2191_v19  ;;  %v555_v55 = vpop.f32.mrb[5].mxu1  ;;  %v999_v34 = vld [vmem:[%s2960_s7 + $0x120] sm:$0xff]  ;;  %v2260_v30 = vcombine.low %v988_v12, %v992_v13  ;;  %v970_v13 = vld [vmem:[%s2960_s7 + $0x38] sm:$0xff] }
  0xf5   : > { %v524_v52 = vadd.f32 %v2191_v19, %v523_v49  ;;  %v2343_v53 = vpop.f32.mrb[6].mxu0  ;;  %2360 = vmatprep.mubr.msk.bf16.mxu1 %vm633_vm3, %v586_v45  ;;  %v556_v59 = vadd.f32 %v2191_v19, %v555_v55  ;;  %v2351_v60 = vpop.f32.mrb[6].mxu1  ;;  %v2267_v36 = vcombine.high %v995_v33, %v999_v34  ;;  %v1003_v37 = vld [vmem:[%s2960_s7 + $0x140] sm:$0xff]  ;;  %v2266_v39 = vcombine.low %v995_v33, %v999_v34  ;;  %v972_v55 = vld [vmem:[%s2960_s7 + $0x48] sm:$0xff] }
  0xf6   : > { %v576_v56 = vmax.f32 %v532_v48, 0.0  ;;  %v535_v57 = vadd.f32 %v2343_v53, %v2191_v19  ;;  %v526_v58 = vpop.f32.mrb[7].mxu0  ;;  %2361 = vmatmul.mubr.msk.bf16.vlgmr.msra.gmra.mrb[8].mxu1 %vm633_vm3, %v587_v43  ;;  %v584_v63 = vmax.f32 %v564_v54, 0.0  ;;  %v567_v0 = vadd.f32 %v2351_v60, %v2191_v19  ;;  %v558_v1 = vpop.f32.mrb[7].mxu1  ;;  %v1007_v38 = vld [vmem:[%s2960_s7 + $0x160] sm:$0xff]  ;;  %v1004_v34 = vld [vmem:[%s2960_s7 + $0x148] sm:$0xff] }
  0xf7   : > { %v574_v61 = vmax.f32 %v524_v52, 0.0  ;;  %v527_v62 = vadd.f32 %v2191_v19, %v526_v58  ;;  %v582_v3 = vmax.f32 %v556_v59, 0.0  ;;  %v559_v4 = vadd.f32 %v2191_v19, %v558_v1  ;;  %v2607_v19 = vld [vmem:[%s2960_s7 + $0x28] sm:$0xff]  ;;  %1348 = vmatpush1.bf16.msra.mxu1 %v2234_v17  ;;  %v2646_v42 = vld [vmem:[%s2957_s4] ss:$0 sm:$0xff] }
  0xf8   : > { %v577_v2 = vmax.f32 %v535_v57, 0.0  ;;  %v585_v6 = vmax.f32 %v567_v0, 0.0  ;;  %v2236_v22 = vcombine.low %v2602_v16, %v2607_v19  ;;  %v2237_v23 = vcombine.high %v2602_v16, %v2607_v19  ;;  %1349 = vmatprep.subr.bf16.mxu1 %v2243_v24  ;;  %v980_v1 = vld [vmem:[%s2960_s7 + $0x88] sm:$0xff] }
  0xf9   : > { %v575_v5 = vmax.f32 %v527_v62, 0.0  ;;  %v583_v8 = vmax.f32 %v559_v4, 0.0  ;;  %v2275_v40 = vcombine.high %v1003_v37, %v1007_v38  ;;  %v2274_v41 = vcombine.low %v1003_v37, %v1007_v38  ;;  %v1000_v24 = vld [vmem:[%s2960_s7 + $0x128] sm:$0xff] }
  0xfa   : > { %v589_v7 = vpack.c.bf16 %v577_v2, %v576_v56  ;;  %v593_v10 = vpack.c.bf16 %v585_v6, %v584_v63  ;;  %1460 = vmatprep.subr.bf16.mxu0 %v2237_v23  ;;  %v976_v56 = vld [vmem:[%s2960_s7 + $0x68] sm:$0xff] }
  0xfb   : > { %v588_v9 = vpack.c.bf16 %v575_v5, %v574_v61  ;;  %v592_v11 = vpack.c.bf16 %v583_v8, %v582_v3  ;;  %1350 = vmatpush1.bf16.msra.mxu1 %v2242_v27  ;;  %v2245_v62 = vcombine.high %v972_v55, %v976_v56  ;;  %v984_v2 = vld [vmem:[%s2960_s7 + $0xa8] sm:$0xff]  ;;  %v2244_v8 = vcombine.low %v972_v55, %v976_v56  ;;  %v1011_v56 = vld [vmem:[%s2960_s7 + $0x180] sm:$0xff] }
  0xfc   : > { %1351 = vmatprep.subr.bf16.mxu1 %v2251_v28  ;;  %v2252_v18 = vcombine.low %v980_v1, %v984_v2  ;;  %v996_v23 = vld [vmem:[%s2960_s7 + $0x108] sm:$0xff] }
  0xfd   : > { %2364 = vmatprep.mubr.msk.bf16.mxu1 %vm633_vm3, %v588_v9 }
  0xfe   : > { %2365 = vmatmul.mubr.msk.bf16.gmra.mrb[12].mxu1 %vm633_vm3, %v589_v7 }
  0xff   : > { %2368 = vmatprep.mubr.msk.bf16.mxu1 %vm633_vm3, %v590_v50  ;;  %1352 = vmatpush1.bf16.msra.mxu1 %v2250_v31 }
 0x100   : > { %1353 = vmatprep.subr.bf16.mxu1 %v2259_v32  ;;  %v2269_v32 = vcombine.high %v996_v23, %v1000_v24 }
 0x103   : > { %1354 = vmatpush1.bf16.msra.mxu1 %v2258_v35  ;;  %v1008_v35 = vld [vmem:[%s2960_s7 + $0x168] sm:$0xff] }
 0x104   : > { %1355 = vmatprep.subr.bf16.mxu1 %v2267_v36 }
 0x106   : > { %2369 = vmatmul.mubr.msk.bf16.gmra.mrb[16].mxu1 %vm633_vm3, %v591_v47 }
 0x107   : > { %2372 = vmatprep.mubr.msk.bf16.mxu1 %vm633_vm3, %v592_v11  ;;  %1356 = vmatpush1.bf16.msra.mxu1 %v2266_v39  ;;  %v2268_v39 = vcombine.low %v996_v23, %v1000_v24 }
 0x108   : > { %1357 = vmatprep.subr.bf16.mxu1 %v2275_v40 }
 0x10b   : > { %1358 = vmatpush1.bf16.msra.mxu1 %v2274_v41 }
 0x10e   : > { %2373 = vmatmul.mubr.msk.bf16.gmra.mrb[20].mxu1 %vm633_vm3, %v593_v10  ;;  %v2253_v10 = vcombine.high %v980_v1, %v984_v2  ;;  %v1020_v1 = vld [vmem:[%s2960_s7 + $0x1c8] sm:$0xff] }
 0x1c9   : > { %v2362_v43 = vpop.f32.mrb[8].mxu1 }
 0x1ca   : > { %v701_v44 = vadd.f32 %v2362_v43, %v2646_v42  ;;  %v692_v45 = vpop.f32.mrb[9].mxu1  ;;  %v2277_v43 = vcombine.high %v1004_v34, %v1008_v35 }
 0x1cb   : > { %v693_v46 = vadd.f32 %v2646_v42, %v692_v45  ;;  %v2363_v47 = vpop.f32.mrb[10].mxu1 }
 0x1cc   : > { %v704_v48 = vadd.f32 %v2363_v47, %v2646_v42  ;;  %v695_v49 = vpop.f32.mrb[11].mxu1  ;;  %v757_v51 = vmax.f32 %v701_v44, 0.0 }
 0x1cd   : > { %v696_v50 = vadd.f32 %v2646_v42, %v695_v49  ;;  %v755_v53 = vmax.f32 %v693_v46, 0.0 }
 0x1ce   : > { %v758_v52 = vmax.f32 %v704_v48, 0.0 }
 0x1cf   : > { %v756_v54 = vmax.f32 %v696_v50, 0.0 }
 0x1d0   : > { %v772_v57 = vpack.c.bf16 %v758_v52, %v757_v51  ;;  %v2276_v51 = vcombine.low %v1004_v34, %v1008_v35 }
 0x1d1   : > { %v771_v58 = vpack.c.bf16 %v756_v54, %v755_v53  ;;  %v2366_v59 = vpop.f32.mrb[12].mxu1 }
 0x1d2   : > { %v717_v60 = vadd.f32 %v2366_v59, %v2646_v42  ;;  %v708_v61 = vpop.f32.mrb[13].mxu1  ;;  %v1016_v59 = vld [vmem:[%s2960_s7 + $0x1a8] sm:$0xff] }
 0x1d3   : > { %v709_v63 = vadd.f32 %v2646_v42, %v708_v61  ;;  %v2367_v0 = vpop.f32.mrb[14].mxu1  ;;  %2384 = vmatprep.mubr.msk.bf16.mxu0 %vm633_vm3, %v771_v58 }
 0x1d4   : > { %v761_v3 = vmax.f32 %v717_v60, 0.0  ;;  %v720_v4 = vadd.f32 %v2367_v0, %v2646_v42  ;;  %v711_v5 = vpop.f32.mrb[15].mxu1  ;;  %2385 = vmatmul.mubr.msk.bf16.vlgmr.msra.gmra.mrb[8].mxu0 %vm633_vm3, %v772_v57  ;;  %v1012_v57 = vld [vmem:[%s2960_s7 + $0x188] sm:$0xff]  ;;  %v1023_v0 = vld [vmem:[%s2960_s7 + $0x1e0] sm:$0xff] }
 0x1d5   : > { %v759_v6 = vmax.f32 %v709_v63, 0.0  ;;  %v712_v7 = vadd.f32 %v2646_v42, %v711_v5  ;;  %1461 = vmatpush1.bf16.msra.mxu0 %v2236_v22  ;;  %v2284_v61 = vcombine.low %v1012_v57, %v1016_v59  ;;  %v1019_v63 = vld [vmem:[%s2960_s7 + $0x1c0] sm:$0xff] }
 0x1d6   : > { %v762_v9 = vmax.f32 %v720_v4, 0.0  ;;  %1462 = vmatprep.subr.bf16.mxu0 %v2245_v62  ;;  %v2285_v62 = vcombine.high %v1012_v57, %v1016_v59  ;;  %v2291_v2 = vcombine.high %v1019_v63, %v1023_v0  ;;  %v2290_v4 = vcombine.low %v1019_v63, %v1023_v0  ;;  %v990_v59 = vld [vmem:[%s2960_s7 + $0xd8] sm:$0xff] }
 0x1d7   : > { %v760_v11 = vmax.f32 %v712_v7, 0.0  ;;  %v2470_v7 = vmov 0  }
 0x1d8   : > { %v774_v14 = vpack.c.bf16 %v762_v9, %v761_v3  ;;  %v1024_v3 = vld [vmem:[%s2960_s7 + $0x1e8] sm:$0xff]  ;;  %1379 = vmatprep.mubr.bf16.mxu1 %v2470_v7  ;;  %v969_v9 = vld [vmem:[%s2960_s7 + $0x30] sm:$0xff] }
 0x1d9   : > { %v773_v15 = vpack.c.bf16 %v760_v11, %v759_v6  ;;  %v2370_v17 = vpop.f32.mrb[16].mxu1  ;;  %1463 = vmatpush1.bf16.msra.mxu0 %v2244_v8  ;;  %v2292_v5 = vcombine.low %v1020_v1, %v1024_v3  ;;  %v2293_v6 = vcombine.high %v1020_v1, %v1024_v3  ;;  %v965_v8 = vld [vmem:[%s2960_s7 + $0x10] sm:$0xff] }
 0x1da   : > { %v733_v16 = vadd.f32 %v2370_v17, %v2646_v42  ;;  %v724_v19 = vpop.f32.mrb[17].mxu1  ;;  %1464 = vmatprep.subr.bf16.mxu0 %v2253_v10  ;;  %v966_v10 = vld [vmem:[%s2960_s7 + $0x18] sm:$0xff]  ;;  %v2238_v11 = vcombine.low %v965_v8, %v969_v9  ;;  %v2239_v12 = vcombine.high %v965_v8, %v969_v9  ;;  %v2746_v17 = vld [vmem:[%s2959_s6] ss:$0 sm:$0xff] }
 0x1db   : > { %2388 = vmatprep.mubr.msk.bf16.mxu0 %vm633_vm3, %v773_v15  ;;  %v725_v21 = vadd.f32 %v2646_v42, %v724_v19  ;;  %v2371_v22 = vpop.f32.mrb[18].mxu1  ;;  %v2241_v15 = vcombine.high %v966_v10, %v970_v13 }
 0x1dc   : > { %2389 = vmatmul.mubr.msk.bf16.gmra.mrb[12].mxu0 %vm633_vm3, %v774_v14  ;;  %v765_v25 = vmax.f32 %v733_v16, 0.0  ;;  %v736_v26 = vadd.f32 %v2371_v22, %v2646_v42  ;;  %v727_v27 = vpop.f32.mrb[19].mxu1  ;;  %v2240_v14 = vcombine.low %v966_v10, %v970_v13  ;;  %v1001_v10 = vld [vmem:[%s2960_s7 + $0x130] sm:$0xff] }
 0x1dd   : > { %v763_v28 = vmax.f32 %v725_v21, 0.0  ;;  %v728_v29 = vadd.f32 %v2646_v42, %v727_v27  ;;  %1465 = vmatpush1.bf16.msra.mxu0 %v2252_v18  ;;  %v973_v27 = vld [vmem:[%s2960_s7 + $0x50] sm:$0xff] }
 0x1de   : > { %v766_v31 = vmax.f32 %v736_v26, 0.0  ;;  %1466 = vmatprep.subr.bf16.mxu0 %v2261_v20 }
 0x1df   : > { %v764_v33 = vmax.f32 %v728_v29, 0.0 }
 0x1e0   : > { %v776_v36 = vpack.c.bf16 %v766_v31, %v765_v25  ;;  %v974_v31 = vld [vmem:[%s2960_s7 + $0x58] sm:$0xff] }
 0x1e1   : > { %v775_v37 = vpack.c.bf16 %v764_v33, %v763_v28  ;;  %v2374_v38 = vpop.f32.mrb[20].mxu1  ;;  %1467 = vmatpush1.bf16.msra.mxu0 %v2260_v30  ;;  %v977_v30 = vld [vmem:[%s2960_s7 + $0x70] sm:$0xff] }
 0x1e2   : > { %v749_v40 = vadd.f32 %v2374_v38, %v2646_v42  ;;  %v740_v41 = vpop.f32.mrb[21].mxu1  ;;  %1468 = vmatprep.subr.bf16.mxu0 %v2269_v32  ;;  %v978_v32 = vld [vmem:[%s2960_s7 + $0x78] sm:$0xff] }
 0x1e3   : > { %2392 = vmatprep.mubr.msk.bf16.mxu0 %vm633_vm3, %v775_v37  ;;  %v741_v44 = vadd.f32 %v2646_v42, %v740_v41  ;;  %v2375_v45 = vpop.f32.mrb[22].mxu1  ;;  %v985_v41 = vld [vmem:[%s2960_s7 + $0xb0] sm:$0xff] }
 0x1e4   : > { %2393 = vmatmul.mubr.msk.bf16.gmra.mrb[16].mxu0 %vm633_vm3, %v776_v36  ;;  %v769_v46 = vmax.f32 %v749_v40, 0.0  ;;  %v752_v47 = vadd.f32 %v2375_v45, %v2646_v42  ;;  %v743_v48 = vpop.f32.mrb[23].mxu1  ;;  %v981_v36 = vld [vmem:[%s2960_s7 + $0x90] sm:$0xff]  ;;  %v2249_v40 = vcombine.high %v974_v31, %v978_v32 }
 0x1e5   : > { %v767_v49 = vmax.f32 %v741_v44, 0.0  ;;  %v744_v50 = vadd.f32 %v2646_v42, %v743_v48  ;;  %1469 = vmatpush1.bf16.msra.mxu0 %v2268_v39  ;;  %v1015_v42 = vld [vmem:[%s2960_s7 + $0x1a0] sm:$0xff]  ;;  %v2247_v39 = vcombine.high %v973_v27, %v977_v30  ;;  %v986_v44 = vld [vmem:[%s2960_s7 + $0xb8] sm:$0xff]  ;;  %v2254_v0 = vcombine.low %v981_v36, %v985_v41 }
 0x1e6   : > { %v770_v52 = vmax.f32 %v752_v47, 0.0  ;;  %1470 = vmatprep.subr.bf16.mxu0 %v2277_v43  ;;  %v2283_v58 = vcombine.high %v1011_v56, %v1015_v42  ;;  %v2282_v60 = vcombine.low %v1011_v56, %v1015_v42  ;;  %v982_v43 = vld [vmem:[%s2960_s7 + $0x98] sm:$0xff]  ;;  %v989_v56 = vld [vmem:[%s2960_s7 + $0xd0] sm:$0xff] }
 0x1e7   : > { %v768_v53 = vmax.f32 %v744_v50, 0.0  ;;  %v2248_v50 = vcombine.low %v974_v31, %v978_v32  ;;  %v2256_v1 = vcombine.low %v982_v43, %v986_v44 }
 0x1e8   : > { %v778_v54 = vpack.c.bf16 %v770_v52, %v769_v46  ;;  %1359 = vmatprep.subr.bf16.mxu1 %v2283_v58  ;;  %v2255_v52 = vcombine.high %v981_v36, %v985_v41  ;;  %v993_v58 = vld [vmem:[%s2960_s7 + $0xf0] sm:$0xff] }
 0x1e9   : > { %v777_v55 = vpack.c.bf16 %v768_v53, %v767_v49  ;;  %1471 = vmatpush1.bf16.msra.mxu0 %v2276_v51  ;;  %1360 = vmatpush1.bf16.msra.mxu1 %v2282_v60  ;;  %v2246_v49 = vcombine.low %v973_v27, %v977_v30  ;;  %v2257_v53 = vcombine.high %v982_v43, %v986_v44  ;;  %v994_v60 = vld [vmem:[%s2960_s7 + $0xf8] sm:$0xff]  ;;  %v1017_v44 = vld [vmem:[%s2960_s7 + $0x1b0] sm:$0xff] }
 0x1ea   : > { %1472 = vmatprep.subr.bf16.mxu0 %v2285_v62  ;;  %1361 = vmatprep.subr.bf16.mxu1 %v2291_v2  ;;  %v1006_v27 = vld [vmem:[%s2960_s7 + $0x158] sm:$0xff] }
 0x1eb   : > { %2396 = vmatprep.mubr.msk.bf16.mxu0 %vm633_vm3, %v777_v55 }
 0x1ec   : > { %2397 = vmatmul.mubr.msk.bf16.gmra.mrb[20].mxu0 %vm633_vm3, %v778_v54 }
 0x1ed   : > { %1473 = vmatpush1.bf16.msra.mxu0 %v2284_v61  ;;  %1362 = vmatpush1.bf16.msra.mxu1 %v2290_v4  ;;  %v2263_v4 = vcombine.high %v989_v56, %v993_v58 }
 0x1ee   : > { %1474 = vmatprep.subr.bf16.mxu0 %v2293_v6  ;;  %1492 = vmatprep.mubr.bf16.mxu0 %v2470_v7  ;;  %v997_v6 = vld [vmem:[%s2960_s7 + $0x110] sm:$0xff] }
 0x1ef   : > { %1573 = vmatprep.subr.bf16.mxu1 %v2239_v12  ;;  %v1002_v12 = vld [vmem:[%s2960_s7 + $0x138] sm:$0xff]  ;;  %v2270_v32 = vcombine.low %v997_v6, %v1001_v10 }
 0x1f1   : > { %1475 = vmatpush1.bf16.msra.mxu0 %v2292_v5  ;;  %v2265_v5 = vcombine.high %v990_v59, %v994_v60 }
 0x1f2   : > { %1686 = vmatprep.subr.bf16.mxu0 %v2241_v15 }
 0x2a7   : > { %v2386_v18 = vpop.f32.mrb[8].mxu0 }
 0x2a8   : > { %v885_v16 = vadd.f32 %v2386_v18, %v2746_v17  ;;  %v876_v19 = vpop.f32.mrb[9].mxu0 }
 0x2a9   : > { %v877_v20 = vadd.f32 %v2746_v17, %v876_v19  ;;  %v2387_v21 = vpop.f32.mrb[10].mxu0  ;;  %v2262_v19 = vcombine.low %v989_v56, %v993_v58  ;;  %v1025_v58 = vld [vmem:[%s2960_s7 + $0x1f0] sm:$0xff] }
 0x2aa   : > { %v888_v22 = vadd.f32 %v2387_v21, %v2746_v17  ;;  %v879_v23 = vpop.f32.mrb[11].mxu0  ;;  %v941_v25 = vmax.f32 %v885_v16, 0.0 }
 0x2ab   : > { %v880_v24 = vadd.f32 %v2746_v17, %v879_v23  ;;  %v939_v28 = vmax.f32 %v877_v20, 0.0  ;;  %v2264_v20 = vcombine.low %v990_v59, %v994_v60  ;;  %v1026_v59 = vld [vmem:[%s2960_s7 + $0x1f8] sm:$0xff] }
 0x2ac   : > { %v942_v26 = vmax.f32 %v888_v22, 0.0  ;;  %v2271_v22 = vcombine.high %v997_v6, %v1001_v10 }
 0x2ad   : > { %v940_v29 = vmax.f32 %v880_v24, 0.0  ;;  %v1005_v24 = vld [vmem:[%s2960_s7 + $0x150] sm:$0xff] }
 0x2ae   : > { %v2764_v33 = vpack.c.bf16 %v942_v26, %v941_v25  ;;  %v1009_v26 = vld [vmem:[%s2960_s7 + $0x170] sm:$0xff] }
 0x2af   : > { %v2766_v34 = vpack.c.bf16 %v940_v29, %v939_v28  ;;  %v2390_v35 = vpop.f32.mrb[12].mxu0  ;;  %v1010_v28 = vld [vmem:[%s2960_s7 + $0x178] sm:$0xff] }
 0x2b0   : > { %v901_v37 = vadd.f32 %v2390_v35, %v2746_v17  ;;  %v892_v38 = vpop.f32.mrb[13].mxu0 }
 0x2b1   : > { %v893_v45 = vadd.f32 %v2746_v17, %v892_v38  ;;  %v2391_v46 = vpop.f32.mrb[14].mxu0  ;;  %1380 = vmatmul.mubr.bf16.vlgmr.msra.gmra.mrb[24].mxu1 %v2766_v34  ;;  %1493 = vmatmul.mubr.bf16.vlgmr.msra.gmra.mrb[24].mxu0 %v2766_v34  ;;  %v2279_v38 = vcombine.high %v1005_v24, %v1009_v26 }
 0x2b2   : > { %v904_v47 = vadd.f32 %v2391_v46, %v2746_v17  ;;  %1574 = vmatpush1.bf16.msra.mxu1 %v2238_v11  ;;  %1687 = vmatpush1.bf16.msra.mxu0 %v2240_v14  ;;  %v895_v48 = vpop.f32.mrb[15].mxu0  ;;  %v945_v54 = vmax.f32 %v901_v37, 0.0  ;;  %v998_v11 = vld [vmem:[%s2960_s7 + $0x118] sm:$0xff] }
 0x2b3   : > { %v896_v51 = vadd.f32 %v2746_v17, %v895_v48  ;;  %1389 = vmatprep.mubr.bf16.mxu1 %v2470_v7  ;;  %1502 = vmatprep.mubr.bf16.mxu0 %v2470_v7  ;;  %v943_v42 = vmax.f32 %v893_v45, 0.0  ;;  %v2273_v23 = vcombine.high %v998_v11, %v1002_v12  ;;  %v2272_v35 = vcombine.low %v998_v11, %v1002_v12  ;;  %v1014_v45 = vld [vmem:[%s2960_s7 + $0x198] sm:$0xff] }
 0x2b4   : > { %v946_v55 = vmax.f32 %v904_v47, 0.0  ;;  %1575 = vmatprep.subr.bf16.mxu1 %v2247_v39  ;;  %1688 = vmatprep.subr.bf16.mxu0 %v2249_v40  ;;  %v2281_v39 = vcombine.high %v1006_v27, %v1010_v28  ;;  %v1013_v40 = vld [vmem:[%s2960_s7 + $0x190] sm:$0xff]  ;;  %v1018_v46 = vld [vmem:[%s2960_s7 + $0x1b8] sm:$0xff] }
 0x2b5   : > { %v944_v57 = vmax.f32 %v896_v51, 0.0  ;;  %v2289_v56 = vcombine.high %v1014_v45, %v1018_v46 }
 0x2b6   : > { %v2800_v61 = vpack.c.bf16 %v946_v55, %v945_v54  ;;  %1576 = vmatpush1.bf16.msra.mxu1 %v2246_v49  ;;  %1689 = vmatpush1.bf16.msra.mxu0 %v2248_v50  ;;  %v2287_v55 = vcombine.high %v1013_v40, %v1017_v44 }
 0x2b7   : > { %v2802_v62 = vpack.c.bf16 %v944_v57, %v943_v42  ;;  %v2394_v63 = vpop.f32.mrb[16].mxu0  ;;  %1577 = vmatprep.subr.bf16.mxu1 %v2255_v52  ;;  %1690 = vmatprep.subr.bf16.mxu0 %v2257_v53  ;;  %v2278_v52 = vcombine.low %v1005_v24, %v1009_v26  ;;  %v2280_v53 = vcombine.low %v1006_v27, %v1010_v28  ;;  %v1021_v42 = vld [vmem:[%s2960_s7 + $0x1d0] sm:$0xff] }
 0x2b8   : > { %v917_v2 = vadd.f32 %v2394_v63, %v2746_v17  ;;  %v908_v3 = vpop.f32.mrb[17].mxu0 }
 0x2b9   : > { %1390 = vmatmul.mubr.bf16.gmra.mrb[28].mxu1 %v2764_v33  ;;  %1503 = vmatmul.mubr.bf16.gmra.mrb[28].mxu0 %v2764_v33  ;;  %v909_v8 = vadd.f32 %v2746_v17, %v908_v3  ;;  %v2395_v9 = vpop.f32.mrb[18].mxu0 }
 0x2ba   : > { %v949_v13 = vmax.f32 %v917_v2, 0.0  ;;  %v920_v14 = vadd.f32 %v2395_v9, %v2746_v17  ;;  %v911_v15 = vpop.f32.mrb[19].mxu0  ;;  %1399 = vmatprep.mubr.bf16.mxu1 %v2470_v7  ;;  %1512 = vmatprep.mubr.bf16.mxu0 %v2470_v7  ;;  %v2295_v2 = vcombine.high %v1021_v42, %v1025_v58 }
 0x2bb   : > { %v947_v18 = vmax.f32 %v909_v8, 0.0  ;;  %v912_v16 = vadd.f32 %v2746_v17, %v911_v15  ;;  %1578 = vmatpush1.bf16.msra.mxu1 %v2254_v0  ;;  %1691 = vmatpush1.bf16.msra.mxu0 %v2256_v1  ;;  %v2286_v0 = vcombine.low %v1013_v40, %v1017_v44  ;;  %v2288_v1 = vcombine.low %v1014_v45, %v1018_v46 }
 0x2bc   : > { %v950_v21 = vmax.f32 %v920_v14, 0.0  ;;  %1579 = vmatprep.subr.bf16.mxu1 %v2263_v4  ;;  %1692 = vmatprep.subr.bf16.mxu0 %v2265_v5  ;;  %v2294_v4 = vcombine.low %v1021_v42, %v1025_v58 }
 0x2bd   : > { %v948_v25 = vmax.f32 %v912_v16, 0.0 }
 0x2be   : > { %v2836_v29 = vpack.c.bf16 %v950_v21, %v949_v13 }
 0x2bf   : > { %v2838_v30 = vpack.c.bf16 %v948_v25, %v947_v18  ;;  %1580 = vmatpush1.bf16.msra.mxu1 %v2262_v19  ;;  %1693 = vmatpush1.bf16.msra.mxu0 %v2264_v20  ;;  %v2398_v31 = vpop.f32.mrb[20].mxu0 }
 0x2c0   : > { %v933_v36 = vadd.f32 %v2398_v31, %v2746_v17  ;;  %v924_v37 = vpop.f32.mrb[21].mxu0  ;;  %1581 = vmatprep.subr.bf16.mxu1 %v2271_v22  ;;  %1694 = vmatprep.subr.bf16.mxu0 %v2273_v23 }
 0x2c1   : > { %1400 = vmatmul.mubr.bf16.gmra.mrb[32].mxu1 %v2802_v62  ;;  %1513 = vmatmul.mubr.bf16.gmra.mrb[32].mxu0 %v2802_v62  ;;  %v925_v41 = vadd.f32 %v2746_v17, %v924_v37  ;;  %v2399_v43 = vpop.f32.mrb[22].mxu0 }
 0x2c2   : > { %1409 = vmatprep.mubr.bf16.mxu1 %v2470_v7  ;;  %1522 = vmatprep.mubr.bf16.mxu0 %v2470_v7  ;;  %v953_v47 = vmax.f32 %v933_v36, 0.0  ;;  %v936_v48 = vadd.f32 %v2399_v43, %v2746_v17  ;;  %v927_v49 = vpop.f32.mrb[23].mxu0 }
 0x2c3   : > { %v951_v50 = vmax.f32 %v925_v41, 0.0  ;;  %v928_v51 = vadd.f32 %v2746_v17, %v927_v49  ;;  %1582 = vmatpush1.bf16.msra.mxu1 %v2270_v32  ;;  %1695 = vmatpush1.bf16.msra.mxu0 %v2272_v35  ;;  %v1022_v17 = vld [vmem:[%s2960_s7 + $0x1d8] sm:$0xff] }
 0x2c4   : > { %v954_v54 = vmax.f32 %v936_v48, 0.0  ;;  %1583 = vmatprep.subr.bf16.mxu1 %v2279_v38  ;;  %1696 = vmatprep.subr.bf16.mxu0 %v2281_v39  ;;  %v2297_v3 = vcombine.high %v1022_v17, %v1026_v59  ;;  %v2296_v5 = vcombine.low %v1022_v17, %v1026_v59 }
 0x2c5   : > { %v952_v57 = vmax.f32 %v928_v51, 0.0 }
 0x2c6   : > { %v2872_v60 = vpack.c.bf16 %v954_v54, %v953_v47 }
 0x2c7   : > { %v961_v63 = vpack.c.bf16 %v952_v57, %v951_v50  ;;  %1584 = vmatpush1.bf16.msra.mxu1 %v2278_v52  ;;  %1697 = vmatpush1.bf16.msra.mxu0 %v2280_v53 }
 0x2c8   : > { %1585 = vmatprep.subr.bf16.mxu1 %v2287_v55  ;;  %1698 = vmatprep.subr.bf16.mxu0 %v2289_v56 }
 0x2c9   : > { %1410 = vmatmul.mubr.bf16.gmra.mrb[36].mxu1 %v2800_v61  ;;  %1523 = vmatmul.mubr.bf16.gmra.mrb[36].mxu0 %v2800_v61 }
 0x2ca   : > { %1419 = vmatprep.mubr.bf16.mxu1 %v2470_v7  ;;  %1532 = vmatprep.mubr.bf16.mxu0 %v2470_v7 }
 0x2cb   : > { %1586 = vmatpush1.bf16.msra.mxu1 %v2286_v0  ;;  %1699 = vmatpush1.bf16.msra.mxu0 %v2288_v1 }
 0x2cc   : > { %1587 = vmatprep.subr.bf16.mxu1 %v2295_v2  ;;  %1700 = vmatprep.subr.bf16.mxu0 %v2297_v3 }
 0x2cf   : > { %1588 = vmatpush1.bf16.msra.mxu1 %v2294_v4  ;;  %1701 = vmatpush1.bf16.msra.mxu0 %v2296_v5 }
 0x2d1   : > { %1420 = vmatmul.mubr.bf16.gmra.mrb[40].mxu1 %v2838_v30  ;;  %1533 = vmatmul.mubr.bf16.gmra.mrb[40].mxu0 %v2838_v30 }
 0x2d2   : > { %1429 = vmatprep.mubr.bf16.mxu1 %v2470_v7  ;;  %1542 = vmatprep.mubr.bf16.mxu0 %v2470_v7 }
 0x2d9   : > { %1430 = vmatmul.mubr.bf16.gmra.mrb[44].mxu1 %v2836_v29  ;;  %1543 = vmatmul.mubr.bf16.gmra.mrb[44].mxu0 %v2836_v29 }
 0x2da   : > { %1439 = vmatprep.mubr.bf16.mxu1 %v2470_v7  ;;  %1552 = vmatprep.mubr.bf16.mxu0 %v2470_v7 }
 0x2e1   : > { %1440 = vmatmul.mubr.bf16.gmra.mrb[48].mxu1 %v961_v63  ;;  %1553 = vmatmul.mubr.bf16.gmra.mrb[48].mxu0 %v961_v63 }
 0x2e2   : > { %1449 = vmatprep.mubr.bf16.mxu1 %v2470_v7  ;;  %1562 = vmatprep.mubr.bf16.mxu0 %v2470_v7 }
 0x2e9   : > { %1450 = vmatmul.mubr.bf16.gmra.mrb[52].mxu1 %v2872_v60  ;;  %1563 = vmatmul.mubr.bf16.gmra.mrb[52].mxu0 %v2872_v60 }
 0x2ea   : > { %1605 = vmatprep.mubr.bf16.mxu1 %v2470_v7  ;;  %1718 = vmatprep.mubr.bf16.mxu0 %v2470_v7 }
 0x2f1   : > { %1606 = vmatmul.mubr.bf16.vlgmr.msra.gmra.mrb[56].mxu1 %v2766_v34  ;;  %1719 = vmatmul.mubr.bf16.vlgmr.msra.gmra.mrb[56].mxu0 %v2766_v34 }
 0x2f2   : > { %1615 = vmatprep.mubr.bf16.mxu1 %v2470_v7  ;;  %1728 = vmatprep.mubr.bf16.mxu0 %v2470_v7 }
 0x2f9   : > { %1616 = vmatmul.mubr.bf16.gmra.mrb[60].mxu1 %v2764_v33  ;;  %1729 = vmatmul.mubr.bf16.gmra.mrb[60].mxu0 %v2764_v33 }
 0x2fa   : > { %1625 = vmatprep.mubr.bf16.mxu1 %v2470_v7  ;;  %1738 = vmatprep.mubr.bf16.mxu0 %v2470_v7 }
 0x301   : > { %1626 = vmatmul.mubr.bf16.gmra.mrb[64].mxu1 %v2802_v62  ;;  %1739 = vmatmul.mubr.bf16.gmra.mrb[64].mxu0 %v2802_v62 }
 0x302   : > { %1635 = vmatprep.mubr.bf16.mxu1 %v2470_v7  ;;  %1748 = vmatprep.mubr.bf16.mxu0 %v2470_v7 }
 0x309   : > { %1636 = vmatmul.mubr.bf16.gmra.mrb[68].mxu1 %v2800_v61  ;;  %1749 = vmatmul.mubr.bf16.gmra.mrb[68].mxu0 %v2800_v61 }
 0x30a   : > { %1645 = vmatprep.mubr.bf16.mxu1 %v2470_v7  ;;  %1758 = vmatprep.mubr.bf16.mxu0 %v2470_v7 }
 0x311   : > { %1646 = vmatmul.mubr.bf16.gmra.mrb[72].mxu1 %v2838_v30  ;;  %1759 = vmatmul.mubr.bf16.gmra.mrb[72].mxu0 %v2838_v30 }
 0x312   : > { %1655 = vmatprep.mubr.bf16.mxu1 %v2470_v7  ;;  %1768 = vmatprep.mubr.bf16.mxu0 %v2470_v7 }
 0x319   : > { %1656 = vmatmul.mubr.bf16.gmra.mrb[76].mxu1 %v2836_v29  ;;  %1769 = vmatmul.mubr.bf16.gmra.mrb[76].mxu0 %v2836_v29 }
 0x31a   : > { %1665 = vmatprep.mubr.bf16.mxu1 %v2470_v7  ;;  %1778 = vmatprep.mubr.bf16.mxu0 %v2470_v7 }
 0x321   : > { %1666 = vmatmul.mubr.bf16.gmra.mrb[80].mxu1 %v961_v63  ;;  %1779 = vmatmul.mubr.bf16.gmra.mrb[80].mxu0 %v961_v63 }
 0x322   : > { %1675 = vmatprep.mubr.bf16.mxu1 %v2470_v7  ;;  %1788 = vmatprep.mubr.bf16.mxu0 %v2470_v7 }
 0x329   : > { %1676 = vmatmul.mubr.bf16.gmra.mrb[84].mxu1 %v2872_v60  ;;  %1789 = vmatmul.mubr.bf16.gmra.mrb[84].mxu0 %v2872_v60 }
 0x384   : > { %v1381_v33 = vpop.f32.mrb[24].mxu1  ;;  %v1494_v34 = vpop.f32.mrb[24].mxu0 }
 0x385   : > { %v1383_v61 = vpop.f32.mrb[25].mxu1  ;;  %v1496_v62 = vpop.f32.mrb[25].mxu0 }
 0x386   : > { %v1385_v6 = vpop.f32.mrb[26].mxu1  ;;  %v1498_v8 = vpop.f32.mrb[26].mxu0 }
 0x387   : > { %v1799_v9 = vmax.f32 %v1381_v33, %v1385_v6  ;;  %v1841_v10 = vmax.f32 %v1494_v34, %v1498_v8  ;;  %v1387_v11 = vpop.f32.mrb[27].mxu1  ;;  %v1500_v12 = vpop.f32.mrb[27].mxu0 }
 0x388   : > { %v1820_v13 = vmax.f32 %v1383_v61, %v1387_v11  ;;  %v1862_v14 = vmax.f32 %v1496_v62, %v1500_v12 }
 0x38c   : > { %v1391_v15 = vpop.f32.mrb[28].mxu1  ;;  %v1504_v18 = vpop.f32.mrb[28].mxu0 }
 0x38d   : > { %v1800_v16 = vmax.f32 %v1799_v9, %v1391_v15  ;;  %v1842_v7 = vmax.f32 %v1841_v10, %v1504_v18  ;;  %v1393_v19 = vpop.f32.mrb[29].mxu1  ;;  %v1506_v20 = vpop.f32.mrb[29].mxu0 }
 0x38e   : > { %v1821_v21 = vmax.f32 %v1820_v13, %v1393_v19  ;;  %v1863_v22 = vmax.f32 %v1862_v14, %v1506_v20  ;;  %v1395_v23 = vpop.f32.mrb[30].mxu1  ;;  %v1508_v24 = vpop.f32.mrb[30].mxu0 }
 0x38f   : > { %v1801_v25 = vmax.f32 %v1800_v16, %v1395_v23  ;;  %v1843_v26 = vmax.f32 %v1842_v7, %v1508_v24  ;;  %v1397_v27 = vpop.f32.mrb[31].mxu1  ;;  %v1510_v28 = vpop.f32.mrb[31].mxu0 }
 0x390   : > { %v1822_v29 = vmax.f32 %v1821_v21, %v1397_v27  ;;  %v1864_v30 = vmax.f32 %v1863_v22, %v1510_v28 }
 0x394   : > { %v1401_v31 = vpop.f32.mrb[32].mxu1  ;;  %v1514_v32 = vpop.f32.mrb[32].mxu0 }
 0x395   : > { %v1802_v35 = vmax.f32 %v1801_v25, %v1401_v31  ;;  %v1844_v36 = vmax.f32 %v1843_v26, %v1514_v32  ;;  %v1403_v37 = vpop.f32.mrb[33].mxu1  ;;  %v1516_v38 = vpop.f32.mrb[33].mxu0 }
 0x396   : > { %v1823_v39 = vmax.f32 %v1822_v29, %v1403_v37  ;;  %v1865_v40 = vmax.f32 %v1864_v30, %v1516_v38  ;;  %v1405_v41 = vpop.f32.mrb[34].mxu1  ;;  %v1518_v43 = vpop.f32.mrb[34].mxu0 }
 0x397   : > { %v1803_v44 = vmax.f32 %v1802_v35, %v1405_v41  ;;  %v1845_v45 = vmax.f32 %v1844_v36, %v1518_v43  ;;  %v1407_v46 = vpop.f32.mrb[35].mxu1  ;;  %v1520_v47 = vpop.f32.mrb[35].mxu0 }
 0x398   : > { %v1824_v48 = vmax.f32 %v1823_v39, %v1407_v46  ;;  %v1866_v49 = vmax.f32 %v1865_v40, %v1520_v47 }
 0x39c   : > { %v1411_v50 = vpop.f32.mrb[36].mxu1  ;;  %v1524_v51 = vpop.f32.mrb[36].mxu0 }
 0x39d   : > { %v1804_v52 = vmax.f32 %v1803_v44, %v1411_v50  ;;  %v1846_v53 = vmax.f32 %v1845_v45, %v1524_v51  ;;  %v1413_v54 = vpop.f32.mrb[37].mxu1  ;;  %v1526_v55 = vpop.f32.mrb[37].mxu0 }
 0x39e   : > { %v1825_v56 = vmax.f32 %v1824_v48, %v1413_v54  ;;  %v1867_v42 = vmax.f32 %v1866_v49, %v1526_v55  ;;  %v1415_v57 = vpop.f32.mrb[38].mxu1  ;;  %v1528_v58 = vpop.f32.mrb[38].mxu0 }
 0x39f   : > { %v1805_v17 = vmax.f32 %v1804_v52, %v1415_v57  ;;  %v1847_v59 = vmax.f32 %v1846_v53, %v1528_v58  ;;  %v1417_v60 = vpop.f32.mrb[39].mxu1  ;;  %v1530_v63 = vpop.f32.mrb[39].mxu0 }
 0x3a0   : > { %v1826_v0 = vmax.f32 %v1825_v56, %v1417_v60  ;;  %v1868_v1 = vmax.f32 %v1867_v42, %v1530_v63 }
 0x3a4   : > { %v1421_v2 = vpop.f32.mrb[40].mxu1  ;;  %v1534_v3 = vpop.f32.mrb[40].mxu0 }
 0x3a5   : > { %v1806_v4 = vmax.f32 %v1805_v17, %v1421_v2  ;;  %v1848_v5 = vmax.f32 %v1847_v59, %v1534_v3  ;;  %v1423_v33 = vpop.f32.mrb[41].mxu1  ;;  %v1536_v34 = vpop.f32.mrb[41].mxu0 }
 0x3a6   : > { %v1827_v61 = vmax.f32 %v1826_v0, %v1423_v33  ;;  %v1869_v62 = vmax.f32 %v1868_v1, %v1536_v34  ;;  %v1425_v6 = vpop.f32.mrb[42].mxu1  ;;  %v1538_v8 = vpop.f32.mrb[42].mxu0  ;;  %v1986_v34 = vlaneseq }
 0x3a7   : > { %v1807_v9 = vmax.f32 %v1806_v4, %v1425_v6  ;;  %v1849_v10 = vmax.f32 %v1848_v5, %v1538_v8  ;;  %v1427_v11 = vpop.f32.mrb[43].mxu1  ;;  %v1540_v12 = vpop.f32.mrb[43].mxu0  ;;  %v2471_v5 = vmov 1966171168  }
 0x3a8   : > { %v1828_v13 = vmax.f32 %v1827_v61, %v1427_v11  ;;  %v1870_v14 = vmax.f32 %v1869_v62, %v1540_v12  ;;  %v1984_v33 = vunpack.c.l.s4 %v2471_v5 }
 0x3ac   : > { %v1431_v15 = vpop.f32.mrb[44].mxu1  ;;  %v1544_v18 = vpop.f32.mrb[44].mxu0 }
 0x3ad   : > { %v1808_v16 = vmax.f32 %v1807_v9, %v1431_v15  ;;  %v1850_v7 = vmax.f32 %v1849_v10, %v1544_v18  ;;  %v1433_v19 = vpop.f32.mrb[45].mxu1  ;;  %v1546_v20 = vpop.f32.mrb[45].mxu0 }
 0x3ae   : > { %v1829_v21 = vmax.f32 %v1828_v13, %v1433_v19  ;;  %v1871_v22 = vmax.f32 %v1870_v14, %v1546_v20  ;;  %v1435_v23 = vpop.f32.mrb[46].mxu1  ;;  %v1548_v24 = vpop.f32.mrb[46].mxu0 }
 0x3af   : > { %v1809_v25 = vmax.f32 %v1808_v16, %v1435_v23  ;;  %v1851_v26 = vmax.f32 %v1850_v7, %v1548_v24  ;;  %v1437_v27 = vpop.f32.mrb[47].mxu1  ;;  %v1550_v28 = vpop.f32.mrb[47].mxu0  ;;  %v1985_v16 = vunpack.c.0.s8 %v1984_v33  ;;  %v1987_v7 = vshrl.u32 %v1986_v34, 7 }
 0x3b0   : > { %v1830_v29 = vmax.f32 %v1829_v21, %v1437_v27  ;;  %v1872_v30 = vmax.f32 %v1871_v22, %v1550_v28 }
 0x3b4   : > { %v1441_v31 = vpop.f32.mrb[48].mxu1  ;;  %v1554_v32 = vpop.f32.mrb[48].mxu0 }
 0x3b5   : > { %v1810_v35 = vmax.f32 %v1809_v25, %v1441_v31  ;;  %v1852_v36 = vmax.f32 %v1851_v26, %v1554_v32  ;;  %v1443_v37 = vpop.f32.mrb[49].mxu1  ;;  %v1556_v38 = vpop.f32.mrb[49].mxu0 }
 0x3b6   : > { %v1831_v39 = vmax.f32 %v1830_v29, %v1443_v37  ;;  %v1873_v40 = vmax.f32 %v1872_v30, %v1556_v38  ;;  %v1445_v41 = vpop.f32.mrb[50].mxu1  ;;  %v1558_v43 = vpop.f32.mrb[50].mxu0 }
 0x3b7   : > { %v1811_v44 = vmax.f32 %v1810_v35, %v1445_v41  ;;  %v1853_v45 = vmax.f32 %v1852_v36, %v1558_v43  ;;  %v1447_v46 = vpop.f32.mrb[51].mxu1  ;;  %v1560_v47 = vpop.f32.mrb[51].mxu0  ;;  %v2920_v41 = vsub.s32 %v1985_v16, %v1987_v7 }
 0x3b8   : > { %v1832_v48 = vmax.f32 %v1831_v39, %v1447_v46  ;;  %v1874_v49 = vmax.f32 %v1873_v40, %v1560_v47 }
 0x3bc   : > { %v1451_v50 = vpop.f32.mrb[52].mxu1  ;;  %v1564_v51 = vpop.f32.mrb[52].mxu0 }
 0x3bd   : > { %v1812_v52 = vmax.f32 %v1811_v44, %v1451_v50  ;;  %v1854_v53 = vmax.f32 %v1853_v45, %v1564_v51  ;;  %v1453_v54 = vpop.f32.mrb[53].mxu1  ;;  %v1566_v55 = vpop.f32.mrb[53].mxu0 }
 0x3be   : > { %v1833_v56 = vmax.f32 %v1832_v48, %v1453_v54  ;;  %v1875_v42 = vmax.f32 %v1874_v49, %v1566_v55  ;;  %v1455_v57 = vpop.f32.mrb[54].mxu1  ;;  %v1568_v58 = vpop.f32.mrb[54].mxu0 }
 0x3bf   : > { %v1813_v17 = vmax.f32 %v1812_v52, %v1455_v57  ;;  %v1855_v59 = vmax.f32 %v1854_v53, %v1568_v58  ;;  %v1457_v60 = vpop.f32.mrb[55].mxu1  ;;  %v1570_v63 = vpop.f32.mrb[55].mxu0 }
 0x3c0   : > { %v1834_v0 = vmax.f32 %v1833_v56, %v1457_v60  ;;  %v1876_v1 = vmax.f32 %v1875_v42, %v1570_v63 }
 0x3c1   : > { %v1814_v2 = vrot.slane %v1813_v17, 4  ;;  %v1856_v3 = vrot.slane %v1855_v59, 4 }
 0x3c2   : > { %v1835_v4 = vrot.slane %v1834_v0, 4  ;;  %v1877_v61 = vrot.slane %v1876_v1, 4 }
 0x3c3   : > { %v1815_v62 = vmax.f32 %v1813_v17, %v1814_v2  ;;  %v1857_v6 = vmax.f32 %v1855_v59, %v1856_v3 }
 0x3c4   : > { %v1836_v8 = vmax.f32 %v1834_v0, %v1835_v4  ;;  %v1878_v9 = vmax.f32 %v1876_v1, %v1877_v61  ;;  %v1607_v10 = vpop.f32.mrb[56].mxu1  ;;  %v1720_v11 = vpop.f32.mrb[56].mxu0 }
 0x3c5   : > { %v1816_v12 = vrot.slane %v1815_v62, 2  ;;  %v1858_v13 = vrot.slane %v1857_v6, 2  ;;  %v1609_v14 = vpop.f32.mrb[57].mxu1  ;;  %v1722_v15 = vpop.f32.mrb[57].mxu0 }
 0x3c6   : > { %v1837_v18 = vrot.slane %v1836_v8, 2  ;;  %v1879_v19 = vrot.slane %v1878_v9, 2  ;;  %v1611_v20 = vpop.f32.mrb[58].mxu1  ;;  %v1724_v21 = vpop.f32.mrb[58].mxu0 }
 0x3c7   : > { %v1817_v22 = vmax.f32 %v1815_v62, %v1816_v12  ;;  %v1859_v23 = vmax.f32 %v1857_v6, %v1858_v13  ;;  %v1883_v24 = vmax.f32 %v1607_v10, %v1611_v20  ;;  %v1925_v25 = vmax.f32 %v1720_v11, %v1724_v21  ;;  %v1613_v26 = vpop.f32.mrb[59].mxu1  ;;  %v1726_v27 = vpop.f32.mrb[59].mxu0 }
 0x3c8   : > { %v1838_v28 = vmax.f32 %v1836_v8, %v1837_v18  ;;  %v1880_v29 = vmax.f32 %v1878_v9, %v1879_v19  ;;  %v1904_v30 = vmax.f32 %v1609_v14, %v1613_v26  ;;  %v1946_v31 = vmax.f32 %v1722_v15, %v1726_v27 }
 0x3c9   : > { %v1818_v32 = vrot.slane %v1817_v22, 1  ;;  %v1860_v35 = vrot.slane %v1859_v23, 1 }
 0x3ca   : > { %v1839_v36 = vrot.slane %v1838_v28, 1  ;;  %v1881_v37 = vrot.slane %v1880_v29, 1 }
 0x3cb   : > { %v1819_v38 = vmax.f32 %v1817_v22, %v1818_v32  ;;  %v1861_v39 = vmax.f32 %v1859_v23, %v1860_v35 }
 0x3cc   : > { %v1840_v40 = vmax.f32 %v1838_v28, %v1839_v36  ;;  %v1882_v43 = vmax.f32 %v1880_v29, %v1881_v37  ;;  %v1617_v44 = vpop.f32.mrb[60].mxu1  ;;  %v1730_v45 = vpop.f32.mrb[60].mxu0 }
 0x3cd   : > { %v1884_v46 = vmax.f32 %v1883_v24, %v1617_v44  ;;  %v1926_v47 = vmax.f32 %v1925_v25, %v1730_v45  ;;  %v1619_v48 = vpop.f32.mrb[61].mxu1  ;;  %v1732_v49 = vpop.f32.mrb[61].mxu0 }
 0x3ce   : > { %v1979_v50 = vcombine.low %v1819_v38, %v1840_v40  ;;  %v1980_v51 = vcombine.low %v1861_v39, %v1882_v43  ;;  %v1905_v52 = vmax.f32 %v1904_v30, %v1619_v48  ;;  %v1947_v53 = vmax.f32 %v1946_v31, %v1732_v49  ;;  %v1621_v54 = vpop.f32.mrb[62].mxu1  ;;  %v1734_v55 = vpop.f32.mrb[62].mxu0 }
 0x3cf   : > { %v1885_v56 = vmax.f32 %v1884_v46, %v1621_v54  ;;  %v1927_v42 = vmax.f32 %v1926_v47, %v1734_v55  ;;  %v1623_v57 = vpop.f32.mrb[63].mxu1  ;;  %v1736_v58 = vpop.f32.mrb[63].mxu0 }
 0x3d0   : > { %v2923_v17 = vrot.slane %v1979_v50, %v2920_v41  ;;  %v2926_v59 = vrot.slane %v1980_v51, %v2920_v41  ;;  %v1906_v60 = vmax.f32 %v1905_v52, %v1623_v57  ;;  %v1948_v63 = vmax.f32 %v1947_v53, %v1736_v58 }
 0x3d2   : > { %v2011_v0 = vcombine.low %v2923_v17, %v2926_v59 }
 0x3d4   : > { %v1627_v1 = vpop.f32.mrb[64].mxu1  ;;  %v1740_v2 = vpop.f32.mrb[64].mxu0 }
 0x3d5   : > { %v1886_v3 = vmax.f32 %v1885_v56, %v1627_v1  ;;  %v1928_v4 = vmax.f32 %v1927_v42, %v1740_v2  ;;  %v1629_v5 = vpop.f32.mrb[65].mxu1  ;;  %v1742_v33 = vpop.f32.mrb[65].mxu0 }
 0x3d6   : > { %v1907_v34 = vmax.f32 %v1906_v60, %v1629_v5  ;;  %v1949_v61 = vmax.f32 %v1948_v63, %v1742_v33  ;;  %v1631_v62 = vpop.f32.mrb[66].mxu1  ;;  %v1744_v6 = vpop.f32.mrb[66].mxu0 }
 0x3d7   : > { %v1887_v8 = vmax.f32 %v1886_v3, %v1631_v62  ;;  %v1929_v9 = vmax.f32 %v1928_v4, %v1744_v6  ;;  %v1633_v10 = vpop.f32.mrb[67].mxu1  ;;  %v1746_v11 = vpop.f32.mrb[67].mxu0 }
 0x3d8   : > { %v1908_v12 = vmax.f32 %v1907_v34, %v1633_v10  ;;  %v1950_v13 = vmax.f32 %v1949_v61, %v1746_v11 }
 0x3dc   : > { %v1637_v14 = vpop.f32.mrb[68].mxu1  ;;  %v1750_v15 = vpop.f32.mrb[68].mxu0 }
 0x3dd   : > { %v1888_v18 = vmax.f32 %v1887_v8, %v1637_v14  ;;  %v1930_v16 = vmax.f32 %v1929_v9, %v1750_v15  ;;  %v1639_v7 = vpop.f32.mrb[69].mxu1  ;;  %v1752_v19 = vpop.f32.mrb[69].mxu0 }
 0x3de   : > { %v1909_v20 = vmax.f32 %v1908_v12, %v1639_v7  ;;  %v1951_v21 = vmax.f32 %v1950_v13, %v1752_v19  ;;  %v1641_v22 = vpop.f32.mrb[70].mxu1  ;;  %v1754_v23 = vpop.f32.mrb[70].mxu0 }
 0x3df   : > { %v1889_v24 = vmax.f32 %v1888_v18, %v1641_v22  ;;  %v1931_v25 = vmax.f32 %v1930_v16, %v1754_v23  ;;  %v1643_v26 = vpop.f32.mrb[71].mxu1  ;;  %v1756_v27 = vpop.f32.mrb[71].mxu0 }
 0x3e0   : > { %v1910_v28 = vmax.f32 %v1909_v20, %v1643_v26  ;;  %v1952_v29 = vmax.f32 %v1951_v21, %v1756_v27 }
 0x3e4   : > { %v1647_v30 = vpop.f32.mrb[72].mxu1  ;;  %v1760_v31 = vpop.f32.mrb[72].mxu0 }
 0x3e5   : > { %v1890_v32 = vmax.f32 %v1889_v24, %v1647_v30  ;;  %v1932_v35 = vmax.f32 %v1931_v25, %v1760_v31  ;;  %v1649_v36 = vpop.f32.mrb[73].mxu1  ;;  %v1762_v37 = vpop.f32.mrb[73].mxu0 }
 0x3e6   : > { %v1911_v38 = vmax.f32 %v1910_v28, %v1649_v36  ;;  %v1953_v39 = vmax.f32 %v1952_v29, %v1762_v37  ;;  %v1651_v40 = vpop.f32.mrb[74].mxu1  ;;  %v1764_v43 = vpop.f32.mrb[74].mxu0 }
 0x3e7   : > { %v1891_v44 = vmax.f32 %v1890_v32, %v1651_v40  ;;  %v1933_v45 = vmax.f32 %v1932_v35, %v1764_v43  ;;  %v1653_v46 = vpop.f32.mrb[75].mxu1  ;;  %v1766_v47 = vpop.f32.mrb[75].mxu0 }
 0x3e8   : > { %v1912_v48 = vmax.f32 %v1911_v38, %v1653_v46  ;;  %v1954_v49 = vmax.f32 %v1953_v39, %v1766_v47 }
 0x3ec   : > { %v1657_v50 = vpop.f32.mrb[76].mxu1  ;;  %v1770_v51 = vpop.f32.mrb[76].mxu0 }
 0x3ed   : > { %v1892_v52 = vmax.f32 %v1891_v44, %v1657_v50  ;;  %v1934_v53 = vmax.f32 %v1933_v45, %v1770_v51  ;;  %v1659_v54 = vpop.f32.mrb[77].mxu1  ;;  %v1772_v55 = vpop.f32.mrb[77].mxu0 }
 0x3ee   : > { %v1913_v56 = vmax.f32 %v1912_v48, %v1659_v54  ;;  %v1955_v42 = vmax.f32 %v1954_v49, %v1772_v55  ;;  %v1661_v57 = vpop.f32.mrb[78].mxu1  ;;  %v1774_v58 = vpop.f32.mrb[78].mxu0 }
 0x3ef   : > { %v1893_v60 = vmax.f32 %v1892_v52, %v1661_v57  ;;  %v1935_v63 = vmax.f32 %v1934_v53, %v1774_v58  ;;  %v1663_v1 = vpop.f32.mrb[79].mxu1  ;;  %v1776_v2 = vpop.f32.mrb[79].mxu0 }
 0x3f0   : > { %v1914_v3 = vmax.f32 %v1913_v56, %v1663_v1  ;;  %v1956_v4 = vmax.f32 %v1955_v42, %v1776_v2 }
 0x3f4   : > { %v1667_v5 = vpop.f32.mrb[80].mxu1  ;;  %v1780_v33 = vpop.f32.mrb[80].mxu0 }
 0x3f5   : > { %v1894_v34 = vmax.f32 %v1893_v60, %v1667_v5  ;;  %v1936_v61 = vmax.f32 %v1935_v63, %v1780_v33  ;;  %v1669_v62 = vpop.f32.mrb[81].mxu1  ;;  %v1782_v6 = vpop.f32.mrb[81].mxu0  ;;  %v2019_v33 = vrot.slane %v2011_v0, %v2920_v41 }
 0x3f6   : > { %v1915_v8 = vmax.f32 %v1914_v3, %v1669_v62  ;;  %v1957_v9 = vmax.f32 %v1956_v4, %v1782_v6  ;;  %v1671_v10 = vpop.f32.mrb[82].mxu1  ;;  %v1784_v11 = vpop.f32.mrb[82].mxu0 }
 0x3f7   : > { %v1895_v12 = vmax.f32 %v1894_v34, %v1671_v10  ;;  %v1937_v13 = vmax.f32 %v1936_v61, %v1784_v11  ;;  %v1673_v14 = vpop.f32.mrb[83].mxu1  ;;  %v1786_v15 = vpop.f32.mrb[83].mxu0  ;;  %v2099_v61 = vld [vmem:[%s2961_s8] sm:$0xff] }
 0x3f8   : > { %v1916_v18 = vmax.f32 %v1915_v8, %v1673_v14  ;;  %v1958_v16 = vmax.f32 %v1957_v9, %v1786_v15 }
 0x3fc   : > { %v1677_v7 = vpop.f32.mrb[84].mxu1  ;;  %v1790_v19 = vpop.f32.mrb[84].mxu0 }
 0x3fd   : > { %v1896_v20 = vmax.f32 %v1895_v12, %v1677_v7  ;;  %v1938_v21 = vmax.f32 %v1937_v13, %v1790_v19  ;;  %v1679_v22 = vpop.f32.mrb[85].mxu1  ;;  %v1792_v23 = vpop.f32.mrb[85].mxu0 }
 0x3fe   : > { %v1917_v24 = vmax.f32 %v1916_v18, %v1679_v22  ;;  %v1959_v25 = vmax.f32 %v1958_v16, %v1792_v23  ;;  %v1681_v26 = vpop.f32.mrb[86].mxu1  ;;  %v1794_v27 = vpop.f32.mrb[86].mxu0 }
 0x3ff   : > { %v1897_v28 = vmax.f32 %v1896_v20, %v1681_v26  ;;  %v1939_v29 = vmax.f32 %v1938_v21, %v1794_v27  ;;  %v1683_v30 = vpop.f32.mrb[87].mxu1  ;;  %v1796_v31 = vpop.f32.mrb[87].mxu0 }
 0x400   : > { %v1918_v32 = vmax.f32 %v1917_v24, %v1683_v30  ;;  %v1960_v35 = vmax.f32 %v1959_v25, %v1796_v31 }
 0x401   : > { %v1898_v36 = vrot.slane %v1897_v28, 4  ;;  %v1940_v37 = vrot.slane %v1939_v29, 4 }
 0x402   : > { %v1919_v38 = vrot.slane %v1918_v32, 4  ;;  %v1961_v39 = vrot.slane %v1960_v35, 4 }
 0x403   : > { %v1899_v40 = vmax.f32 %v1897_v28, %v1898_v36  ;;  %v1941_v43 = vmax.f32 %v1939_v29, %v1940_v37 }
 0x404   : > { %v1920_v44 = vmax.f32 %v1918_v32, %v1919_v38  ;;  %v1962_v45 = vmax.f32 %v1960_v35, %v1961_v39 }
 0x405   : > { %v1900_v46 = vrot.slane %v1899_v40, 2  ;;  %v1942_v47 = vrot.slane %v1941_v43, 2 }
 0x406   : > { %v1921_v48 = vrot.slane %v1920_v44, 2  ;;  %v1963_v49 = vrot.slane %v1962_v45, 2 }
 0x407   : > { %v1901_v50 = vmax.f32 %v1899_v40, %v1900_v46  ;;  %v1943_v51 = vmax.f32 %v1941_v43, %v1942_v47 }
 0x408   : > { %v1922_v52 = vmax.f32 %v1920_v44, %v1921_v48  ;;  %v1964_v53 = vmax.f32 %v1962_v45, %v1963_v49 }
 0x409   : > { %v1902_v54 = vrot.slane %v1901_v50, 1  ;;  %v1944_v55 = vrot.slane %v1943_v51, 1 }
 0x40a   : > { %v1923_v56 = vrot.slane %v1922_v52, 1  ;;  %v1965_v42 = vrot.slane %v1964_v53, 1 }
 0x40b   : > { %v1903_v57 = vmax.f32 %v1901_v50, %v1902_v54  ;;  %v1945_v58 = vmax.f32 %v1943_v51, %v1944_v55 }
 0x40c   : > { %v1924_v60 = vmax.f32 %v1922_v52, %v1923_v56  ;;  %v1966_v63 = vmax.f32 %v1964_v53, %v1965_v42 }
 0x40e   : > { %v1981_v1 = vcombine.low %v1903_v57, %v1924_v60  ;;  %v1982_v2 = vcombine.low %v1945_v58, %v1966_v63 }
 0x410   : > { %v2003_v3 = vrot.slane %v1981_v1, %v2920_v41  ;;  %v2010_v4 = vrot.slane %v1982_v2, %v2920_v41 }
 0x412   : > { %v2012_v5 = vcombine.low %v2003_v3, %v2010_v4 }
 0x414   : > { %v2026_v34 = vrot.slane %v2012_v5, %v2920_v41 }
 0x416   : > { %v2027_v62 = vcombine.low %v2019_v33, %v2026_v34 }
 0x418   : > { %v2100_v6 = vadd.f32 %v2099_v61, %v2027_v62 }
 0x41a   : > { %v2101_v8 = vmax.f32 %v2100_v6, 0.0 }
 0x41c   : > { %2102 = vst [vmem:[%s375_s23] sm:$0xff] %v2101_v8 }
 0x41d PF: > { %s19_s11 = sadd.s32 1, %s2467_s11   ;;  %s2963_s30 = smov %s2463_s10 }
 0x41e   : > { %p16_p5 = scmp.ge.s32.totalorder %s19_s11, 4   ;;  %s2964_s10 = smov %s2966_s12 }
 0x420   :  { %18 = sbr.rel (!%p16_p5) target bundleno = 2 (0x2), region = 101 }

// kernel: transform_forward.3
= control target key start
LH: loop header
LB: loop body
LE: loop exit
PB: predicated region body
PF: predicated region fallthrough
CT: control target
= control target key end

     0   :  { %12 = vsyncpa [#allocation3], 0  ;;  %s3477_s0 = inlined_call_operand.vmem [shape: bf16[2,128,3], index: 0, kind: input, shape index: {}]   ;;  %s3478_s1 = inlined_call_operand.vmem [shape: bf16[3,64], index: 1, kind: input, shape index: {}]   ;;  %s3479_s2 = inlined_call_operand.hbm [shape: f32[1,64], index: 2, kind: input, shape index: {}]   ;;  %s3480_s3 = inlined_call_operand.vmem [shape: bf16[64,128], index: 3, kind: input, shape index: {}]   ;;  %s3481_s4 = inlined_call_operand.hbm [shape: f32[1,128], index: 4, kind: input, shape index: {}]   ;;  %s3482_s5 = inlined_call_operand.vmem [shape: bf16[128,1024], index: 5, kind: input, shape index: {}]   ;;  %s3483_s6 = inlined_call_operand.hbm [shape: f32[1,1024], index: 6, kind: input, shape index: {}]   ;;  %s3484_s7 = inlined_call_operand.vmem [shape: f32[2,1,1024], index: 7, kind: output, shape index: {}]  }
   0x1   :  { %13 = vsyncpa [#allocation5], 0  ;;  %s2827_s24 = smov [#allocation4]   ;;  %s2828_s26 = smov [#allocation2]  }
   0x2   :  { %s36_s25 = sshll.u32 %s2827_s24, 4  ;;  %s24_s27 = sshll.u32 %s2828_s26, 4  ;;  %s37_s25 = int_to_ptr.vmem [resolvable:$true] %s36_s25  ;;  %s25_s27 = int_to_ptr.vmem [resolvable:$true] %s24_s27 }
   0x3   :  { %s2757_s30 = scalar_lea.hbm %s3481_s4, 16 }
   0x4   :  { %p2758_p0 = scmp.ne.s32.totalorder %s3481_s4, %s2757_s30  ;;  %p2761_p1 = scmp.lt.u32.totalorder %s2757_s30, %s3481_s4 }
   0x6   :  { %p2763_p2 = pnand %p2761_p1, %p2758_p0 }
   0x8   :  { %2766 = shalt.err (!%p2763_p2)
}
   0x9   :  { %s2767_s12 = scalar_lea.vmem %s37_s25, 16  ;;  %s2771_s13 = scalar_lea.vmem %s37_s25, 32 }
   0xa   :  { %p2768_p3 = scmp.ne.s32.totalorder %s37_s25, %s2767_s12  ;;  %p2772_p4 = scmp.lt.s32.totalorder %s37_s25, %s37_s25 }
   0xb   :  { %p2773_p5 = scmp.lt.s32.totalorder %s2771_s13, %s2767_s12 }
   0xd   :  { %p2774_p6 = por %p2773_p5, %p2772_p4 }
   0xf   :  { %p2775_p7 = pnand %p2774_p6, %p2768_p3 }
  0x11   :  { %2778 = shalt.err (!%p2775_p7)
}
  0x12   :  { %39 = dma.hbm_to_vmem [thread:$0]  %s3481_s4, 16, %s37_s25, [#allocation5]  }
  0x13   :  { %s2779_s18 = scalar_lea.hbm %s3479_s2, 16 }
  0x14   :  { %p2780_p8 = scmp.ne.s32.totalorder %s3479_s2, %s2779_s18  ;;  %p2783_p9 = scmp.lt.u32.totalorder %s2779_s18, %s3479_s2 }
  0x16   :  { %p2785_p10 = pnand %p2783_p9, %p2780_p8 }
  0x18   :  { %2788 = shalt.err (!%p2785_p10)
}
  0x19   :  { %s2789_s23 = scalar_lea.vmem %s25_s27, 16  ;;  %s2793_s24 = scalar_lea.vmem %s25_s27, 32 }
  0x1a   :  { %p2790_p11 = scmp.ne.s32.totalorder %s25_s27, %s2789_s23  ;;  %p2794_p12 = scmp.lt.s32.totalorder %s25_s27, %s25_s27 }
  0x1b   :  { %p2795_p13 = scmp.lt.s32.totalorder %s2793_s24, %s2789_s23 }
  0x1d   :  { %p2796_p0 = por %p2795_p13, %p2794_p12 }
  0x1f   :  { %p2797_p1 = pnand %p2796_p0, %p2790_p11 }
  0x21   :  { %2800 = shalt.err (!%p2797_p1)
}
  0x22   :  { %27 = dma.hbm_to_vmem [thread:$0]  %s3479_s2, 16, %s25_s27, [#allocation3]  }
  0x23   :  { %s2829_s26 = smov [#allocation6]   ;;  %s2801_s8 = scalar_lea.hbm %s3483_s6, 128 }
  0x24   :  { %s48_s28 = sshll.u32 %s2829_s26, 4  ;;  %p2802_p2 = scmp.ne.s32.totalorder %s3483_s6, %s2801_s8  ;;  %s49_s28 = int_to_ptr.vmem [resolvable:$true] %s48_s28 }
  0x25   :  { %p2805_p3 = scmp.lt.u32.totalorder %s2801_s8, %s3483_s6 }
  0x27   :  { %p2807_p4 = pnand %p2805_p3, %p2802_p2 }
  0x29   :  { %2810 = shalt.err (!%p2807_p4)
}
  0x2a   :  { %s2811_s13 = scalar_lea.vmem %s49_s28, 128  ;;  %p2816_p6 = scmp.lt.s32.totalorder %s49_s28, %s49_s28 }
  0x2b   :  { %p2812_p5 = scmp.ne.s32.totalorder %s49_s28, %s2811_s13  ;;  %p2817_p7 = scmp.lt.s32.totalorder %s2811_s13, %s2811_s13 }
  0x2d   :  { %p2818_p8 = por %p2817_p7, %p2816_p6 }
  0x2f   :  { %p2819_p9 = pnand %p2818_p8, %p2812_p5 }
  0x31   :  { %2822 = shalt.err (!%p2819_p9)
}
  0x32   :  { %51 = dma.hbm_to_vmem [thread:$0]  %s3483_s6, 128, %s49_s28, [#allocation5]  }
  0x33   :  { %2823 = dma.done.wait [#allocation3], 16  }
  0x34   :  { %2824 = vsyncadd [#allocation3], 4294967280 }
  0x35   :  { %2825 = dma.done.wait [#allocation5], 144  }
  0x36   :  { %2826 = vsyncadd [#allocation5], 4294967152  ;;  %vm231_vm0 = vcmask 1040384   ;;  %vm232_vm1 = vcmask 1041408   ;;  %v2830_v0 = vmov 65535   ;;  %vm182_vm2 = vcmask 23552  }
  0x37   :  { %v233_v1 = vsel %vm231_vm0, 4294967295, %v2830_v0  ;;  %v94_v3 = vld [vmem:[%s3478_s1] sm:$0x3]  ;;  %v2738_v6 = vld [vmem:[%s3477_s0 + $0x8] sm:$0xff]   ;;  %v2739_v7 = vld [vmem:[%s3477_s0 + $0x10] sm:$0xff]   ;;  %vm486_vm3 = vcmask 523264  }
  0x38   :  { %v234_v2 = vsel %vm232_vm1, %v233_v1, 0  ;;  %v2737_v5 = vld [vmem:[%s3477_s0] sm:$0xff]   ;;  %v2740_v8 = vld [vmem:[%s3477_s0 + $0x18] sm:$0xff]   ;;  %v2754_v11 = vld [vmem:[%s3480_s3 + $0x8] sm:$0xff]  }
  0x39   :  { %v236_v4 = vand.u32 %v234_v2, %v94_v3  ;;  %2659 = vmatprep.mubr.msk.bf16.mxu0 %vm182_vm2, %v2737_v5  ;;  %v2741_v9 = vld [vmem:[%s3477_s0 + $0x20] sm:$0xff]   ;;  %v2742_v12 = vld [vmem:[%s3477_s0 + $0x28] sm:$0xff]   ;;  %v2743_v13 = vld [vmem:[%s3477_s0 + $0x30] sm:$0xff]  }
  0x3a   :  { %v2753_v10 = vld [vmem:[%s3480_s3] sm:$0xff]   ;;  %v2744_v14 = vld [vmem:[%s3477_s0 + $0x38] sm:$0xff]   ;;  %v2746_v16 = vld [vmem:[%s3477_s0 + $0x48] sm:$0xff]  }
  0x3b   :  { %2657 = vmatprep.subr.bf16.mxu0 %v236_v4  ;;  %2691 = vmatprep.subr.bf16.mxu1 %v2753_v10  ;;  %v2745_v15 = vld [vmem:[%s3477_s0 + $0x40] sm:$0xff]   ;;  %v2747_v17 = vld [vmem:[%s3477_s0 + $0x50] sm:$0xff]   ;;  %v2748_v18 = vld [vmem:[%s3477_s0 + $0x58] sm:$0xff]  }
  0x3c   :  { %2658 = vmatpush3.bf16.msra.mxu0 %v236_v4  ;;  %2692 = vmatpush3.bf16.msra.mxu1 %v2753_v10  ;;  %v2749_v19 = vld [vmem:[%s3477_s0 + $0x60] sm:$0xff]   ;;  %v2750_v20 = vld [vmem:[%s3477_s0 + $0x68] sm:$0xff]   ;;  %v2751_v21 = vld [vmem:[%s3477_s0 + $0x70] sm:$0xff]  }
  0x3d   :  { %2693 = vmatprep.subr.bf16.mxu1 %v2754_v11  ;;  %v2752_v22 = vld [vmem:[%s3477_s0 + $0x78] sm:$0xff]   ;;  %v2755_v23 = vld [vmem:[%s3480_s3 + $0x10] sm:$0xff]   ;;  %v744_v25 = vld [vmem:[%s3482_s5] sm:$0xff] }
  0x3e   :  { %v2756_v24 = vld [vmem:[%s3480_s3 + $0x18] sm:$0xff]   ;;  %v748_v26 = vld [vmem:[%s3482_s5 + $0x20] sm:$0xff]  ;;  %v2997_v27 = vld [vmem:[%s3482_s5 + $0x8] sm:$0xff] }
  0x3f   :  { %2660 = vmatmul.mubr.msk.bf16.vlgmr.msra.gmra.mrb[0].mxu0 %vm182_vm2, %v2738_v6  ;;  %v2556_v28 = vcombine.low %v744_v25, %v748_v26  ;;  %v2557_v29 = vcombine.high %v744_v25, %v748_v26  ;;  %v3002_v30 = vld [vmem:[%s3482_s5 + $0x28] sm:$0xff]  ;;  %v752_v31 = vld [vmem:[%s3482_s5 + $0x40] sm:$0xff] }
  0x40   :  { %2663 = vmatprep.mubr.msk.bf16.mxu0 %vm182_vm2, %v2739_v7  ;;  %2694 = vmatpush3.bf16.msra.mxu1 %v2754_v11  ;;  %v756_v32 = vld [vmem:[%s3482_s5 + $0x60] sm:$0xff]  ;;  %v2558_v33 = vcombine.low %v2997_v27, %v3002_v30  ;;  %v2559_v34 = vcombine.high %v2997_v27, %v3002_v30  ;;  %v753_v6 = vld [vmem:[%s3482_s5 + $0x48] sm:$0xff] }
  0x41   :  { %2695 = vmatprep.subr.bf16.mxu1 %v2755_v23  ;;  %v2565_v35 = vcombine.high %v752_v31, %v756_v32  ;;  %v760_v36 = vld [vmem:[%s3482_s5 + $0x80] sm:$0xff]  ;;  %1128 = vmatprep.subr.bf16.mxu0 %v2557_v29  ;;  %v2564_v38 = vcombine.low %v752_v31, %v756_v32  ;;  %v757_v7 = vld [vmem:[%s3482_s5 + $0x68] sm:$0xff] }
  0x42   :  { %v764_v37 = vld [vmem:[%s3482_s5 + $0xa0] sm:$0xff]  ;;  %1129 = vmatpush1.bf16.msra.mxu0 %v2556_v28  ;;  %v769_v28 = vld [vmem:[%s3482_s5 + $0xc8] sm:$0xff] }
  0x43   :  { %1130 = vmatprep.subr.bf16.mxu0 %v2565_v35  ;;  %v2573_v39 = vcombine.high %v760_v36, %v764_v37  ;;  %v768_v40 = vld [vmem:[%s3482_s5 + $0xc0] sm:$0xff]  ;;  %v2572_v42 = vcombine.low %v760_v36, %v764_v37  ;;  %v773_v29 = vld [vmem:[%s3482_s5 + $0xe8] sm:$0xff] }
  0x44   :  { %2696 = vmatpush3.bf16.msra.mxu1 %v2755_v23  ;;  %v772_v41 = vld [vmem:[%s3482_s5 + $0xe0] sm:$0xff]  ;;  %v2566_v23 = vcombine.low %v753_v6, %v757_v7 }
  0x45   :  { %2697 = vmatprep.subr.bf16.mxu1 %v2756_v24  ;;  %v2581_v43 = vcombine.high %v768_v40, %v772_v41  ;;  %v776_v44 = vld [vmem:[%s3482_s5 + $0x100] sm:$0xff]  ;;  %v2580_v46 = vcombine.low %v768_v40, %v772_v41 }
  0x46   :  { %1131 = vmatpush1.bf16.msra.mxu0 %v2564_v38  ;;  %v780_v45 = vld [vmem:[%s3482_s5 + $0x120] sm:$0xff]  ;;  %v777_v38 = vld [vmem:[%s3482_s5 + $0x108] sm:$0xff] }
  0x47   :  { %2664 = vmatmul.mubr.msk.bf16.gmra.mrb[4].mxu0 %vm182_vm2, %v2740_v8  ;;  %1132 = vmatprep.subr.bf16.mxu0 %v2573_v39  ;;  %v2589_v47 = vcombine.high %v776_v44, %v780_v45  ;;  %v784_v48 = vld [vmem:[%s3482_s5 + $0x140] sm:$0xff]  ;;  %v2588_v50 = vcombine.low %v776_v44, %v780_v45  ;;  %v781_v39 = vld [vmem:[%s3482_s5 + $0x128] sm:$0xff]  ;;  %v2582_v45 = vcombine.low %v769_v28, %v773_v29 }
  0x48   :  { %2667 = vmatprep.mubr.msk.bf16.mxu0 %vm182_vm2, %v2741_v9  ;;  %2698 = vmatpush3.bf16.msra.mxu1 %v2756_v24  ;;  %v788_v49 = vld [vmem:[%s3482_s5 + $0x160] sm:$0xff] }
  0x49   :  { %1321 = vmatprep.subr.bf16.mxu1 %v2559_v34  ;;  %v2597_v51 = vcombine.high %v784_v48, %v788_v49  ;;  %v792_v52 = vld [vmem:[%s3482_s5 + $0x180] sm:$0xff]  ;;  %v2596_v54 = vcombine.low %v784_v48, %v788_v49  ;;  %v785_v49 = vld [vmem:[%s3482_s5 + $0x148] sm:$0xff] }
  0x4a   :  { %1133 = vmatpush1.bf16.msra.mxu0 %v2572_v42  ;;  %v796_v53 = vld [vmem:[%s3482_s5 + $0x1a0] sm:$0xff] }
  0x4b   :  { %1134 = vmatprep.subr.bf16.mxu0 %v2581_v43  ;;  %v2605_v55 = vcombine.high %v792_v52, %v796_v53  ;;  %v2604_v56 = vcombine.low %v792_v52, %v796_v53  ;;  %v3044_v57 = vld [vmem:[#allocation2] ss:$0 sm:$0xff] }
  0x4e   :  { %1135 = vmatpush1.bf16.msra.mxu0 %v2580_v46 }
  0x4f   :  { %2668 = vmatmul.mubr.msk.bf16.gmra.mrb[8].mxu0 %vm182_vm2, %v2742_v12  ;;  %1136 = vmatprep.subr.bf16.mxu0 %v2589_v47  ;;  %v2591_v47 = vcombine.high %v777_v38, %v781_v39 }
  0x50   :  { %2671 = vmatprep.mubr.msk.bf16.mxu0 %vm182_vm2, %v2743_v13  ;;  %v2567_v13 = vcombine.high %v753_v6, %v757_v7 }
  0x52   :  { %1137 = vmatpush1.bf16.msra.mxu0 %v2588_v50  ;;  %v789_v50 = vld [vmem:[%s3482_s5 + $0x168] sm:$0xff] }
  0x53   :  { %1138 = vmatprep.subr.bf16.mxu0 %v2597_v51 }
  0x56   :  { %1139 = vmatpush1.bf16.msra.mxu0 %v2596_v54  ;;  %v2590_v54 = vcombine.low %v777_v38, %v781_v39 }
  0x57   :  { %2672 = vmatmul.mubr.msk.bf16.gmra.mrb[12].mxu0 %vm182_vm2, %v2744_v14  ;;  %1140 = vmatprep.subr.bf16.mxu0 %v2605_v55 }
  0x58   :  { %2675 = vmatprep.mubr.msk.bf16.mxu0 %vm182_vm2, %v2745_v15 }
  0x5a   :  { %1141 = vmatpush1.bf16.msra.mxu0 %v2604_v56 }
  0x5f   :  { %2676 = vmatmul.mubr.msk.bf16.gmra.mrb[16].mxu0 %vm182_vm2, %v2746_v16  ;;  %v761_v16 = vld [vmem:[%s3482_s5 + $0x88] sm:$0xff] }
  0x60   :  { %2679 = vmatprep.mubr.msk.bf16.mxu0 %vm182_vm2, %v2747_v17  ;;  %v765_v17 = vld [vmem:[%s3482_s5 + $0xa8] sm:$0xff] }
  0x61   :  { %v2575_v25 = vcombine.high %v761_v16, %v765_v17  ;;  %v2574_v35 = vcombine.low %v761_v16, %v765_v17 }
  0x67   :  { %2680 = vmatmul.mubr.msk.bf16.gmra.mrb[20].mxu0 %vm182_vm2, %v2748_v18 }
  0x68   :  { %2683 = vmatprep.mubr.msk.bf16.mxu0 %vm182_vm2, %v2749_v19 }
  0x6f   :  { %2684 = vmatmul.mubr.msk.bf16.gmra.mrb[24].mxu0 %vm182_vm2, %v2750_v20 }
  0x70   :  { %2687 = vmatprep.mubr.msk.bf16.mxu0 %vm182_vm2, %v2751_v21 }
  0x77   :  { %2688 = vmatmul.mubr.msk.bf16.gmra.mrb[28].mxu0 %vm182_vm2, %v2752_v22 }
 0x112   :  { %v2661_v58 = vpop.f32.mrb[0].mxu0 }
 0x113   :  { %v281_v59 = vadd.f32 %v2661_v58, %v3044_v57  ;;  %v272_v60 = vpop.f32.mrb[1].mxu0  ;;  %v2599_v58 = vcombine.high %v785_v49, %v789_v50 }
 0x114   :  { %v273_v61 = vadd.f32 %v3044_v57, %v272_v60  ;;  %v2662_v62 = vpop.f32.mrb[2].mxu0 }
 0x115   :  { %v284_v63 = vadd.f32 %v2662_v62, %v3044_v57  ;;  %v275_v0 = vpop.f32.mrb[3].mxu0  ;;  %v401_v2 = vmax.f32 %v281_v59, 0.0  ;;  %v797_v62 = vld [vmem:[%s3482_s5 + $0x1a8] sm:$0xff] }
 0x116   :  { %v276_v1 = vadd.f32 %v3044_v57, %v275_v0  ;;  %v399_v4 = vmax.f32 %v273_v61, 0.0  ;;  %v793_v61 = vld [vmem:[%s3482_s5 + $0x188] sm:$0xff] }
 0x117   :  { %v402_v3 = vmax.f32 %v284_v63, 0.0  ;;  %v2607_v6 = vcombine.high %v793_v61, %v797_v62 }
 0x118   :  { %v400_v5 = vmax.f32 %v276_v1, 0.0 }
 0x119   :  { %v432_v8 = vpack.c.bf16 %v402_v3, %v401_v2 }
 0x11a   :  { %v2665_v9 = vpop.f32.mrb[4].mxu0  ;;  %v431_v10 = vpack.c.bf16 %v400_v5, %v399_v4  ;;  %v2598_v4 = vcombine.low %v785_v49, %v789_v50 }
 0x11b   :  { %v297_v11 = vadd.f32 %v2665_v9, %v3044_v57  ;;  %v288_v12 = vpop.f32.mrb[5].mxu0 }
 0x11c   :  { %v289_v14 = vadd.f32 %v3044_v57, %v288_v12  ;;  %2699 = vmatprep.mubr.msk.bf16.mxu1 %vm486_vm3, %v431_v10  ;;  %v2666_v15 = vpop.f32.mrb[6].mxu0 }
 0x11d   :  { %v405_v18 = vmax.f32 %v297_v11, 0.0  ;;  %v300_v19 = vadd.f32 %v2666_v15, %v3044_v57  ;;  %2700 = vmatmul.mubr.msk.bf16.vlgmr.msra.gmra.mrb[0].mxu1 %vm486_vm3, %v432_v8  ;;  %v291_v20 = vpop.f32.mrb[7].mxu0  ;;  %v2606_v11 = vcombine.low %v793_v61, %v797_v62 }
 0x11e   :  { %v403_v21 = vmax.f32 %v289_v14, 0.0  ;;  %v292_v22 = vadd.f32 %v3044_v57, %v291_v20  ;;  %1322 = vmatpush1.bf16.msra.mxu1 %v2558_v33  ;;  %v2583_v33 = vcombine.high %v769_v28, %v773_v29 }
 0x11f   :  { %v406_v24 = vmax.f32 %v300_v19, 0.0  ;;  %1323 = vmatprep.subr.bf16.mxu1 %v2567_v13 }
 0x120   :  { %v404_v26 = vmax.f32 %v292_v22, 0.0 }
 0x121   :  { %v434_v31 = vpack.c.bf16 %v406_v24, %v405_v18 }
 0x122   :  { %v433_v32 = vpack.c.bf16 %v404_v26, %v403_v21  ;;  %v2669_v34 = vpop.f32.mrb[8].mxu0  ;;  %1324 = vmatpush1.bf16.msra.mxu1 %v2566_v23 }
 0x123   :  { %v313_v27 = vadd.f32 %v2669_v34, %v3044_v57  ;;  %v304_v30 = vpop.f32.mrb[9].mxu0  ;;  %1325 = vmatprep.subr.bf16.mxu1 %v2575_v25 }
 0x124   :  { %2703 = vmatprep.mubr.msk.bf16.mxu1 %vm486_vm3, %v433_v32  ;;  %v305_v36 = vadd.f32 %v3044_v57, %v304_v30  ;;  %v2670_v37 = vpop.f32.mrb[10].mxu0 }
 0x125   :  { %2704 = vmatmul.mubr.msk.bf16.gmra.mrb[4].mxu1 %vm486_vm3, %v434_v31  ;;  %v409_v40 = vmax.f32 %v313_v27, 0.0  ;;  %v316_v41 = vadd.f32 %v2670_v37, %v3044_v57  ;;  %v307_v42 = vpop.f32.mrb[11].mxu0 }
 0x126   :  { %v407_v43 = vmax.f32 %v305_v36, 0.0  ;;  %v308_v44 = vadd.f32 %v3044_v57, %v307_v42  ;;  %1326 = vmatpush1.bf16.msra.mxu1 %v2574_v35 }
 0x127   :  { %v410_v46 = vmax.f32 %v316_v41, 0.0  ;;  %1327 = vmatprep.subr.bf16.mxu1 %v2583_v33 }
 0x128   :  { %v408_v48 = vmax.f32 %v308_v44, 0.0 }
 0x129   :  { %v436_v51 = vpack.c.bf16 %v410_v46, %v409_v40 }
 0x12a   :  { %v435_v52 = vpack.c.bf16 %v408_v48, %v407_v43  ;;  %v2673_v53 = vpop.f32.mrb[12].mxu0  ;;  %1328 = vmatpush1.bf16.msra.mxu1 %v2582_v45 }
 0x12b   :  { %v329_v55 = vadd.f32 %v2673_v53, %v3044_v57  ;;  %v320_v56 = vpop.f32.mrb[13].mxu0  ;;  %1329 = vmatprep.subr.bf16.mxu1 %v2591_v47 }
 0x12c   :  { %2707 = vmatprep.mubr.msk.bf16.mxu1 %vm486_vm3, %v435_v52  ;;  %v321_v59 = vadd.f32 %v3044_v57, %v320_v56  ;;  %v2674_v60 = vpop.f32.mrb[14].mxu0 }
 0x12d   :  { %2708 = vmatmul.mubr.msk.bf16.gmra.mrb[8].mxu1 %vm486_vm3, %v436_v51  ;;  %v413_v63 = vmax.f32 %v329_v55, 0.0  ;;  %v332_v0 = vadd.f32 %v2674_v60, %v3044_v57  ;;  %v323_v1 = vpop.f32.mrb[15].mxu0 }
 0x12e   :  { %v411_v2 = vmax.f32 %v321_v59, 0.0  ;;  %v324_v3 = vadd.f32 %v3044_v57, %v323_v1  ;;  %1330 = vmatpush1.bf16.msra.mxu1 %v2590_v54 }
 0x12f   :  { %v414_v5 = vmax.f32 %v332_v0, 0.0  ;;  %1331 = vmatprep.subr.bf16.mxu1 %v2599_v58 }
 0x130   :  { %v412_v7 = vmax.f32 %v324_v3, 0.0 }
 0x131   :  { %v438_v8 = vpack.c.bf16 %v414_v5, %v413_v63  ;;  %v804_v5 = vld [vmem:[%s3482_s5 + $0x1e0] sm:$0xff] }
 0x132   :  { %v437_v9 = vpack.c.bf16 %v412_v7, %v411_v2  ;;  %v2677_v10 = vpop.f32.mrb[16].mxu0  ;;  %1332 = vmatpush1.bf16.msra.mxu1 %v2598_v4  ;;  %v800_v4 = vld [vmem:[%s3482_s5 + $0x1c0] sm:$0xff] }
 0x133   :  { %v345_v12 = vadd.f32 %v2677_v10, %v3044_v57  ;;  %v336_v13 = vpop.f32.mrb[17].mxu0  ;;  %1333 = vmatprep.subr.bf16.mxu1 %v2607_v6  ;;  %v2612_v6 = vcombine.low %v800_v4, %v804_v5  ;;  %v2613_v7 = vcombine.high %v800_v4, %v804_v5 }
 0x134   :  { %2711 = vmatprep.mubr.msk.bf16.mxu1 %vm486_vm3, %v437_v9  ;;  %v337_v14 = vadd.f32 %v3044_v57, %v336_v13  ;;  %v2678_v15 = vpop.f32.mrb[18].mxu0  ;;  %v750_v13 = vld [vmem:[%s3482_s5 + $0x30] sm:$0xff] }
 0x135   :  { %2712 = vmatmul.mubr.msk.bf16.gmra.mrb[12].mxu1 %vm486_vm3, %v438_v8  ;;  %v417_v16 = vmax.f32 %v345_v12, 0.0  ;;  %v348_v17 = vadd.f32 %v2678_v15, %v3044_v57  ;;  %v339_v18 = vpop.f32.mrb[19].mxu0  ;;  %v805_v8 = vld [vmem:[%s3482_s5 + $0x1e8] sm:$0xff]  ;;  %1142 = vmatprep.subr.bf16.mxu0 %v2613_v7  ;;  %v746_v12 = vld [vmem:[%s3482_s5 + $0x10] sm:$0xff] }
 0x136   :  { %v415_v19 = vmax.f32 %v337_v14, 0.0  ;;  %v340_v20 = vadd.f32 %v3044_v57, %v339_v18  ;;  %1334 = vmatpush1.bf16.msra.mxu1 %v2606_v11  ;;  %1143 = vmatpush1.bf16.msra.mxu0 %v2612_v6  ;;  %v2831_v11 = vmov 0   ;;  %v747_v14 = vld [vmem:[%s3482_s5 + $0x18] sm:$0xff]  ;;  %v2560_v15 = vcombine.low %v746_v12, %v750_v13 }
 0x137   :  { %v418_v21 = vmax.f32 %v348_v17, 0.0  ;;  %1160 = vmatprep.mubr.bf16.mxu0 %v2831_v11  ;;  %v751_v17 = vld [vmem:[%s3482_s5 + $0x38] sm:$0xff] }
 0x138   :  { %v416_v22 = vmax.f32 %v340_v20, 0.0  ;;  %v2562_v18 = vcombine.low %v747_v14, %v751_v17  ;;  %v3159_v20 = vld [vmem:[#allocation4] ss:$0 sm:$0xff] }
 0x139   :  { %v440_v23 = vpack.c.bf16 %v418_v21, %v417_v16  ;;  %v2561_v16 = vcombine.high %v746_v12, %v750_v13 }
 0x13a   :  { %v439_v24 = vpack.c.bf16 %v416_v22, %v415_v19  ;;  %v2681_v25 = vpop.f32.mrb[20].mxu0  ;;  %v2563_v19 = vcombine.high %v747_v14, %v751_v17  ;;  %v782_v14 = vld [vmem:[%s3482_s5 + $0x130] sm:$0xff] }
 0x13b   :  { %v361_v26 = vadd.f32 %v2681_v25, %v3044_v57  ;;  %v352_v28 = vpop.f32.mrb[21].mxu0  ;;  %1514 = vmatprep.subr.bf16.mxu0 %v2561_v16  ;;  %v783_v16 = vld [vmem:[%s3482_s5 + $0x138] sm:$0xff] }
 0x13c   :  { %2715 = vmatprep.mubr.msk.bf16.mxu1 %vm486_vm3, %v439_v24  ;;  %v353_v29 = vadd.f32 %v3044_v57, %v352_v28  ;;  %v2682_v31 = vpop.f32.mrb[22].mxu0 }
 0x13d   :  { %2716 = vmatmul.mubr.msk.bf16.gmra.mrb[16].mxu1 %vm486_vm3, %v440_v23  ;;  %v421_v32 = vmax.f32 %v361_v26, 0.0  ;;  %v364_v34 = vadd.f32 %v2682_v31, %v3044_v57  ;;  %v355_v35 = vpop.f32.mrb[23].mxu0 }
 0x13e   :  { %v419_v27 = vmax.f32 %v353_v29, 0.0  ;;  %v356_v30 = vadd.f32 %v3044_v57, %v355_v35 }
 0x13f   :  { %v422_v33 = vmax.f32 %v364_v34, 0.0  ;;  %v754_v34 = vld [vmem:[%s3482_s5 + $0x50] sm:$0xff] }
 0x140   :  { %v420_v36 = vmax.f32 %v356_v30, 0.0  ;;  %v758_v30 = vld [vmem:[%s3482_s5 + $0x70] sm:$0xff] }
 0x141   :  { %v442_v37 = vpack.c.bf16 %v422_v33, %v421_v32  ;;  %v755_v33 = vld [vmem:[%s3482_s5 + $0x58] sm:$0xff] }
 0x142   :  { %v441_v38 = vpack.c.bf16 %v420_v36, %v419_v27  ;;  %v2685_v39 = vpop.f32.mrb[24].mxu0  ;;  %v759_v36 = vld [vmem:[%s3482_s5 + $0x78] sm:$0xff] }
 0x143   :  { %v377_v40 = vadd.f32 %v2685_v39, %v3044_v57  ;;  %v368_v41 = vpop.f32.mrb[25].mxu0 }
 0x144   :  { %2719 = vmatprep.mubr.msk.bf16.mxu1 %vm486_vm3, %v441_v38  ;;  %v369_v42 = vadd.f32 %v3044_v57, %v368_v41  ;;  %v2686_v43 = vpop.f32.mrb[26].mxu0 }
 0x145   :  { %2720 = vmatmul.mubr.msk.bf16.gmra.mrb[20].mxu1 %vm486_vm3, %v442_v37  ;;  %v425_v44 = vmax.f32 %v377_v40, 0.0  ;;  %v380_v45 = vadd.f32 %v2686_v43, %v3044_v57  ;;  %v371_v46 = vpop.f32.mrb[27].mxu0  ;;  %v762_v40 = vld [vmem:[%s3482_s5 + $0x90] sm:$0xff]  ;;  %v2569_v43 = vcombine.high %v754_v34, %v758_v30 }
 0x146   :  { %v423_v47 = vmax.f32 %v369_v42, 0.0  ;;  %v372_v48 = vadd.f32 %v3044_v57, %v371_v46  ;;  %v763_v46 = vld [vmem:[%s3482_s5 + $0x98] sm:$0xff] }
 0x147   :  { %v426_v49 = vmax.f32 %v380_v45, 0.0  ;;  %v766_v45 = vld [vmem:[%s3482_s5 + $0xb0] sm:$0xff] }
 0x148   :  { %v424_v50 = vmax.f32 %v372_v48, 0.0  ;;  %v2576_v5 = vcombine.low %v762_v40, %v766_v45 }
 0x149   :  { %v444_v51 = vpack.c.bf16 %v426_v49, %v425_v44  ;;  %v2571_v44 = vcombine.high %v755_v33, %v759_v36 }
 0x14a   :  { %v443_v52 = vpack.c.bf16 %v424_v50, %v423_v47  ;;  %v2689_v53 = vpop.f32.mrb[28].mxu0  ;;  %v767_v47 = vld [vmem:[%s3482_s5 + $0xb8] sm:$0xff] }
 0x14b   :  { %v393_v54 = vadd.f32 %v2689_v53, %v3044_v57  ;;  %v384_v55 = vpop.f32.mrb[29].mxu0  ;;  %v2568_v53 = vcombine.low %v754_v34, %v758_v30  ;;  %v787_v34 = vld [vmem:[%s3482_s5 + $0x158] sm:$0xff] }
 0x14c   :  { %2723 = vmatprep.mubr.msk.bf16.mxu1 %vm486_vm3, %v443_v52  ;;  %v385_v56 = vadd.f32 %v3044_v57, %v384_v55  ;;  %v2690_v58 = vpop.f32.mrb[30].mxu0 }
 0x14d   :  { %2724 = vmatmul.mubr.msk.bf16.gmra.mrb[24].mxu1 %vm486_vm3, %v444_v51  ;;  %v429_v59 = vmax.f32 %v393_v54, 0.0  ;;  %v396_v60 = vadd.f32 %v2690_v58, %v3044_v57  ;;  %v387_v61 = vpop.f32.mrb[31].mxu0  ;;  %v2570_v54 = vcombine.low %v755_v33, %v759_v36  ;;  %v2577_v58 = vcombine.high %v762_v40, %v766_v45 }
 0x14e   :  { %v427_v62 = vmax.f32 %v385_v56, 0.0  ;;  %v388_v63 = vadd.f32 %v3044_v57, %v387_v61  ;;  %v801_v57 = vld [vmem:[%s3482_s5 + $0x1c8] sm:$0xff]  ;;  %v770_v61 = vld [vmem:[%s3482_s5 + $0xd0] sm:$0xff] }
 0x14f   :  { %v430_v0 = vmax.f32 %v396_v60, 0.0  ;;  %v2614_v9 = vcombine.low %v801_v57, %v805_v8  ;;  %v2615_v10 = vcombine.high %v801_v57, %v805_v8  ;;  %v2578_v57 = vcombine.low %v763_v46, %v767_v47 }
 0x150   :  { %v428_v1 = vmax.f32 %v388_v63, 0.0  ;;  %v774_v63 = vld [vmem:[%s3482_s5 + $0xf0] sm:$0xff] }
 0x151   :  { %v446_v2 = vpack.c.bf16 %v430_v0, %v429_v59  ;;  %1335 = vmatprep.subr.bf16.mxu1 %v2615_v10  ;;  %v2579_v59 = vcombine.high %v763_v46, %v767_v47  ;;  %v771_v0 = vld [vmem:[%s3482_s5 + $0xd8] sm:$0xff]  ;;  %v2585_v8 = vcombine.high %v770_v61, %v774_v63  ;;  %v778_v10 = vld [vmem:[%s3482_s5 + $0x110] sm:$0xff] }
 0x152   :  { %v445_v3 = vpack.c.bf16 %v428_v1, %v427_v62  ;;  %1336 = vmatpush1.bf16.msra.mxu1 %v2614_v9  ;;  %v775_v1 = vld [vmem:[%s3482_s5 + $0xf8] sm:$0xff]  ;;  %v2592_v36 = vcombine.low %v778_v10, %v782_v14  ;;  %v798_v47 = vld [vmem:[%s3482_s5 + $0x1b0] sm:$0xff] }
 0x153   :  { %1707 = vmatprep.subr.bf16.mxu1 %v2563_v19  ;;  %v2587_v9 = vcombine.high %v771_v0, %v775_v1 }
 0x154   :  { %2727 = vmatprep.mubr.msk.bf16.mxu1 %vm486_vm3, %v445_v3 }
 0x155   :  { %2728 = vmatmul.mubr.msk.bf16.gmra.mrb[28].mxu1 %vm486_vm3, %v446_v2 }
 0x156   :  { %1353 = vmatprep.mubr.bf16.mxu1 %v2831_v11 }
 0x1f0   :  { %v2701_v21 = vpop.f32.mrb[0].mxu1 }
 0x1f1   :  { %v578_v22 = vadd.f32 %v2701_v21, %v3159_v20  ;;  %v569_v23 = vpop.f32.mrb[1].mxu1 }
 0x1f2   :  { %v570_v24 = vadd.f32 %v3159_v20, %v569_v23  ;;  %v2702_v25 = vpop.f32.mrb[2].mxu1  ;;  %v2584_v23 = vcombine.low %v770_v61, %v774_v63  ;;  %v802_v61 = vld [vmem:[%s3482_s5 + $0x1d0] sm:$0xff] }
 0x1f3   :  { %v581_v26 = vadd.f32 %v2702_v25, %v3159_v20  ;;  %v572_v28 = vpop.f32.mrb[3].mxu1  ;;  %v698_v31 = vmax.f32 %v578_v22, 0.0  ;;  %v806_v63 = vld [vmem:[%s3482_s5 + $0x1f0] sm:$0xff] }
 0x1f4   :  { %v573_v29 = vadd.f32 %v3159_v20, %v572_v28  ;;  %v696_v35 = vmax.f32 %v570_v24, 0.0  ;;  %v2586_v24 = vcombine.low %v771_v0, %v775_v1  ;;  %v803_v0 = vld [vmem:[%s3482_s5 + $0x1d8] sm:$0xff] }
 0x1f5   :  { %v699_v32 = vmax.f32 %v581_v26, 0.0  ;;  %v2593_v26 = vcombine.high %v778_v10, %v782_v14  ;;  %v807_v1 = vld [vmem:[%s3482_s5 + $0x1f8] sm:$0xff]  ;;  %v2617_v10 = vcombine.high %v802_v61, %v806_v63 }
 0x1f6   :  { %v697_v27 = vmax.f32 %v573_v29, 0.0  ;;  %v786_v29 = vld [vmem:[%s3482_s5 + $0x150] sm:$0xff] }
 0x1f7   :  { %v3177_v37 = vpack.c.bf16 %v699_v32, %v698_v31  ;;  %v790_v32 = vld [vmem:[%s3482_s5 + $0x170] sm:$0xff] }
 0x1f8   :  { %v3179_v38 = vpack.c.bf16 %v697_v27, %v696_v35  ;;  %v2705_v39 = vpop.f32.mrb[4].mxu1  ;;  %v791_v35 = vld [vmem:[%s3482_s5 + $0x178] sm:$0xff] }
 0x1f9   :  { %v594_v41 = vadd.f32 %v2705_v39, %v3159_v20  ;;  %v585_v42 = vpop.f32.mrb[5].mxu1 }
 0x1fa   :  { %v586_v48 = vadd.f32 %v3159_v20, %v585_v42  ;;  %1161 = vmatmul.mubr.bf16.vlgmr.msra.gmra.mrb[32].mxu0 %v3179_v38  ;;  %1354 = vmatmul.mubr.bf16.vlgmr.msra.gmra.mrb[32].mxu1 %v3179_v38  ;;  %v2706_v49 = vpop.f32.mrb[6].mxu1  ;;  %v2601_v42 = vcombine.high %v786_v29, %v790_v32 }
 0x1fb   :  { %v702_v50 = vmax.f32 %v594_v41, 0.0  ;;  %1515 = vmatpush1.bf16.msra.mxu0 %v2560_v15  ;;  %1708 = vmatpush1.bf16.msra.mxu1 %v2562_v18  ;;  %v597_v51 = vadd.f32 %v2706_v49, %v3159_v20  ;;  %v588_v52 = vpop.f32.mrb[7].mxu1  ;;  %v779_v15 = vld [vmem:[%s3482_s5 + $0x118] sm:$0xff] }
 0x1fc   :  { %v700_v55 = vmax.f32 %v586_v48, 0.0  ;;  %v589_v56 = vadd.f32 %v3159_v20, %v588_v52  ;;  %1170 = vmatprep.mubr.bf16.mxu0 %v2831_v11  ;;  %1363 = vmatprep.mubr.bf16.mxu1 %v2831_v11  ;;  %v2595_v28 = vcombine.high %v779_v15, %v783_v16  ;;  %v2594_v39 = vcombine.low %v779_v15, %v783_v16  ;;  %v795_v48 = vld [vmem:[%s3482_s5 + $0x198] sm:$0xff] }
 0x1fd   :  { %v703_v60 = vmax.f32 %v597_v51, 0.0  ;;  %1516 = vmatprep.subr.bf16.mxu0 %v2569_v43  ;;  %1709 = vmatprep.subr.bf16.mxu1 %v2571_v44  ;;  %v2603_v43 = vcombine.high %v787_v34, %v791_v35  ;;  %v794_v44 = vld [vmem:[%s3482_s5 + $0x190] sm:$0xff]  ;;  %v799_v49 = vld [vmem:[%s3482_s5 + $0x1b8] sm:$0xff] }
 0x1fe   :  { %v701_v62 = vmax.f32 %v589_v56, 0.0  ;;  %v2602_v56 = vcombine.low %v787_v34, %v791_v35 }
 0x1ff   :  { %v3213_v2 = vpack.c.bf16 %v703_v60, %v702_v50  ;;  %1517 = vmatpush1.bf16.msra.mxu0 %v2568_v53  ;;  %1710 = vmatpush1.bf16.msra.mxu1 %v2570_v54  ;;  %v2611_v60 = vcombine.high %v795_v48, %v799_v49 }
 0x200   :  { %v3215_v3 = vpack.c.bf16 %v701_v62, %v700_v55  ;;  %v2709_v4 = vpop.f32.mrb[8].mxu1  ;;  %1518 = vmatprep.subr.bf16.mxu0 %v2577_v58  ;;  %1711 = vmatprep.subr.bf16.mxu1 %v2579_v59  ;;  %v2600_v55 = vcombine.low %v786_v29, %v790_v32  ;;  %v2609_v59 = vcombine.high %v794_v44, %v798_v47 }
 0x201   :  { %v610_v6 = vadd.f32 %v2709_v4, %v3159_v20  ;;  %v601_v7 = vpop.f32.mrb[9].mxu1 }
 0x202   :  { %1171 = vmatmul.mubr.bf16.gmra.mrb[36].mxu0 %v3177_v37  ;;  %1364 = vmatmul.mubr.bf16.gmra.mrb[36].mxu1 %v3177_v37  ;;  %v602_v12 = vadd.f32 %v3159_v20, %v601_v7  ;;  %v2710_v13 = vpop.f32.mrb[10].mxu1  ;;  %v2610_v7 = vcombine.low %v795_v48, %v799_v49 }
 0x203   :  { %v706_v17 = vmax.f32 %v610_v6, 0.0  ;;  %1180 = vmatprep.mubr.bf16.mxu0 %v2831_v11  ;;  %1373 = vmatprep.mubr.bf16.mxu1 %v2831_v11  ;;  %v613_v18 = vadd.f32 %v2710_v13, %v3159_v20  ;;  %v604_v19 = vpop.f32.mrb[11].mxu1  ;;  %v2608_v6 = vcombine.low %v794_v44, %v798_v47 }
 0x204   :  { %v704_v21 = vmax.f32 %v602_v12, 0.0  ;;  %v605_v22 = vadd.f32 %v3159_v20, %v604_v19  ;;  %1519 = vmatpush1.bf16.msra.mxu0 %v2576_v5  ;;  %1712 = vmatpush1.bf16.msra.mxu1 %v2578_v57  ;;  %v2619_v12 = vcombine.high %v803_v0, %v807_v1 }
 0x205   :  { %v707_v25 = vmax.f32 %v613_v18, 0.0  ;;  %1520 = vmatprep.subr.bf16.mxu0 %v2585_v8  ;;  %1713 = vmatprep.subr.bf16.mxu1 %v2587_v9 }
 0x206   :  { %v705_v31 = vmax.f32 %v605_v22, 0.0  ;;  %v2618_v22 = vcombine.low %v803_v0, %v807_v1 }
 0x207   :  { %v3249_v27 = vpack.c.bf16 %v707_v25, %v706_v17 }
 0x208   :  { %v3251_v30 = vpack.c.bf16 %v705_v31, %v704_v21  ;;  %v2713_v33 = vpop.f32.mrb[12].mxu1  ;;  %1521 = vmatpush1.bf16.msra.mxu0 %v2584_v23  ;;  %1714 = vmatpush1.bf16.msra.mxu1 %v2586_v24  ;;  %v2616_v21 = vcombine.low %v802_v61, %v806_v63 }
 0x209   :  { %v626_v40 = vadd.f32 %v2713_v33, %v3159_v20  ;;  %v617_v41 = vpop.f32.mrb[13].mxu1  ;;  %1522 = vmatprep.subr.bf16.mxu0 %v2593_v26  ;;  %1715 = vmatprep.subr.bf16.mxu1 %v2595_v28 }
 0x20a   :  { %1181 = vmatmul.mubr.bf16.gmra.mrb[40].mxu0 %v3215_v3  ;;  %1374 = vmatmul.mubr.bf16.gmra.mrb[40].mxu1 %v3215_v3  ;;  %v618_v45 = vadd.f32 %v3159_v20, %v617_v41  ;;  %v2714_v46 = vpop.f32.mrb[14].mxu1 }
 0x20b   :  { %1190 = vmatprep.mubr.bf16.mxu0 %v2831_v11  ;;  %1383 = vmatprep.mubr.bf16.mxu1 %v2831_v11  ;;  %v710_v50 = vmax.f32 %v626_v40, 0.0  ;;  %v629_v51 = vadd.f32 %v2714_v46, %v3159_v20  ;;  %v620_v52 = vpop.f32.mrb[15].mxu1 }
 0x20c   :  { %v708_v53 = vmax.f32 %v618_v45, 0.0  ;;  %v621_v54 = vadd.f32 %v3159_v20, %v620_v52  ;;  %1523 = vmatpush1.bf16.msra.mxu0 %v2592_v36  ;;  %1716 = vmatpush1.bf16.msra.mxu1 %v2594_v39 }
 0x20d   :  { %v711_v58 = vmax.f32 %v629_v51, 0.0  ;;  %1524 = vmatprep.subr.bf16.mxu0 %v2601_v42  ;;  %1717 = vmatprep.subr.bf16.mxu1 %v2603_v43 }
 0x20e   :  { %v709_v62 = vmax.f32 %v621_v54, 0.0 }
 0x20f   :  { %v3285_v4 = vpack.c.bf16 %v711_v58, %v710_v50 }
 0x210   :  { %v3287_v5 = vpack.c.bf16 %v709_v62, %v708_v53  ;;  %v2717_v57 = vpop.f32.mrb[16].mxu1  ;;  %1525 = vmatpush1.bf16.msra.mxu0 %v2600_v55  ;;  %1718 = vmatpush1.bf16.msra.mxu1 %v2602_v56 }
 0x211   :  { %v642_v8 = vadd.f32 %v2717_v57, %v3159_v20  ;;  %v633_v9 = vpop.f32.mrb[17].mxu1  ;;  %1526 = vmatprep.subr.bf16.mxu0 %v2609_v59  ;;  %1719 = vmatprep.subr.bf16.mxu1 %v2611_v60 }
 0x212   :  { %1191 = vmatmul.mubr.bf16.gmra.mrb[44].mxu0 %v3213_v2  ;;  %1384 = vmatmul.mubr.bf16.gmra.mrb[44].mxu1 %v3213_v2  ;;  %v634_v13 = vadd.f32 %v3159_v20, %v633_v9  ;;  %v2718_v14 = vpop.f32.mrb[18].mxu1 }
 0x213   :  { %1200 = vmatprep.mubr.bf16.mxu0 %v2831_v11  ;;  %1393 = vmatprep.mubr.bf16.mxu1 %v2831_v11  ;;  %v714_v15 = vmax.f32 %v642_v8, 0.0  ;;  %v645_v16 = vadd.f32 %v2718_v14, %v3159_v20  ;;  %v636_v17 = vpop.f32.mrb[19].mxu1 }
 0x214   :  { %v712_v18 = vmax.f32 %v634_v13, 0.0  ;;  %v637_v19 = vadd.f32 %v3159_v20, %v636_v17  ;;  %1527 = vmatpush1.bf16.msra.mxu0 %v2608_v6  ;;  %1720 = vmatpush1.bf16.msra.mxu1 %v2610_v7 }
 0x215   :  { %v715_v23 = vmax.f32 %v645_v16, 0.0  ;;  %1528 = vmatprep.subr.bf16.mxu0 %v2617_v10  ;;  %1721 = vmatprep.subr.bf16.mxu1 %v2619_v12 }
 0x216   :  { %v713_v24 = vmax.f32 %v637_v19, 0.0 }
 0x217   :  { %v3297_v25 = vpack.c.bf16 %v715_v23, %v714_v15 }
 0x218   :  { %v3299_v26 = vpack.c.bf16 %v713_v24, %v712_v18  ;;  %v2721_v28 = vpop.f32.mrb[20].mxu1  ;;  %1529 = vmatpush1.bf16.msra.mxu0 %v2616_v21  ;;  %1722 = vmatpush1.bf16.msra.mxu1 %v2618_v22 }
 0x219   :  { %v658_v29 = vadd.f32 %v2721_v28, %v3159_v20  ;;  %v649_v31 = vpop.f32.mrb[21].mxu1 }
 0x21a   :  { %1201 = vmatmul.mubr.bf16.gmra.mrb[48].mxu0 %v3251_v30  ;;  %1394 = vmatmul.mubr.bf16.gmra.mrb[48].mxu1 %v3251_v30  ;;  %v650_v32 = vadd.f32 %v3159_v20, %v649_v31  ;;  %v2722_v34 = vpop.f32.mrb[22].mxu1 }
 0x21b   :  { %1210 = vmatprep.mubr.bf16.mxu0 %v2831_v11  ;;  %1403 = vmatprep.mubr.bf16.mxu1 %v2831_v11  ;;  %v718_v35 = vmax.f32 %v658_v29, 0.0  ;;  %v661_v33 = vadd.f32 %v2722_v34, %v3159_v20  ;;  %v652_v36 = vpop.f32.mrb[23].mxu1 }
 0x21c   :  { %v716_v39 = vmax.f32 %v650_v32, 0.0  ;;  %v653_v40 = vadd.f32 %v3159_v20, %v652_v36 }
 0x21d   :  { %v719_v41 = vmax.f32 %v661_v33, 0.0 }
 0x21e   :  { %v717_v42 = vmax.f32 %v653_v40, 0.0 }
 0x21f   :  { %v3309_v43 = vpack.c.bf16 %v719_v41, %v718_v35 }
 0x220   :  { %v3311_v44 = vpack.c.bf16 %v717_v42, %v716_v39  ;;  %v2725_v45 = vpop.f32.mrb[24].mxu1 }
 0x221   :  { %v674_v46 = vadd.f32 %v2725_v45, %v3159_v20  ;;  %v665_v47 = vpop.f32.mrb[25].mxu1 }
 0x222   :  { %1211 = vmatmul.mubr.bf16.gmra.mrb[52].mxu0 %v3249_v27  ;;  %1404 = vmatmul.mubr.bf16.gmra.mrb[52].mxu1 %v3249_v27  ;;  %v666_v48 = vadd.f32 %v3159_v20, %v665_v47  ;;  %v2726_v49 = vpop.f32.mrb[26].mxu1 }
 0x223   :  { %1220 = vmatprep.mubr.bf16.mxu0 %v2831_v11  ;;  %1413 = vmatprep.mubr.bf16.mxu1 %v2831_v11  ;;  %v722_v50 = vmax.f32 %v674_v46, 0.0  ;;  %v677_v51 = vadd.f32 %v2726_v49, %v3159_v20  ;;  %v668_v52 = vpop.f32.mrb[27].mxu1 }
 0x224   :  { %v720_v53 = vmax.f32 %v666_v48, 0.0  ;;  %v669_v54 = vadd.f32 %v3159_v20, %v668_v52 }
 0x225   :  { %v723_v55 = vmax.f32 %v677_v51, 0.0 }
 0x226   :  { %v721_v56 = vmax.f32 %v669_v54, 0.0 }
 0x227   :  { %v3321_v58 = vpack.c.bf16 %v723_v55, %v722_v50 }
 0x228   :  { %v3323_v59 = vpack.c.bf16 %v721_v56, %v720_v53  ;;  %v2729_v60 = vpop.f32.mrb[28].mxu1 }
 0x229   :  { %v690_v61 = vadd.f32 %v2729_v60, %v3159_v20  ;;  %v681_v62 = vpop.f32.mrb[29].mxu1 }
 0x22a   :  { %1221 = vmatmul.mubr.bf16.gmra.mrb[56].mxu0 %v3287_v5  ;;  %1414 = vmatmul.mubr.bf16.gmra.mrb[56].mxu1 %v3287_v5  ;;  %v682_v63 = vadd.f32 %v3159_v20, %v681_v62  ;;  %v2730_v0 = vpop.f32.mrb[30].mxu1 }
 0x22b   :  { %1230 = vmatprep.mubr.bf16.mxu0 %v2831_v11  ;;  %1423 = vmatprep.mubr.bf16.mxu1 %v2831_v11  ;;  %v726_v1 = vmax.f32 %v690_v61, 0.0  ;;  %v693_v57 = vadd.f32 %v2730_v0, %v3159_v20  ;;  %v684_v6 = vpop.f32.mrb[31].mxu1 }
 0x22c   :  { %v724_v7 = vmax.f32 %v682_v63, 0.0  ;;  %v685_v8 = vadd.f32 %v3159_v20, %v684_v6 }
 0x22d   :  { %v727_v9 = vmax.f32 %v693_v57, 0.0 }
 0x22e   :  { %v725_v10 = vmax.f32 %v685_v8, 0.0 }
 0x22f   :  { %v3333_v12 = vpack.c.bf16 %v727_v9, %v726_v1 }
 0x230   :  { %v3335_v13 = vpack.c.bf16 %v725_v10, %v724_v7 }
 0x232   :  { %1231 = vmatmul.mubr.bf16.gmra.mrb[60].mxu0 %v3285_v4  ;;  %1424 = vmatmul.mubr.bf16.gmra.mrb[60].mxu1 %v3285_v4 }
 0x233   :  { %1240 = vmatprep.mubr.bf16.mxu0 %v2831_v11  ;;  %1433 = vmatprep.mubr.bf16.mxu1 %v2831_v11 }
 0x23a   :  { %1241 = vmatmul.mubr.bf16.gmra.mrb[64].mxu0 %v3299_v26  ;;  %1434 = vmatmul.mubr.bf16.gmra.mrb[64].mxu1 %v3299_v26 }
 0x23b   :  { %1250 = vmatprep.mubr.bf16.mxu0 %v2831_v11  ;;  %1443 = vmatprep.mubr.bf16.mxu1 %v2831_v11 }
 0x242   :  { %1251 = vmatmul.mubr.bf16.gmra.mrb[68].mxu0 %v3297_v25  ;;  %1444 = vmatmul.mubr.bf16.gmra.mrb[68].mxu1 %v3297_v25 }
 0x243   :  { %1260 = vmatprep.mubr.bf16.mxu0 %v2831_v11  ;;  %1453 = vmatprep.mubr.bf16.mxu1 %v2831_v11 }
 0x24a   :  { %1261 = vmatmul.mubr.bf16.gmra.mrb[72].mxu0 %v3311_v44  ;;  %1454 = vmatmul.mubr.bf16.gmra.mrb[72].mxu1 %v3311_v44 }
 0x24b   :  { %1270 = vmatprep.mubr.bf16.mxu0 %v2831_v11  ;;  %1463 = vmatprep.mubr.bf16.mxu1 %v2831_v11 }
 0x252   :  { %1271 = vmatmul.mubr.bf16.gmra.mrb[76].mxu0 %v3309_v43  ;;  %1464 = vmatmul.mubr.bf16.gmra.mrb[76].mxu1 %v3309_v43 }
 0x253   :  { %1280 = vmatprep.mubr.bf16.mxu0 %v2831_v11  ;;  %1473 = vmatprep.mubr.bf16.mxu1 %v2831_v11 }
 0x25a   :  { %1281 = vmatmul.mubr.bf16.gmra.mrb[80].mxu0 %v3323_v59  ;;  %1474 = vmatmul.mubr.bf16.gmra.mrb[80].mxu1 %v3323_v59 }
 0x25b   :  { %1290 = vmatprep.mubr.bf16.mxu0 %v2831_v11  ;;  %1483 = vmatprep.mubr.bf16.mxu1 %v2831_v11 }
 0x262   :  { %1291 = vmatmul.mubr.bf16.gmra.mrb[84].mxu0 %v3321_v58  ;;  %1484 = vmatmul.mubr.bf16.gmra.mrb[84].mxu1 %v3321_v58 }
 0x263   :  { %1300 = vmatprep.mubr.bf16.mxu0 %v2831_v11  ;;  %1493 = vmatprep.mubr.bf16.mxu1 %v2831_v11 }
 0x26a   :  { %1301 = vmatmul.mubr.bf16.gmra.mrb[88].mxu0 %v3335_v13  ;;  %1494 = vmatmul.mubr.bf16.gmra.mrb[88].mxu1 %v3335_v13 }
 0x26b   :  { %1310 = vmatprep.mubr.bf16.mxu0 %v2831_v11  ;;  %1503 = vmatprep.mubr.bf16.mxu1 %v2831_v11 }
 0x272   :  { %1311 = vmatmul.mubr.bf16.gmra.mrb[92].mxu0 %v3333_v12  ;;  %1504 = vmatmul.mubr.bf16.gmra.mrb[92].mxu1 %v3333_v12 }
 0x273   :  { %1546 = vmatprep.mubr.bf16.mxu0 %v2831_v11  ;;  %1739 = vmatprep.mubr.bf16.mxu1 %v2831_v11 }
 0x27a   :  { %1547 = vmatmul.mubr.bf16.vlgmr.msra.gmra.mrb[96].mxu0 %v3179_v38  ;;  %1740 = vmatmul.mubr.bf16.vlgmr.msra.gmra.mrb[96].mxu1 %v3179_v38 }
 0x27b   :  { %1556 = vmatprep.mubr.bf16.mxu0 %v2831_v11  ;;  %1749 = vmatprep.mubr.bf16.mxu1 %v2831_v11 }
 0x282   :  { %1557 = vmatmul.mubr.bf16.gmra.mrb[100].mxu0 %v3177_v37  ;;  %1750 = vmatmul.mubr.bf16.gmra.mrb[100].mxu1 %v3177_v37 }
 0x283   :  { %1566 = vmatprep.mubr.bf16.mxu0 %v2831_v11  ;;  %1759 = vmatprep.mubr.bf16.mxu1 %v2831_v11 }
 0x28a   :  { %1567 = vmatmul.mubr.bf16.gmra.mrb[104].mxu0 %v3215_v3  ;;  %1760 = vmatmul.mubr.bf16.gmra.mrb[104].mxu1 %v3215_v3 }
 0x28b   :  { %1576 = vmatprep.mubr.bf16.mxu0 %v2831_v11  ;;  %1769 = vmatprep.mubr.bf16.mxu1 %v2831_v11 }
 0x292   :  { %1577 = vmatmul.mubr.bf16.gmra.mrb[108].mxu0 %v3213_v2  ;;  %1770 = vmatmul.mubr.bf16.gmra.mrb[108].mxu1 %v3213_v2 }
 0x293   :  { %1586 = vmatprep.mubr.bf16.mxu0 %v2831_v11  ;;  %1779 = vmatprep.mubr.bf16.mxu1 %v2831_v11 }
 0x29a   :  { %1587 = vmatmul.mubr.bf16.gmra.mrb[112].mxu0 %v3251_v30  ;;  %1780 = vmatmul.mubr.bf16.gmra.mrb[112].mxu1 %v3251_v30 }
 0x29b   :  { %1596 = vmatprep.mubr.bf16.mxu0 %v2831_v11  ;;  %1789 = vmatprep.mubr.bf16.mxu1 %v2831_v11 }
 0x2a2   :  { %1597 = vmatmul.mubr.bf16.gmra.mrb[116].mxu0 %v3249_v27  ;;  %1790 = vmatmul.mubr.bf16.gmra.mrb[116].mxu1 %v3249_v27 }
 0x2a3   :  { %1606 = vmatprep.mubr.bf16.mxu0 %v2831_v11  ;;  %1799 = vmatprep.mubr.bf16.mxu1 %v2831_v11 }
 0x2aa   :  { %1607 = vmatmul.mubr.bf16.gmra.mrb[120].mxu0 %v3287_v5  ;;  %1800 = vmatmul.mubr.bf16.gmra.mrb[120].mxu1 %v3287_v5 }
 0x2ab   :  { %1616 = vmatprep.mubr.bf16.mxu0 %v2831_v11  ;;  %1809 = vmatprep.mubr.bf16.mxu1 %v2831_v11 }
 0x2b2   :  { %1617 = vmatmul.mubr.bf16.gmra.mrb[124].mxu0 %v3285_v4  ;;  %1810 = vmatmul.mubr.bf16.gmra.mrb[124].mxu1 %v3285_v4 }
 0x2b3   :  { %1626 = vmatprep.mubr.bf16.mxu0 %v2831_v11  ;;  %1819 = vmatprep.mubr.bf16.mxu1 %v2831_v11 }
 0x2ba   :  { %1627 = vmatmul.mubr.bf16.gmra.mrb[128].mxu0 %v3299_v26  ;;  %1820 = vmatmul.mubr.bf16.gmra.mrb[128].mxu1 %v3299_v26 }
 0x2bb   :  { %1636 = vmatprep.mubr.bf16.mxu0 %v2831_v11  ;;  %1829 = vmatprep.mubr.bf16.mxu1 %v2831_v11 }
 0x2c2   :  { %1637 = vmatmul.mubr.bf16.gmra.mrb[132].mxu0 %v3297_v25  ;;  %1830 = vmatmul.mubr.bf16.gmra.mrb[132].mxu1 %v3297_v25 }
 0x2c3   :  { %1646 = vmatprep.mubr.bf16.mxu0 %v2831_v11  ;;  %1839 = vmatprep.mubr.bf16.mxu1 %v2831_v11 }
 0x2ca   :  { %1647 = vmatmul.mubr.bf16.gmra.mrb[136].mxu0 %v3311_v44  ;;  %1840 = vmatmul.mubr.bf16.gmra.mrb[136].mxu1 %v3311_v44 }
 0x2cb   :  { %1656 = vmatprep.mubr.bf16.mxu0 %v2831_v11  ;;  %1849 = vmatprep.mubr.bf16.mxu1 %v2831_v11 }
 0x2cd   :  { %v1162_v20 = vpop.f32.mrb[32].mxu0  ;;  %v1355_v37 = vpop.f32.mrb[32].mxu1 }
 0x2ce   :  { %v1164_v38 = vpop.f32.mrb[33].mxu0  ;;  %v1357_v2 = vpop.f32.mrb[33].mxu1 }
 0x2cf   :  { %v1166_v3 = vpop.f32.mrb[34].mxu0  ;;  %v1359_v27 = vpop.f32.mrb[34].mxu1 }
 0x2d0   :  { %v1900_v30 = vmax.f32 %v1162_v20, %v1166_v3  ;;  %v1942_v4 = vmax.f32 %v1355_v37, %v1359_v27  ;;  %v1168_v5 = vpop.f32.mrb[35].mxu0  ;;  %v1361_v14 = vpop.f32.mrb[35].mxu1 }
 0x2d1   :  { %v1921_v15 = vmax.f32 %v1164_v38, %v1168_v5  ;;  %v1963_v16 = vmax.f32 %v1357_v2, %v1361_v14 }
 0x2d2   :  { %1657 = vmatmul.mubr.bf16.gmra.mrb[140].mxu0 %v3309_v43  ;;  %1850 = vmatmul.mubr.bf16.gmra.mrb[140].mxu1 %v3309_v43 }
 0x2d3   :  { %1666 = vmatprep.mubr.bf16.mxu0 %v2831_v11  ;;  %1859 = vmatprep.mubr.bf16.mxu1 %v2831_v11 }
 0x2d5   :  { %v1172_v17 = vpop.f32.mrb[36].mxu0  ;;  %v1365_v18 = vpop.f32.mrb[36].mxu1 }
 0x2d6   :  { %v1901_v19 = vmax.f32 %v1900_v30, %v1172_v17  ;;  %v1943_v21 = vmax.f32 %v1942_v4, %v1365_v18  ;;  %v1174_v22 = vpop.f32.mrb[37].mxu0  ;;  %v1367_v23 = vpop.f32.mrb[37].mxu1 }
 0x2d7   :  { %v1922_v24 = vmax.f32 %v1921_v15, %v1174_v22  ;;  %v1964_v25 = vmax.f32 %v1963_v16, %v1367_v23  ;;  %v1176_v26 = vpop.f32.mrb[38].mxu0  ;;  %v1369_v28 = vpop.f32.mrb[38].mxu1 }
 0x2d8   :  { %v1902_v29 = vmax.f32 %v1901_v19, %v1176_v26  ;;  %v1944_v31 = vmax.f32 %v1943_v21, %v1369_v28  ;;  %v1178_v32 = vpop.f32.mrb[39].mxu0  ;;  %v1371_v34 = vpop.f32.mrb[39].mxu1 }
 0x2d9   :  { %v1923_v35 = vmax.f32 %v1922_v24, %v1178_v32  ;;  %v1965_v33 = vmax.f32 %v1964_v25, %v1371_v34 }
 0x2da   :  { %1667 = vmatmul.mubr.bf16.gmra.mrb[144].mxu0 %v3323_v59  ;;  %1860 = vmatmul.mubr.bf16.gmra.mrb[144].mxu1 %v3323_v59 }
 0x2db   :  { %1676 = vmatprep.mubr.bf16.mxu0 %v2831_v11  ;;  %1869 = vmatprep.mubr.bf16.mxu1 %v2831_v11 }
 0x2dd   :  { %v1182_v36 = vpop.f32.mrb[40].mxu0  ;;  %v1375_v39 = vpop.f32.mrb[40].mxu1 }
 0x2de   :  { %v1903_v40 = vmax.f32 %v1902_v29, %v1182_v36  ;;  %v1945_v41 = vmax.f32 %v1944_v31, %v1375_v39  ;;  %v1184_v42 = vpop.f32.mrb[41].mxu0  ;;  %v1377_v43 = vpop.f32.mrb[41].mxu1 }
 0x2df   :  { %v1924_v44 = vmax.f32 %v1923_v35, %v1184_v42  ;;  %v1966_v45 = vmax.f32 %v1965_v33, %v1377_v43  ;;  %v1186_v46 = vpop.f32.mrb[42].mxu0  ;;  %v1379_v47 = vpop.f32.mrb[42].mxu1 }
 0x2e0   :  { %v1904_v48 = vmax.f32 %v1903_v40, %v1186_v46  ;;  %v1946_v49 = vmax.f32 %v1945_v41, %v1379_v47  ;;  %v1188_v50 = vpop.f32.mrb[43].mxu0  ;;  %v1381_v51 = vpop.f32.mrb[43].mxu1 }
 0x2e1   :  { %v1925_v52 = vmax.f32 %v1924_v44, %v1188_v50  ;;  %v1967_v53 = vmax.f32 %v1966_v45, %v1381_v51 }
 0x2e2   :  { %1677 = vmatmul.mubr.bf16.gmra.mrb[148].mxu0 %v3321_v58  ;;  %1870 = vmatmul.mubr.bf16.gmra.mrb[148].mxu1 %v3321_v58 }
 0x2e3   :  { %1686 = vmatprep.mubr.bf16.mxu0 %v2831_v11  ;;  %1879 = vmatprep.mubr.bf16.mxu1 %v2831_v11 }
 0x2e5   :  { %v1192_v54 = vpop.f32.mrb[44].mxu0  ;;  %v1385_v55 = vpop.f32.mrb[44].mxu1 }
 0x2e6   :  { %v1905_v56 = vmax.f32 %v1904_v48, %v1192_v54  ;;  %v1947_v59 = vmax.f32 %v1946_v49, %v1385_v55  ;;  %v1194_v60 = vpop.f32.mrb[45].mxu0  ;;  %v1387_v61 = vpop.f32.mrb[45].mxu1 }
 0x2e7   :  { %v1926_v62 = vmax.f32 %v1925_v52, %v1194_v60  ;;  %v1968_v63 = vmax.f32 %v1967_v53, %v1387_v61  ;;  %v1196_v0 = vpop.f32.mrb[46].mxu0  ;;  %v1389_v1 = vpop.f32.mrb[46].mxu1 }
 0x2e8   :  { %v1906_v57 = vmax.f32 %v1905_v56, %v1196_v0  ;;  %v1948_v6 = vmax.f32 %v1947_v59, %v1389_v1  ;;  %v1198_v7 = vpop.f32.mrb[47].mxu0  ;;  %v1391_v8 = vpop.f32.mrb[47].mxu1 }
 0x2e9   :  { %v1927_v9 = vmax.f32 %v1926_v62, %v1198_v7  ;;  %v1969_v58 = vmax.f32 %v1968_v63, %v1391_v8 }
 0x2ea   :  { %1687 = vmatmul.mubr.bf16.gmra.mrb[152].mxu0 %v3335_v13  ;;  %1880 = vmatmul.mubr.bf16.gmra.mrb[152].mxu1 %v3335_v13 }
 0x2eb   :  { %1696 = vmatprep.mubr.bf16.mxu0 %v2831_v11  ;;  %1889 = vmatprep.mubr.bf16.mxu1 %v2831_v11 }
 0x2ed   :  { %v1202_v10 = vpop.f32.mrb[48].mxu0  ;;  %v1395_v20 = vpop.f32.mrb[48].mxu1 }
 0x2ee   :  { %v1907_v37 = vmax.f32 %v1906_v57, %v1202_v10  ;;  %v1949_v38 = vmax.f32 %v1948_v6, %v1395_v20  ;;  %v1204_v2 = vpop.f32.mrb[49].mxu0  ;;  %v1397_v3 = vpop.f32.mrb[49].mxu1 }
 0x2ef   :  { %v1928_v27 = vmax.f32 %v1927_v9, %v1204_v2  ;;  %v1970_v30 = vmax.f32 %v1969_v58, %v1397_v3  ;;  %v1206_v4 = vpop.f32.mrb[50].mxu0  ;;  %v1399_v5 = vpop.f32.mrb[50].mxu1  ;;  %v2263_v3 = vlaneseq }
 0x2f0   :  { %v1908_v14 = vmax.f32 %v1907_v37, %v1206_v4  ;;  %v1950_v15 = vmax.f32 %v1949_v38, %v1399_v5  ;;  %v1208_v16 = vpop.f32.mrb[51].mxu0  ;;  %v1401_v17 = vpop.f32.mrb[51].mxu1  ;;  %v2832_v38 = vmov 1966171168  }
 0x2f1   :  { %v1929_v18 = vmax.f32 %v1928_v27, %v1208_v16  ;;  %v1971_v13 = vmax.f32 %v1970_v30, %v1401_v17  ;;  %v2261_v2 = vunpack.c.l.s4 %v2832_v38 }
 0x2f2   :  { %1697 = vmatmul.mubr.bf16.gmra.mrb[156].mxu0 %v3333_v12  ;;  %1890 = vmatmul.mubr.bf16.gmra.mrb[156].mxu1 %v3333_v12 }
 0x2f5   :  { %v1212_v11 = vpop.f32.mrb[52].mxu0  ;;  %v1405_v19 = vpop.f32.mrb[52].mxu1 }
 0x2f6   :  { %v1909_v21 = vmax.f32 %v1908_v14, %v1212_v11  ;;  %v1951_v22 = vmax.f32 %v1950_v15, %v1405_v19  ;;  %v1214_v23 = vpop.f32.mrb[53].mxu0  ;;  %v1407_v24 = vpop.f32.mrb[53].mxu1 }
 0x2f7   :  { %v1930_v25 = vmax.f32 %v1929_v18, %v1214_v23  ;;  %v1972_v26 = vmax.f32 %v1971_v13, %v1407_v24  ;;  %v1216_v28 = vpop.f32.mrb[54].mxu0  ;;  %v1409_v29 = vpop.f32.mrb[54].mxu1 }
 0x2f8   :  { %v1910_v31 = vmax.f32 %v1909_v21, %v1216_v28  ;;  %v1952_v32 = vmax.f32 %v1951_v22, %v1409_v29  ;;  %v1218_v34 = vpop.f32.mrb[55].mxu0  ;;  %v1411_v35 = vpop.f32.mrb[55].mxu1  ;;  %v2262_v21 = vunpack.c.0.s8 %v2261_v2  ;;  %v2264_v22 = vshrl.u32 %v2263_v3, 7 }
 0x2f9   :  { %v1931_v33 = vmax.f32 %v1930_v25, %v1218_v34  ;;  %v1973_v36 = vmax.f32 %v1972_v26, %v1411_v35 }
 0x2fd   :  { %v1222_v39 = vpop.f32.mrb[56].mxu0  ;;  %v1415_v40 = vpop.f32.mrb[56].mxu1 }
 0x2fe   :  { %v1911_v41 = vmax.f32 %v1910_v31, %v1222_v39  ;;  %v1953_v12 = vmax.f32 %v1952_v32, %v1415_v40  ;;  %v1224_v42 = vpop.f32.mrb[57].mxu0  ;;  %v1417_v43 = vpop.f32.mrb[57].mxu1 }
 0x2ff   :  { %v1932_v44 = vmax.f32 %v1931_v33, %v1224_v42  ;;  %v1974_v45 = vmax.f32 %v1973_v36, %v1417_v43  ;;  %v1226_v46 = vpop.f32.mrb[58].mxu0  ;;  %v1419_v47 = vpop.f32.mrb[58].mxu1 }
 0x300   :  { %v1912_v48 = vmax.f32 %v1911_v41, %v1226_v46  ;;  %v1954_v49 = vmax.f32 %v1953_v12, %v1419_v47  ;;  %v1228_v50 = vpop.f32.mrb[59].mxu0  ;;  %v1421_v51 = vpop.f32.mrb[59].mxu1  ;;  %v3435_v46 = vsub.s32 %v2262_v21, %v2264_v22 }
 0x301   :  { %v1933_v52 = vmax.f32 %v1932_v44, %v1228_v50  ;;  %v1975_v53 = vmax.f32 %v1974_v45, %v1421_v51 }
 0x305   :  { %v1232_v54 = vpop.f32.mrb[60].mxu0  ;;  %v1425_v55 = vpop.f32.mrb[60].mxu1 }
 0x306   :  { %v1913_v56 = vmax.f32 %v1912_v48, %v1232_v54  ;;  %v1955_v59 = vmax.f32 %v1954_v49, %v1425_v55  ;;  %v1234_v60 = vpop.f32.mrb[61].mxu0  ;;  %v1427_v61 = vpop.f32.mrb[61].mxu1 }
 0x307   :  { %v1934_v62 = vmax.f32 %v1933_v52, %v1234_v60  ;;  %v1976_v63 = vmax.f32 %v1975_v53, %v1427_v61  ;;  %v1236_v0 = vpop.f32.mrb[62].mxu0  ;;  %v1429_v1 = vpop.f32.mrb[62].mxu1 }
 0x308   :  { %v1914_v57 = vmax.f32 %v1913_v56, %v1236_v0  ;;  %v1956_v6 = vmax.f32 %v1955_v59, %v1429_v1  ;;  %v1238_v7 = vpop.f32.mrb[63].mxu0  ;;  %v1431_v8 = vpop.f32.mrb[63].mxu1 }
 0x309   :  { %v1935_v9 = vmax.f32 %v1934_v62, %v1238_v7  ;;  %v1977_v58 = vmax.f32 %v1976_v63, %v1431_v8 }
 0x30a   :  { %v1915_v10 = vrot.slane %v1914_v57, 4  ;;  %v1957_v20 = vrot.slane %v1956_v6, 4 }
 0x30b   :  { %v1936_v37 = vrot.slane %v1935_v9, 4  ;;  %v1978_v27 = vrot.slane %v1977_v58, 4 }
 0x30c   :  { %v1916_v30 = vmax.f32 %v1914_v57, %v1915_v10  ;;  %v1958_v4 = vmax.f32 %v1956_v6, %v1957_v20 }
 0x30d   :  { %v1937_v5 = vmax.f32 %v1935_v9, %v1936_v37  ;;  %v1979_v14 = vmax.f32 %v1977_v58, %v1978_v27  ;;  %v1242_v15 = vpop.f32.mrb[64].mxu0  ;;  %v1435_v16 = vpop.f32.mrb[64].mxu1 }
 0x30e   :  { %v1917_v17 = vrot.slane %v1916_v30, 2  ;;  %v1959_v18 = vrot.slane %v1958_v4, 2  ;;  %v1244_v13 = vpop.f32.mrb[65].mxu0  ;;  %v1437_v11 = vpop.f32.mrb[65].mxu1 }
 0x30f   :  { %v1938_v19 = vrot.slane %v1937_v5, 2  ;;  %v1980_v23 = vrot.slane %v1979_v14, 2  ;;  %v1246_v24 = vpop.f32.mrb[66].mxu0  ;;  %v1439_v25 = vpop.f32.mrb[66].mxu1 }
 0x310   :  { %v1918_v26 = vmax.f32 %v1916_v30, %v1917_v17  ;;  %v1960_v28 = vmax.f32 %v1958_v4, %v1959_v18  ;;  %v2068_v29 = vmax.f32 %v1242_v15, %v1246_v24  ;;  %v2110_v31 = vmax.f32 %v1435_v16, %v1439_v25  ;;  %v1248_v32 = vpop.f32.mrb[67].mxu0  ;;  %v1441_v34 = vpop.f32.mrb[67].mxu1 }
 0x311   :  { %v1939_v35 = vmax.f32 %v1937_v5, %v1938_v19  ;;  %v1981_v33 = vmax.f32 %v1979_v14, %v1980_v23  ;;  %v2089_v36 = vmax.f32 %v1244_v13, %v1248_v32  ;;  %v2131_v39 = vmax.f32 %v1437_v11, %v1441_v34 }
 0x312   :  { %v1919_v40 = vrot.slane %v1918_v26, 1  ;;  %v1961_v41 = vrot.slane %v1960_v28, 1 }
 0x313   :  { %v1940_v12 = vrot.slane %v1939_v35, 1  ;;  %v1982_v42 = vrot.slane %v1981_v33, 1 }
 0x314   :  { %v1920_v43 = vmax.f32 %v1918_v26, %v1919_v40  ;;  %v1962_v44 = vmax.f32 %v1960_v28, %v1961_v41 }
 0x315   :  { %v1941_v45 = vmax.f32 %v1939_v35, %v1940_v12  ;;  %v1983_v47 = vmax.f32 %v1981_v33, %v1982_v42  ;;  %v1252_v48 = vpop.f32.mrb[68].mxu0  ;;  %v1445_v49 = vpop.f32.mrb[68].mxu1 }
 0x316   :  { %v2069_v50 = vmax.f32 %v2068_v29, %v1252_v48  ;;  %v2111_v51 = vmax.f32 %v2110_v31, %v1445_v49  ;;  %v1254_v52 = vpop.f32.mrb[69].mxu0  ;;  %v1447_v53 = vpop.f32.mrb[69].mxu1 }
 0x317   :  { %v2256_v54 = vcombine.low %v1920_v43, %v1941_v45  ;;  %v2257_v55 = vcombine.low %v1962_v44, %v1983_v47  ;;  %v2090_v56 = vmax.f32 %v2089_v36, %v1254_v52  ;;  %v2132_v59 = vmax.f32 %v2131_v39, %v1447_v53  ;;  %v1256_v60 = vpop.f32.mrb[70].mxu0  ;;  %v1449_v61 = vpop.f32.mrb[70].mxu1 }
 0x318   :  { %v2070_v62 = vmax.f32 %v2069_v50, %v1256_v60  ;;  %v2112_v63 = vmax.f32 %v2111_v51, %v1449_v61  ;;  %v1258_v0 = vpop.f32.mrb[71].mxu0  ;;  %v1451_v1 = vpop.f32.mrb[71].mxu1 }
 0x319   :  { %v3438_v57 = vrot.slane %v2256_v54, %v3435_v46  ;;  %v3441_v6 = vrot.slane %v2257_v55, %v3435_v46  ;;  %v2091_v7 = vmax.f32 %v2090_v56, %v1258_v0  ;;  %v2133_v8 = vmax.f32 %v2132_v59, %v1451_v1 }
 0x31b   :  { %v2288_v9 = vcombine.low %v3438_v57, %v3441_v6 }
 0x31d   :  { %v1262_v58 = vpop.f32.mrb[72].mxu0  ;;  %v1455_v10 = vpop.f32.mrb[72].mxu1 }
 0x31e   :  { %v2071_v20 = vmax.f32 %v2070_v62, %v1262_v58  ;;  %v2113_v37 = vmax.f32 %v2112_v63, %v1455_v10  ;;  %v1264_v38 = vpop.f32.mrb[73].mxu0  ;;  %v1457_v2 = vpop.f32.mrb[73].mxu1 }
 0x31f   :  { %v2092_v3 = vmax.f32 %v2091_v7, %v1264_v38  ;;  %v2134_v27 = vmax.f32 %v2133_v8, %v1457_v2  ;;  %v1266_v30 = vpop.f32.mrb[74].mxu0  ;;  %v1459_v4 = vpop.f32.mrb[74].mxu1 }
 0x320   :  { %v2072_v5 = vmax.f32 %v2071_v20, %v1266_v30  ;;  %v2114_v14 = vmax.f32 %v2113_v37, %v1459_v4  ;;  %v1268_v15 = vpop.f32.mrb[75].mxu0  ;;  %v1461_v16 = vpop.f32.mrb[75].mxu1 }
 0x321   :  { %v2093_v17 = vmax.f32 %v2092_v3, %v1268_v15  ;;  %v2135_v18 = vmax.f32 %v2134_v27, %v1461_v16 }
 0x325   :  { %v1272_v13 = vpop.f32.mrb[76].mxu0  ;;  %v1465_v11 = vpop.f32.mrb[76].mxu1 }
 0x326   :  { %v2073_v19 = vmax.f32 %v2072_v5, %v1272_v13  ;;  %v2115_v21 = vmax.f32 %v2114_v14, %v1465_v11  ;;  %v1274_v22 = vpop.f32.mrb[77].mxu0  ;;  %v1467_v23 = vpop.f32.mrb[77].mxu1 }
 0x327   :  { %v2094_v24 = vmax.f32 %v2093_v17, %v1274_v22  ;;  %v2136_v25 = vmax.f32 %v2135_v18, %v1467_v23  ;;  %v1276_v26 = vpop.f32.mrb[78].mxu0  ;;  %v1469_v28 = vpop.f32.mrb[78].mxu1 }
 0x328   :  { %v2074_v29 = vmax.f32 %v2073_v19, %v1276_v26  ;;  %v2116_v31 = vmax.f32 %v2115_v21, %v1469_v28  ;;  %v1278_v32 = vpop.f32.mrb[79].mxu0  ;;  %v1471_v34 = vpop.f32.mrb[79].mxu1 }
 0x329   :  { %v2095_v35 = vmax.f32 %v2094_v24, %v1278_v32  ;;  %v2137_v33 = vmax.f32 %v2136_v25, %v1471_v34 }
 0x32d   :  { %v1282_v36 = vpop.f32.mrb[80].mxu0  ;;  %v1475_v39 = vpop.f32.mrb[80].mxu1 }
 0x32e   :  { %v2075_v40 = vmax.f32 %v2074_v29, %v1282_v36  ;;  %v2117_v41 = vmax.f32 %v2116_v31, %v1475_v39  ;;  %v1284_v12 = vpop.f32.mrb[81].mxu0  ;;  %v1477_v42 = vpop.f32.mrb[81].mxu1 }
 0x32f   :  { %v2096_v43 = vmax.f32 %v2095_v35, %v1284_v12  ;;  %v2138_v44 = vmax.f32 %v2137_v33, %v1477_v42  ;;  %v1286_v45 = vpop.f32.mrb[82].mxu0  ;;  %v1479_v47 = vpop.f32.mrb[82].mxu1 }
 0x330   :  { %v2076_v48 = vmax.f32 %v2075_v40, %v1286_v45  ;;  %v2118_v49 = vmax.f32 %v2117_v41, %v1479_v47  ;;  %v1288_v50 = vpop.f32.mrb[83].mxu0  ;;  %v1481_v51 = vpop.f32.mrb[83].mxu1 }
 0x331   :  { %v2097_v52 = vmax.f32 %v2096_v43, %v1288_v50  ;;  %v2139_v53 = vmax.f32 %v2138_v44, %v1481_v51 }
 0x335   :  { %v1292_v54 = vpop.f32.mrb[84].mxu0  ;;  %v1485_v55 = vpop.f32.mrb[84].mxu1 }
 0x336   :  { %v2077_v56 = vmax.f32 %v2076_v48, %v1292_v54  ;;  %v2119_v59 = vmax.f32 %v2118_v49, %v1485_v55  ;;  %v1294_v60 = vpop.f32.mrb[85].mxu0  ;;  %v1487_v61 = vpop.f32.mrb[85].mxu1 }
 0x337   :  { %v2098_v62 = vmax.f32 %v2097_v52, %v1294_v60  ;;  %v2140_v63 = vmax.f32 %v2139_v53, %v1487_v61  ;;  %v1296_v0 = vpop.f32.mrb[86].mxu0  ;;  %v1489_v1 = vpop.f32.mrb[86].mxu1 }
 0x338   :  { %v2078_v7 = vmax.f32 %v2077_v56, %v1296_v0  ;;  %v2120_v8 = vmax.f32 %v2119_v59, %v1489_v1  ;;  %v1298_v58 = vpop.f32.mrb[87].mxu0  ;;  %v1491_v10 = vpop.f32.mrb[87].mxu1 }
 0x339   :  { %v2099_v20 = vmax.f32 %v2098_v62, %v1298_v58  ;;  %v2141_v37 = vmax.f32 %v2140_v63, %v1491_v10 }
 0x33d   :  { %v1302_v38 = vpop.f32.mrb[88].mxu0  ;;  %v1495_v2 = vpop.f32.mrb[88].mxu1 }
 0x33e   :  { %v2079_v3 = vmax.f32 %v2078_v7, %v1302_v38  ;;  %v2121_v27 = vmax.f32 %v2120_v8, %v1495_v2  ;;  %v1304_v30 = vpop.f32.mrb[89].mxu0  ;;  %v1497_v4 = vpop.f32.mrb[89].mxu1 }
 0x33f   :  { %v2100_v5 = vmax.f32 %v2099_v20, %v1304_v30  ;;  %v2142_v14 = vmax.f32 %v2141_v37, %v1497_v4  ;;  %v1306_v15 = vpop.f32.mrb[90].mxu0  ;;  %v1499_v16 = vpop.f32.mrb[90].mxu1 }
 0x340   :  { %v2080_v17 = vmax.f32 %v2079_v3, %v1306_v15  ;;  %v2122_v18 = vmax.f32 %v2121_v27, %v1499_v16  ;;  %v1308_v13 = vpop.f32.mrb[91].mxu0  ;;  %v1501_v11 = vpop.f32.mrb[91].mxu1 }
 0x341   :  { %v2101_v19 = vmax.f32 %v2100_v5, %v1308_v13  ;;  %v2143_v21 = vmax.f32 %v2142_v14, %v1501_v11 }
 0x345   :  { %v1312_v22 = vpop.f32.mrb[92].mxu0  ;;  %v1505_v23 = vpop.f32.mrb[92].mxu1 }
 0x346   :  { %v2081_v24 = vmax.f32 %v2080_v17, %v1312_v22  ;;  %v2123_v25 = vmax.f32 %v2122_v18, %v1505_v23  ;;  %v1314_v26 = vpop.f32.mrb[93].mxu0  ;;  %v1507_v28 = vpop.f32.mrb[93].mxu1 }
 0x347   :  { %v2102_v29 = vmax.f32 %v2101_v19, %v1314_v26  ;;  %v2144_v31 = vmax.f32 %v2143_v21, %v1507_v28  ;;  %v1316_v32 = vpop.f32.mrb[94].mxu0  ;;  %v1509_v34 = vpop.f32.mrb[94].mxu1 }
 0x348   :  { %v2082_v35 = vmax.f32 %v2081_v24, %v1316_v32  ;;  %v2124_v33 = vmax.f32 %v2123_v25, %v1509_v34  ;;  %v1318_v36 = vpop.f32.mrb[95].mxu0  ;;  %v1511_v39 = vpop.f32.mrb[95].mxu1 }
 0x349   :  { %v2103_v40 = vmax.f32 %v2102_v29, %v1318_v36  ;;  %v2145_v41 = vmax.f32 %v2144_v31, %v1511_v39 }
 0x34a   :  { %v2083_v12 = vrot.slane %v2082_v35, 4  ;;  %v2125_v42 = vrot.slane %v2124_v33, 4 }
 0x34b   :  { %v2104_v43 = vrot.slane %v2103_v40, 4  ;;  %v2146_v44 = vrot.slane %v2145_v41, 4 }
 0x34c   :  { %v2084_v45 = vmax.f32 %v2082_v35, %v2083_v12  ;;  %v2126_v47 = vmax.f32 %v2124_v33, %v2125_v42 }
 0x34d   :  { %v2105_v48 = vmax.f32 %v2103_v40, %v2104_v43  ;;  %v2147_v49 = vmax.f32 %v2145_v41, %v2146_v44  ;;  %v1548_v50 = vpop.f32.mrb[96].mxu0  ;;  %v1741_v51 = vpop.f32.mrb[96].mxu1 }
 0x34e   :  { %v2085_v52 = vrot.slane %v2084_v45, 2  ;;  %v2127_v53 = vrot.slane %v2126_v47, 2  ;;  %v1550_v54 = vpop.f32.mrb[97].mxu0  ;;  %v1743_v55 = vpop.f32.mrb[97].mxu1 }
 0x34f   :  { %v2106_v56 = vrot.slane %v2105_v48, 2  ;;  %v2148_v59 = vrot.slane %v2147_v49, 2  ;;  %v1552_v60 = vpop.f32.mrb[98].mxu0  ;;  %v1745_v61 = vpop.f32.mrb[98].mxu1 }
 0x350   :  { %v2086_v62 = vmax.f32 %v2084_v45, %v2085_v52  ;;  %v2128_v63 = vmax.f32 %v2126_v47, %v2127_v53  ;;  %v1984_v0 = vmax.f32 %v1548_v50, %v1552_v60  ;;  %v2026_v1 = vmax.f32 %v1741_v51, %v1745_v61  ;;  %v1554_v7 = vpop.f32.mrb[99].mxu0  ;;  %v1747_v8 = vpop.f32.mrb[99].mxu1 }
 0x351   :  { %v2107_v58 = vmax.f32 %v2105_v48, %v2106_v56  ;;  %v2149_v10 = vmax.f32 %v2147_v49, %v2148_v59  ;;  %v2005_v20 = vmax.f32 %v1550_v54, %v1554_v7  ;;  %v2047_v37 = vmax.f32 %v1743_v55, %v1747_v8 }
 0x352   :  { %v2087_v38 = vrot.slane %v2086_v62, 1  ;;  %v2129_v2 = vrot.slane %v2128_v63, 1 }
 0x353   :  { %v2108_v3 = vrot.slane %v2107_v58, 1  ;;  %v2150_v27 = vrot.slane %v2149_v10, 1 }
 0x354   :  { %v2088_v30 = vmax.f32 %v2086_v62, %v2087_v38  ;;  %v2130_v4 = vmax.f32 %v2128_v63, %v2129_v2 }
 0x355   :  { %v2109_v5 = vmax.f32 %v2107_v58, %v2108_v3  ;;  %v2151_v14 = vmax.f32 %v2149_v10, %v2150_v27  ;;  %v1558_v15 = vpop.f32.mrb[100].mxu0  ;;  %v1751_v16 = vpop.f32.mrb[100].mxu1 }
 0x356   :  { %v1985_v17 = vmax.f32 %v1984_v0, %v1558_v15  ;;  %v2027_v18 = vmax.f32 %v2026_v1, %v1751_v16  ;;  %v1560_v13 = vpop.f32.mrb[101].mxu0  ;;  %v1753_v11 = vpop.f32.mrb[101].mxu1 }
 0x357   :  { %v2305_v19 = vcombine.low %v2088_v30, %v2109_v5  ;;  %v2306_v21 = vcombine.low %v2130_v4, %v2151_v14  ;;  %v2006_v22 = vmax.f32 %v2005_v20, %v1560_v13  ;;  %v2048_v23 = vmax.f32 %v2047_v37, %v1753_v11  ;;  %v1562_v24 = vpop.f32.mrb[102].mxu0  ;;  %v1755_v25 = vpop.f32.mrb[102].mxu1 }
 0x358   :  { %v1986_v26 = vmax.f32 %v1985_v17, %v1562_v24  ;;  %v2028_v28 = vmax.f32 %v2027_v18, %v1755_v25  ;;  %v1564_v29 = vpop.f32.mrb[103].mxu0  ;;  %v1757_v31 = vpop.f32.mrb[103].mxu1 }
 0x359   :  { %v3446_v32 = vrot.slane %v2305_v19, %v3435_v46  ;;  %v3449_v34 = vrot.slane %v2306_v21, %v3435_v46  ;;  %v2007_v35 = vmax.f32 %v2006_v22, %v1564_v29  ;;  %v2049_v33 = vmax.f32 %v2048_v23, %v1757_v31 }
 0x35b   :  { %v2337_v36 = vcombine.low %v3446_v32, %v3449_v34 }
 0x35d   :  { %v1568_v39 = vpop.f32.mrb[104].mxu0  ;;  %v1761_v40 = vpop.f32.mrb[104].mxu1 }
 0x35e   :  { %v1987_v41 = vmax.f32 %v1986_v26, %v1568_v39  ;;  %v2029_v12 = vmax.f32 %v2028_v28, %v1761_v40  ;;  %v1570_v42 = vpop.f32.mrb[105].mxu0  ;;  %v1763_v43 = vpop.f32.mrb[105].mxu1 }
 0x35f   :  { %v2008_v44 = vmax.f32 %v2007_v35, %v1570_v42  ;;  %v2050_v45 = vmax.f32 %v2049_v33, %v1763_v43  ;;  %v1572_v47 = vpop.f32.mrb[106].mxu0  ;;  %v1765_v48 = vpop.f32.mrb[106].mxu1 }
 0x360   :  { %v1988_v49 = vmax.f32 %v1987_v41, %v1572_v47  ;;  %v2030_v50 = vmax.f32 %v2029_v12, %v1765_v48  ;;  %v1574_v51 = vpop.f32.mrb[107].mxu0  ;;  %v1767_v52 = vpop.f32.mrb[107].mxu1 }
 0x361   :  { %v2009_v53 = vmax.f32 %v2008_v44, %v1574_v51  ;;  %v2051_v54 = vmax.f32 %v2050_v45, %v1767_v52 }
 0x365   :  { %v1578_v55 = vpop.f32.mrb[108].mxu0  ;;  %v1771_v56 = vpop.f32.mrb[108].mxu1 }
 0x366   :  { %v1989_v59 = vmax.f32 %v1988_v49, %v1578_v55  ;;  %v2031_v60 = vmax.f32 %v2030_v50, %v1771_v56  ;;  %v1580_v61 = vpop.f32.mrb[109].mxu0  ;;  %v1773_v62 = vpop.f32.mrb[109].mxu1 }
 0x367   :  { %v2010_v63 = vmax.f32 %v2009_v53, %v1580_v61  ;;  %v2052_v0 = vmax.f32 %v2051_v54, %v1773_v62  ;;  %v1582_v1 = vpop.f32.mrb[110].mxu0  ;;  %v1775_v7 = vpop.f32.mrb[110].mxu1 }
 0x368   :  { %v1990_v8 = vmax.f32 %v1989_v59, %v1582_v1  ;;  %v2032_v58 = vmax.f32 %v2031_v60, %v1775_v7  ;;  %v1584_v10 = vpop.f32.mrb[111].mxu0  ;;  %v1777_v20 = vpop.f32.mrb[111].mxu1 }
 0x369   :  { %v2011_v37 = vmax.f32 %v2010_v63, %v1584_v10  ;;  %v2053_v38 = vmax.f32 %v2052_v0, %v1777_v20 }
 0x36d   :  { %v1588_v2 = vpop.f32.mrb[112].mxu0  ;;  %v1781_v3 = vpop.f32.mrb[112].mxu1 }
 0x36e   :  { %v1991_v27 = vmax.f32 %v1990_v8, %v1588_v2  ;;  %v2033_v30 = vmax.f32 %v2032_v58, %v1781_v3  ;;  %v1590_v4 = vpop.f32.mrb[113].mxu0  ;;  %v1783_v5 = vpop.f32.mrb[113].mxu1 }
 0x36f   :  { %v2012_v14 = vmax.f32 %v2011_v37, %v1590_v4  ;;  %v2054_v15 = vmax.f32 %v2053_v38, %v1783_v5  ;;  %v1592_v16 = vpop.f32.mrb[114].mxu0  ;;  %v1785_v17 = vpop.f32.mrb[114].mxu1 }
 0x370   :  { %v1992_v18 = vmax.f32 %v1991_v27, %v1592_v16  ;;  %v2034_v13 = vmax.f32 %v2033_v30, %v1785_v17  ;;  %v1594_v11 = vpop.f32.mrb[115].mxu0  ;;  %v1787_v19 = vpop.f32.mrb[115].mxu1 }
 0x371   :  { %v2013_v21 = vmax.f32 %v2012_v14, %v1594_v11  ;;  %v2055_v22 = vmax.f32 %v2054_v15, %v1787_v19 }
 0x375   :  { %v1598_v23 = vpop.f32.mrb[116].mxu0  ;;  %v1791_v24 = vpop.f32.mrb[116].mxu1 }
 0x376   :  { %v1993_v25 = vmax.f32 %v1992_v18, %v1598_v23  ;;  %v2035_v26 = vmax.f32 %v2034_v13, %v1791_v24  ;;  %v1600_v28 = vpop.f32.mrb[117].mxu0  ;;  %v1793_v29 = vpop.f32.mrb[117].mxu1 }
 0x377   :  { %v2014_v31 = vmax.f32 %v2013_v21, %v1600_v28  ;;  %v2056_v35 = vmax.f32 %v2055_v22, %v1793_v29  ;;  %v1602_v33 = vpop.f32.mrb[118].mxu0  ;;  %v1795_v39 = vpop.f32.mrb[118].mxu1 }
 0x378   :  { %v1994_v40 = vmax.f32 %v1993_v25, %v1602_v33  ;;  %v2036_v41 = vmax.f32 %v2035_v26, %v1795_v39  ;;  %v1604_v12 = vpop.f32.mrb[119].mxu0  ;;  %v1797_v42 = vpop.f32.mrb[119].mxu1 }
 0x379   :  { %v2015_v43 = vmax.f32 %v2014_v31, %v1604_v12  ;;  %v2057_v44 = vmax.f32 %v2056_v35, %v1797_v42 }
 0x37d   :  { %v1608_v45 = vpop.f32.mrb[120].mxu0  ;;  %v1801_v47 = vpop.f32.mrb[120].mxu1 }
 0x37e   :  { %v1995_v48 = vmax.f32 %v1994_v40, %v1608_v45  ;;  %v2037_v49 = vmax.f32 %v2036_v41, %v1801_v47  ;;  %v1610_v50 = vpop.f32.mrb[121].mxu0  ;;  %v1803_v51 = vpop.f32.mrb[121].mxu1 }
 0x37f   :  { %v2016_v52 = vmax.f32 %v2015_v43, %v1610_v50  ;;  %v2058_v53 = vmax.f32 %v2057_v44, %v1803_v51  ;;  %v1612_v54 = vpop.f32.mrb[122].mxu0  ;;  %v1805_v55 = vpop.f32.mrb[122].mxu1 }
 0x380   :  { %v1996_v56 = vmax.f32 %v1995_v48, %v1612_v54  ;;  %v2038_v59 = vmax.f32 %v2037_v49, %v1805_v55  ;;  %v1614_v60 = vpop.f32.mrb[123].mxu0  ;;  %v1807_v61 = vpop.f32.mrb[123].mxu1 }
 0x381   :  { %v2017_v62 = vmax.f32 %v2016_v52, %v1614_v60  ;;  %v2059_v63 = vmax.f32 %v2058_v53, %v1807_v61 }
 0x385   :  { %v1618_v0 = vpop.f32.mrb[124].mxu0  ;;  %v1811_v1 = vpop.f32.mrb[124].mxu1 }
 0x386   :  { %v1997_v7 = vmax.f32 %v1996_v56, %v1618_v0  ;;  %v2039_v8 = vmax.f32 %v2038_v59, %v1811_v1  ;;  %v1620_v58 = vpop.f32.mrb[125].mxu0  ;;  %v1813_v10 = vpop.f32.mrb[125].mxu1 }
 0x387   :  { %v2018_v20 = vmax.f32 %v2017_v62, %v1620_v58  ;;  %v2060_v37 = vmax.f32 %v2059_v63, %v1813_v10  ;;  %v1622_v38 = vpop.f32.mrb[126].mxu0  ;;  %v1815_v2 = vpop.f32.mrb[126].mxu1 }
 0x388   :  { %v1998_v3 = vmax.f32 %v1997_v7, %v1622_v38  ;;  %v2040_v27 = vmax.f32 %v2039_v8, %v1815_v2  ;;  %v1624_v30 = vpop.f32.mrb[127].mxu0  ;;  %v1817_v4 = vpop.f32.mrb[127].mxu1 }
 0x389   :  { %v2019_v5 = vmax.f32 %v2018_v20, %v1624_v30  ;;  %v2061_v14 = vmax.f32 %v2060_v37, %v1817_v4 }
 0x38a   :  { %v1999_v15 = vrot.slane %v1998_v3, 4  ;;  %v2041_v16 = vrot.slane %v2040_v27, 4 }
 0x38b   :  { %v2020_v17 = vrot.slane %v2019_v5, 4  ;;  %v2062_v18 = vrot.slane %v2061_v14, 4 }
 0x38c   :  { %v2000_v13 = vmax.f32 %v1998_v3, %v1999_v15  ;;  %v2042_v11 = vmax.f32 %v2040_v27, %v2041_v16  ;;  %v2296_v15 = vrot.slane %v2288_v9, %v3435_v46 }
 0x38d   :  { %v2021_v19 = vmax.f32 %v2019_v5, %v2020_v17  ;;  %v2063_v21 = vmax.f32 %v2061_v14, %v2062_v18  ;;  %v1628_v22 = vpop.f32.mrb[128].mxu0  ;;  %v1821_v23 = vpop.f32.mrb[128].mxu1 }
 0x38e   :  { %v2001_v24 = vrot.slane %v2000_v13, 2  ;;  %v2043_v25 = vrot.slane %v2042_v11, 2  ;;  %v1630_v26 = vpop.f32.mrb[129].mxu0  ;;  %v1823_v28 = vpop.f32.mrb[129].mxu1 }
 0x38f   :  { %v2022_v29 = vrot.slane %v2021_v19, 2  ;;  %v2064_v31 = vrot.slane %v2063_v21, 2  ;;  %v1632_v35 = vpop.f32.mrb[130].mxu0  ;;  %v1825_v33 = vpop.f32.mrb[130].mxu1 }
 0x390   :  { %v2002_v39 = vmax.f32 %v2000_v13, %v2001_v24  ;;  %v2044_v40 = vmax.f32 %v2042_v11, %v2043_v25  ;;  %v2152_v41 = vmax.f32 %v1628_v22, %v1632_v35  ;;  %v2194_v12 = vmax.f32 %v1821_v23, %v1825_v33  ;;  %v1634_v42 = vpop.f32.mrb[131].mxu0  ;;  %v1827_v43 = vpop.f32.mrb[131].mxu1  ;;  %v3460_v13 = vld [vmem:[#allocation6] sm:$0xff] }
 0x391   :  { %v2023_v44 = vmax.f32 %v2021_v19, %v2022_v29  ;;  %v2065_v45 = vmax.f32 %v2063_v21, %v2064_v31  ;;  %v2173_v47 = vmax.f32 %v1630_v26, %v1634_v42  ;;  %v2215_v48 = vmax.f32 %v1823_v28, %v1827_v43 }
 0x392   :  { %v2003_v49 = vrot.slane %v2002_v39, 1  ;;  %v2045_v50 = vrot.slane %v2044_v40, 1 }
 0x393   :  { %v2024_v51 = vrot.slane %v2023_v44, 1  ;;  %v2066_v52 = vrot.slane %v2065_v45, 1 }
 0x394   :  { %v2004_v53 = vmax.f32 %v2002_v39, %v2003_v49  ;;  %v2046_v54 = vmax.f32 %v2044_v40, %v2045_v50 }
 0x395   :  { %v2025_v55 = vmax.f32 %v2023_v44, %v2024_v51  ;;  %v2067_v56 = vmax.f32 %v2065_v45, %v2066_v52  ;;  %v1638_v59 = vpop.f32.mrb[132].mxu0  ;;  %v1831_v60 = vpop.f32.mrb[132].mxu1 }
 0x396   :  { %v2153_v61 = vmax.f32 %v2152_v41, %v1638_v59  ;;  %v2195_v62 = vmax.f32 %v2194_v12, %v1831_v60  ;;  %v1640_v63 = vpop.f32.mrb[133].mxu0  ;;  %v1833_v0 = vpop.f32.mrb[133].mxu1 }
 0x397   :  { %v2258_v1 = vcombine.low %v2004_v53, %v2025_v55  ;;  %v2259_v7 = vcombine.low %v2046_v54, %v2067_v56  ;;  %v2174_v8 = vmax.f32 %v2173_v47, %v1640_v63  ;;  %v2216_v58 = vmax.f32 %v2215_v48, %v1833_v0  ;;  %v1642_v10 = vpop.f32.mrb[134].mxu0  ;;  %v1835_v20 = vpop.f32.mrb[134].mxu1 }
 0x398   :  { %v2154_v37 = vmax.f32 %v2153_v61, %v1642_v10  ;;  %v2196_v38 = vmax.f32 %v2195_v62, %v1835_v20  ;;  %v1644_v2 = vpop.f32.mrb[135].mxu0  ;;  %v1837_v3 = vpop.f32.mrb[135].mxu1 }
 0x399   :  { %v2280_v27 = vrot.slane %v2258_v1, %v3435_v46  ;;  %v2287_v30 = vrot.slane %v2259_v7, %v3435_v46  ;;  %v2175_v4 = vmax.f32 %v2174_v8, %v1644_v2  ;;  %v2217_v5 = vmax.f32 %v2216_v58, %v1837_v3 }
 0x39b   :  { %v2289_v14 = vcombine.low %v2280_v27, %v2287_v30 }
 0x39d   :  { %v2303_v16 = vrot.slane %v2289_v14, %v3435_v46  ;;  %v1648_v17 = vpop.f32.mrb[136].mxu0  ;;  %v1841_v18 = vpop.f32.mrb[136].mxu1 }
 0x39e   :  { %v2155_v11 = vmax.f32 %v2154_v37, %v1648_v17  ;;  %v2197_v19 = vmax.f32 %v2196_v38, %v1841_v18  ;;  %v1650_v21 = vpop.f32.mrb[137].mxu0  ;;  %v1843_v22 = vpop.f32.mrb[137].mxu1 }
 0x39f   :  { %v2304_v23 = vcombine.low %v2296_v15, %v2303_v16  ;;  %v2176_v24 = vmax.f32 %v2175_v4, %v1650_v21  ;;  %v2218_v25 = vmax.f32 %v2217_v5, %v1843_v22  ;;  %v1652_v26 = vpop.f32.mrb[138].mxu0  ;;  %v1845_v28 = vpop.f32.mrb[138].mxu1 }
 0x3a0   :  { %v2156_v29 = vmax.f32 %v2155_v11, %v1652_v26  ;;  %v2198_v31 = vmax.f32 %v2197_v19, %v1845_v28  ;;  %v1654_v35 = vpop.f32.mrb[139].mxu0  ;;  %v1847_v57 = vpop.f32.mrb[139].mxu1 }
 0x3a1   :  { %v2490_v6 = vadd.f32 %v3460_v13, %v2304_v23  ;;  %v2177_v9 = vmax.f32 %v2176_v24, %v1654_v35  ;;  %v2219_v33 = vmax.f32 %v2218_v25, %v1847_v57 }
 0x3a3   :  { %v2492_v39 = vmax.f32 %v2490_v6, 0.0 }
 0x3a5   :  { %2494 = vst [vmem:[%s3484_s7] sm:$0xff] %v2492_v39  ;;  %v1658_v40 = vpop.f32.mrb[140].mxu0  ;;  %v1851_v41 = vpop.f32.mrb[140].mxu1 }
 0x3a6   :  { %v2157_v12 = vmax.f32 %v2156_v29, %v1658_v40  ;;  %v2199_v42 = vmax.f32 %v2198_v31, %v1851_v41  ;;  %v1660_v43 = vpop.f32.mrb[141].mxu0  ;;  %v1853_v44 = vpop.f32.mrb[141].mxu1 }
 0x3a7   :  { %v2178_v45 = vmax.f32 %v2177_v9, %v1660_v43  ;;  %v2220_v47 = vmax.f32 %v2219_v33, %v1853_v44  ;;  %v1662_v48 = vpop.f32.mrb[142].mxu0  ;;  %v1855_v49 = vpop.f32.mrb[142].mxu1 }
 0x3a8   :  { %v2158_v50 = vmax.f32 %v2157_v12, %v1662_v48  ;;  %v2200_v51 = vmax.f32 %v2199_v42, %v1855_v49  ;;  %v1664_v52 = vpop.f32.mrb[143].mxu0  ;;  %v1857_v53 = vpop.f32.mrb[143].mxu1 }
 0x3a9   :  { %v2179_v54 = vmax.f32 %v2178_v45, %v1664_v52  ;;  %v2221_v55 = vmax.f32 %v2220_v47, %v1857_v53 }
 0x3ad   :  { %v1668_v56 = vpop.f32.mrb[144].mxu0  ;;  %v1861_v59 = vpop.f32.mrb[144].mxu1 }
 0x3ae   :  { %v2159_v60 = vmax.f32 %v2158_v50, %v1668_v56  ;;  %v2201_v61 = vmax.f32 %v2200_v51, %v1861_v59  ;;  %v1670_v62 = vpop.f32.mrb[145].mxu0  ;;  %v1863_v63 = vpop.f32.mrb[145].mxu1 }
 0x3af   :  { %v2180_v0 = vmax.f32 %v2179_v54, %v1670_v62  ;;  %v2222_v1 = vmax.f32 %v2221_v55, %v1863_v63  ;;  %v1672_v7 = vpop.f32.mrb[146].mxu0  ;;  %v1865_v8 = vpop.f32.mrb[146].mxu1 }
 0x3b0   :  { %v2160_v58 = vmax.f32 %v2159_v60, %v1672_v7  ;;  %v2202_v10 = vmax.f32 %v2201_v61, %v1865_v8  ;;  %v1674_v20 = vpop.f32.mrb[147].mxu0  ;;  %v1867_v37 = vpop.f32.mrb[147].mxu1 }
 0x3b1   :  { %v2181_v38 = vmax.f32 %v2180_v0, %v1674_v20  ;;  %v2223_v2 = vmax.f32 %v2222_v1, %v1867_v37 }
 0x3b5   :  { %v1678_v3 = vpop.f32.mrb[148].mxu0  ;;  %v1871_v27 = vpop.f32.mrb[148].mxu1 }
 0x3b6   :  { %v2161_v30 = vmax.f32 %v2160_v58, %v1678_v3  ;;  %v2203_v4 = vmax.f32 %v2202_v10, %v1871_v27  ;;  %v1680_v5 = vpop.f32.mrb[149].mxu0  ;;  %v1873_v14 = vpop.f32.mrb[149].mxu1 }
 0x3b7   :  { %v2182_v15 = vmax.f32 %v2181_v38, %v1680_v5  ;;  %v2224_v16 = vmax.f32 %v2223_v2, %v1873_v14  ;;  %v1682_v17 = vpop.f32.mrb[150].mxu0  ;;  %v1875_v18 = vpop.f32.mrb[150].mxu1 }
 0x3b8   :  { %v2162_v11 = vmax.f32 %v2161_v30, %v1682_v17  ;;  %v2204_v19 = vmax.f32 %v2203_v4, %v1875_v18  ;;  %v1684_v21 = vpop.f32.mrb[151].mxu0  ;;  %v1877_v22 = vpop.f32.mrb[151].mxu1 }
 0x3b9   :  { %v2183_v23 = vmax.f32 %v2182_v15, %v1684_v21  ;;  %v2225_v24 = vmax.f32 %v2224_v16, %v1877_v22 }
 0x3bd   :  { %v1688_v25 = vpop.f32.mrb[152].mxu0  ;;  %v1881_v26 = vpop.f32.mrb[152].mxu1 }
 0x3be   :  { %v2163_v28 = vmax.f32 %v2162_v11, %v1688_v25  ;;  %v2205_v29 = vmax.f32 %v2204_v19, %v1881_v26  ;;  %v1690_v31 = vpop.f32.mrb[153].mxu0  ;;  %v1883_v35 = vpop.f32.mrb[153].mxu1 }
 0x3bf   :  { %v2184_v57 = vmax.f32 %v2183_v23, %v1690_v31  ;;  %v2226_v6 = vmax.f32 %v2225_v24, %v1883_v35  ;;  %v1692_v9 = vpop.f32.mrb[154].mxu0  ;;  %v1885_v33 = vpop.f32.mrb[154].mxu1 }
 0x3c0   :  { %v2164_v39 = vmax.f32 %v2163_v28, %v1692_v9  ;;  %v2206_v40 = vmax.f32 %v2205_v29, %v1885_v33  ;;  %v1694_v41 = vpop.f32.mrb[155].mxu0  ;;  %v1887_v12 = vpop.f32.mrb[155].mxu1  ;;  %v2345_v28 = vrot.slane %v2337_v36, %v3435_v46 }
 0x3c1   :  { %v2185_v42 = vmax.f32 %v2184_v57, %v1694_v41  ;;  %v2227_v43 = vmax.f32 %v2226_v6, %v1887_v12 }
 0x3c5   :  { %v1698_v44 = vpop.f32.mrb[156].mxu0  ;;  %v1891_v45 = vpop.f32.mrb[156].mxu1 }
 0x3c6   :  { %v2165_v47 = vmax.f32 %v2164_v39, %v1698_v44  ;;  %v2207_v48 = vmax.f32 %v2206_v40, %v1891_v45  ;;  %v1700_v49 = vpop.f32.mrb[157].mxu0  ;;  %v1893_v50 = vpop.f32.mrb[157].mxu1 }
 0x3c7   :  { %v2186_v51 = vmax.f32 %v2185_v42, %v1700_v49  ;;  %v2228_v52 = vmax.f32 %v2227_v43, %v1893_v50  ;;  %v1702_v53 = vpop.f32.mrb[158].mxu0  ;;  %v1895_v54 = vpop.f32.mrb[158].mxu1 }
 0x3c8   :  { %v2166_v55 = vmax.f32 %v2165_v47, %v1702_v53  ;;  %v2208_v56 = vmax.f32 %v2207_v48, %v1895_v54  ;;  %v1704_v59 = vpop.f32.mrb[159].mxu0  ;;  %v1897_v60 = vpop.f32.mrb[159].mxu1 }
 0x3c9   :  { %v2187_v61 = vmax.f32 %v2186_v51, %v1704_v59  ;;  %v2229_v62 = vmax.f32 %v2228_v52, %v1897_v60 }
 0x3ca   :  { %v2167_v63 = vrot.slane %v2166_v55, 4  ;;  %v2209_v0 = vrot.slane %v2208_v56, 4 }
 0x3cb   :  { %v2188_v1 = vrot.slane %v2187_v61, 4  ;;  %v2230_v7 = vrot.slane %v2229_v62, 4 }
 0x3cc   :  { %v2168_v8 = vmax.f32 %v2166_v55, %v2167_v63  ;;  %v2210_v58 = vmax.f32 %v2208_v56, %v2209_v0 }
 0x3cd   :  { %v2189_v10 = vmax.f32 %v2187_v61, %v2188_v1  ;;  %v2231_v20 = vmax.f32 %v2229_v62, %v2230_v7 }
 0x3ce   :  { %v2169_v37 = vrot.slane %v2168_v8, 2  ;;  %v2211_v38 = vrot.slane %v2210_v58, 2 }
 0x3cf   :  { %v2190_v2 = vrot.slane %v2189_v10, 2  ;;  %v2232_v3 = vrot.slane %v2231_v20, 2 }
 0x3d0   :  { %v2170_v27 = vmax.f32 %v2168_v8, %v2169_v37  ;;  %v2212_v30 = vmax.f32 %v2210_v58, %v2211_v38 }
 0x3d1   :  { %v2191_v4 = vmax.f32 %v2189_v10, %v2190_v2  ;;  %v2233_v5 = vmax.f32 %v2231_v20, %v2232_v3 }
 0x3d2   :  { %v2171_v14 = vrot.slane %v2170_v27, 1  ;;  %v2213_v15 = vrot.slane %v2212_v30, 1 }
 0x3d3   :  { %v2192_v16 = vrot.slane %v2191_v4, 1  ;;  %v2234_v17 = vrot.slane %v2233_v5, 1 }
 0x3d4   :  { %v2172_v18 = vmax.f32 %v2170_v27, %v2171_v14  ;;  %v2214_v11 = vmax.f32 %v2212_v30, %v2213_v15 }
 0x3d5   :  { %v2193_v19 = vmax.f32 %v2191_v4, %v2192_v16  ;;  %v2235_v21 = vmax.f32 %v2233_v5, %v2234_v17 }
 0x3d7   :  { %v2307_v22 = vcombine.low %v2172_v18, %v2193_v19  ;;  %v2308_v23 = vcombine.low %v2214_v11, %v2235_v21 }
 0x3d9   :  { %v2329_v24 = vrot.slane %v2307_v22, %v3435_v46  ;;  %v2336_v25 = vrot.slane %v2308_v23, %v3435_v46 }
 0x3db   :  { %v2338_v26 = vcombine.low %v2329_v24, %v2336_v25 }
 0x3dd   :  { %v2352_v29 = vrot.slane %v2338_v26, %v3435_v46 }
 0x3df   :  { %v2353_v31 = vcombine.low %v2345_v28, %v2352_v29 }
 0x3e1   :  { %v2491_v35 = vadd.f32 %v3460_v13, %v2353_v31 }
 0x3e3   :  { %v2493_v57 = vmax.f32 %v2491_v35, 0.0 }
 0x3e5   :  { %2495 = vst [vmem:[%s3484_s7 + $0x8] sm:$0xff] %v2493_v57 }
 0x3e6   :  { %2500 = vsyncpa [#allocation3], 1 }
 0x3e7   :  { %2501 = vsyncpa [#allocation5], 1 }

// kernel: transform_forward.5
= control target key start
LH: loop header
LB: loop body
LE: loop exit
PB: predicated region body
PF: predicated region fallthrough
CT: control target
= control target key end

     0   :  { %s2253_s24 = smov 0   ;;  %s2255_s25 = smov 0   ;;  %s2653_s0 = inlined_call_operand.vmem [shape: bf16[2,128,3], index: 0, kind: input, shape index: {}]   ;;  %s2654_s1 = inlined_call_operand.vmem [shape: bf16[2,3,64], index: 1, kind: input, shape index: {}]   ;;  %s2655_s2 = inlined_call_operand.vmem [shape: f32[1,64], index: 2, kind: input, shape index: {}]   ;;  %s2656_s3 = inlined_call_operand.vmem [shape: bf16[2,64,128], index: 3, kind: input, shape index: {}]   ;;  %s2657_s4 = inlined_call_operand.vmem [shape: f32[1,128], index: 4, kind: input, shape index: {}]   ;;  %s2658_s5 = inlined_call_operand.vmem [shape: bf16[128,1024], index: 5, kind: input, shape index: {}]   ;;  %s2659_s6 = inlined_call_operand.vmem [shape: f32[1,1024], index: 6, kind: input, shape index: {}]   ;;  %s2660_s7 = inlined_call_operand.vmem [shape: f32[2,1,1024], index: 7, kind: output, shape index: {}]  }
   0x1   :  { %s2257_s26 = smov 0  }
   0x2 LB: > { %s29_s27 = sadd.s32 1, %s2204_s25  ;;  %p1979_p0 = scmp.ge.s32.totalorder %s2208_s26, 1  ;;  %s2208_s26 = sphi %s2257_s26, %s17_s26   ;;  %s2204_s25 = sphi %s2255_s25, %s2662_s25   ;;  %s2200_s24 = sphi %s2253_s24, %s2661_s24  }
   0x3   : > { %p31_p1 = scmp.ge.s32.totalorder %s29_s27, 2  ;;  %p275_p2 = scmp.lt.s32.totalorder %s2208_s26, 3 }
   0x5   : > { %s2664_s27 = smov (%p31_p1, %s29_s27), 0  ;;  %p276_p3 = pnand %p1979_p0, %p275_p2 }
   0x6   : > { %p320_p4 = scmp.lt.s32.totalorder (!%p276_p3), %s2200_s24, 1  ;;  %vm432_vm0 = vcmask (!%p276_p3), 1040384   ;;  %vm433_vm1 = vcmask (!%p276_p3), 1041408   ;;  %v2210_v0 = vmov (!%p276_p3), 65535   ;;  %vm407_vm2 = vcmask (!%p276_p3), 23552   ;;  %v745_v17 = vld [vmem:[%s2658_s5] sm:$0xff] (!%p276_p3) }
   0x7   : > { %279 = sbr.rel (%p276_p3) target bundleno = 829 (0x33d), region = 48  ;;  %v434_v1 = vsel (!%p276_p3), %vm432_vm0, 4294967295, %v2210_v0  ;;  %v749_v18 = vld [vmem:[%s2658_s5 + $0x20] sm:$0xff] (!%p276_p3)  ;;  %v2302_v19 = vld [vmem:[%s2658_s5 + $0x8] sm:$0xff] (!%p276_p3)  ;;  %vm599_vm3 = vcmask (!%p276_p3), 523264  }
   0x8   : > { %v435_v2 = vsel (!%p276_p3), %vm433_vm1, %v434_v1, 0  ;;  %v2016_v20 = vcombine.low (!%p276_p3), %v745_v17, %v749_v18  ;;  %v2017_v21 = vcombine.high (!%p276_p3), %v745_v17, %v749_v18  ;;  %v2307_v22 = vld [vmem:[%s2658_s5 + $0x28] sm:$0xff] (!%p276_p3)  ;;  %v753_v23 = vld [vmem:[%s2658_s5 + $0x40] sm:$0xff] (!%p276_p3) }
   0x9   : > { %v757_v24 = vld [vmem:[%s2658_s5 + $0x60] sm:$0xff] (!%p276_p3)  ;;  %v2018_v25 = vcombine.low (!%p276_p3), %v2302_v19, %v2307_v22  ;;  %v2019_v26 = vcombine.high (!%p276_p3), %v2302_v19, %v2307_v22  ;;  %v754_v58 = vld [vmem:[%s2658_s5 + $0x48] sm:$0xff] (!%p276_p3) }
   0xa   : > { %v2025_v27 = vcombine.high (!%p276_p3), %v753_v23, %v757_v24  ;;  %v761_v28 = vld [vmem:[%s2658_s5 + $0x80] sm:$0xff] (!%p276_p3)  ;;  %v2024_v30 = vcombine.low (!%p276_p3), %v753_v23, %v757_v24  ;;  %v758_v59 = vld [vmem:[%s2658_s5 + $0x68] sm:$0xff] (!%p276_p3) }
   0xb   : > { %v765_v29 = vld [vmem:[%s2658_s5 + $0xa0] sm:$0xff] (!%p276_p3)  ;;  %v2027_v1 = vcombine.high (!%p276_p3), %v754_v58, %v758_v59 }
   0xc   : > { %v2033_v31 = vcombine.high (!%p276_p3), %v761_v28, %v765_v29  ;;  %v769_v32 = vld [vmem:[%s2658_s5 + $0xc0] sm:$0xff] (!%p276_p3)  ;;  %v2032_v34 = vcombine.low (!%p276_p3), %v761_v28, %v765_v29 }
   0xd   : > { %v773_v33 = vld [vmem:[%s2658_s5 + $0xe0] sm:$0xff] (!%p276_p3) }
   0xe   : > { %s2666_s24 = smov (!%p320_p4, %s2200_s24), 1  ;;  %v2041_v35 = vcombine.high %v769_v32, %v773_v33  ;;  %v777_v36 = vld [vmem:[%s2658_s5 + $0x100] sm:$0xff]  ;;  %v2040_v38 = vcombine.low %v769_v32, %v773_v33 }
   0xf   : > { %s2082_s28 = sshll.u32 %s2666_s24, 6  ;;  %s1982_s29 = sshll.u32 %s2666_s24, 1  ;;  %v781_v37 = vld [vmem:[%s2658_s5 + $0x120] sm:$0xff] }
  0x10   : > { %s327_s9 = scalar_lea.vmem %s2653_s0, %s2082_s28  ;;  %s332_s12 = scalar_lea.vmem %s2654_s1, %s1982_s29  ;;  %v2049_v39 = vcombine.high %v777_v36, %v781_v37  ;;  %v785_v40 = vld [vmem:[%s2658_s5 + $0x140] sm:$0xff]  ;;  %v2048_v42 = vcombine.low %v777_v36, %v781_v37  ;;  %v786_v37 = vld [vmem:[%s2658_s5 + $0x148] sm:$0xff] }
  0x11   : > { %v359_v3 = vld [vmem:[%s332_s12] sm:$0x3]  ;;  %v2175_v6 = vld [vmem:[%s327_s9 + $0x8] sm:$0xff]   ;;  %s2083_s13 = sshll.u32 %s2666_s24, 5  ;;  %v2176_v7 = vld [vmem:[%s327_s9 + $0x10] sm:$0xff]  }
  0x12   : > { %v2174_v4 = vld [vmem:[%s327_s9] sm:$0xff]   ;;  %v437_v5 = vand.u32 %v435_v2, %v359_v3  ;;  %s337_s16 = scalar_lea.vmem %s2656_s3, %s2083_s13  ;;  %v2177_v10 = vld [vmem:[%s327_s9 + $0x18] sm:$0xff]   ;;  %v2179_v12 = vld [vmem:[%s327_s9 + $0x28] sm:$0xff]  }
  0x13   : > { %2107 = vmatprep.mubr.msk.bf16.mxu0 %vm407_vm2, %v2174_v4  ;;  %v2182_v8 = vld [vmem:[%s337_s16] sm:$0xff]   ;;  %v2183_v9 = vld [vmem:[%s337_s16 + $0x8] sm:$0xff]   ;;  %v2180_v13 = vld [vmem:[%s327_s9 + $0x30] sm:$0xff]  }
  0x14   : > { %2105 = vmatprep.subr.bf16.mxu0 %v437_v5  ;;  %2123 = vmatprep.subr.bf16.mxu1 %v2182_v8  ;;  %v2178_v11 = vld [vmem:[%s327_s9 + $0x20] sm:$0xff]   ;;  %v2181_v14 = vld [vmem:[%s327_s9 + $0x38] sm:$0xff]   ;;  %v2184_v15 = vld [vmem:[%s337_s16 + $0x10] sm:$0xff]  }
  0x15   : > { %2106 = vmatpush3.bf16.msra.mxu0 %v437_v5  ;;  %2124 = vmatpush3.bf16.msra.mxu1 %v2182_v8  ;;  %v2185_v16 = vld [vmem:[%s337_s16 + $0x18] sm:$0xff]   ;;  %v789_v41 = vld [vmem:[%s2658_s5 + $0x160] sm:$0xff]  ;;  %v762_v4 = vld [vmem:[%s2658_s5 + $0x88] sm:$0xff]  ;;  %s1985_s16 = sshll.u32 %s2666_s24, 3 }
  0x16   : > { %2125 = vmatprep.subr.bf16.mxu1 %v2183_v9  ;;  %1129 = vmatprep.subr.bf16.mxu0 %v2017_v21  ;;  %v2057_v43 = vcombine.high %v785_v40, %v789_v41  ;;  %v2056_v44 = vcombine.low %v785_v40, %v789_v41  ;;  %v2346_v45 = vld [vmem:[%s2655_s2] ss:$0 sm:$0xff]  ;;  %v766_v5 = vld [vmem:[%s2658_s5 + $0xa8] sm:$0xff]  ;;  %s341_s21 = scalar_lea.vmem %s2660_s7, %s1985_s16 }
  0x17   : > { %v2034_v21 = vcombine.low %v762_v4, %v766_v5 }
  0x18   : > { %2108 = vmatmul.mubr.msk.bf16.vlgmr.msra.gmra.mrb[0].mxu0 %vm407_vm2, %v2175_v6 }
  0x19   : > { %2111 = vmatprep.mubr.msk.bf16.mxu0 %vm407_vm2, %v2176_v7  ;;  %2126 = vmatpush3.bf16.msra.mxu1 %v2183_v9 }
  0x1a   : > { %2127 = vmatprep.subr.bf16.mxu1 %v2184_v15  ;;  %1130 = vmatpush1.bf16.msra.mxu0 %v2016_v20 }
  0x1b   : > { %1131 = vmatprep.subr.bf16.mxu0 %v2025_v27  ;;  %v782_v27 = vld [vmem:[%s2658_s5 + $0x128] sm:$0xff] }
  0x1d   : > { %2128 = vmatpush3.bf16.msra.mxu1 %v2184_v15  ;;  %v770_v15 = vld [vmem:[%s2658_s5 + $0xc8] sm:$0xff] }
  0x1e   : > { %2129 = vmatprep.subr.bf16.mxu1 %v2185_v16  ;;  %1132 = vmatpush1.bf16.msra.mxu0 %v2024_v30 }
  0x1f   : > { %1133 = vmatprep.subr.bf16.mxu0 %v2033_v31 }
  0x20   : > { %2112 = vmatmul.mubr.msk.bf16.gmra.mrb[4].mxu0 %vm407_vm2, %v2177_v10 }
  0x21   : > { %2115 = vmatprep.mubr.msk.bf16.mxu0 %vm407_vm2, %v2178_v11  ;;  %2130 = vmatpush3.bf16.msra.mxu1 %v2185_v16  ;;  %v2026_v11 = vcombine.low %v754_v58, %v758_v59  ;;  %v774_v16 = vld [vmem:[%s2658_s5 + $0xe8] sm:$0xff]  ;;  %v793_v59 = vld [vmem:[%s2658_s5 + $0x180] sm:$0xff] }
  0x22   : > { %1242 = vmatprep.subr.bf16.mxu1 %v2019_v26  ;;  %1134 = vmatpush1.bf16.msra.mxu0 %v2032_v34  ;;  %v2043_v23 = vcombine.high %v770_v15, %v774_v16  ;;  %v778_v26 = vld [vmem:[%s2658_s5 + $0x108] sm:$0xff]  ;;  %v2042_v33 = vcombine.low %v770_v15, %v774_v16  ;;  %v752_v16 = vld [vmem:[%s2658_s5 + $0x38] sm:$0xff] }
  0x23   : > { %1135 = vmatprep.subr.bf16.mxu0 %v2041_v35  ;;  %v2051_v35 = vcombine.high %v778_v26, %v782_v27 }
  0x26   : > { %1136 = vmatpush1.bf16.msra.mxu0 %v2040_v38  ;;  %v790_v38 = vld [vmem:[%s2658_s5 + $0x168] sm:$0xff] }
  0x27   : > { %1137 = vmatprep.subr.bf16.mxu0 %v2049_v39 }
  0x28   : > { %2116 = vmatmul.mubr.msk.bf16.gmra.mrb[8].mxu0 %vm407_vm2, %v2179_v12 }
  0x29   : > { %2119 = vmatprep.mubr.msk.bf16.mxu0 %vm407_vm2, %v2180_v13  ;;  %v2035_v13 = vcombine.high %v762_v4, %v766_v5  ;;  %v802_v4 = vld [vmem:[%s2658_s5 + $0x1c8] sm:$0xff] }
  0x2a   : > { %1138 = vmatpush1.bf16.msra.mxu0 %v2048_v42  ;;  %v2050_v42 = vcombine.low %v778_v26, %v782_v27 }
  0x2b   : > { %1139 = vmatprep.subr.bf16.mxu0 %v2057_v43 }
  0x2e   : > { %1140 = vmatpush1.bf16.msra.mxu0 %v2056_v44 }
  0x30   : > { %2120 = vmatmul.mubr.msk.bf16.gmra.mrb[12].mxu0 %vm407_vm2, %v2181_v14 }
  0xeb   : > { %v2109_v46 = vpop.f32.mrb[0].mxu0 }
  0xec   : > { %v482_v47 = vadd.f32 %v2109_v46, %v2346_v45  ;;  %v473_v48 = vpop.f32.mrb[1].mxu0  ;;  %v2059_v46 = vcombine.high %v786_v37, %v790_v38 }
  0xed   : > { %v474_v49 = vadd.f32 %v2346_v45, %v473_v48  ;;  %v2110_v50 = vpop.f32.mrb[2].mxu0 }
  0xee   : > { %v485_v51 = vadd.f32 %v2110_v50, %v2346_v45  ;;  %v476_v52 = vpop.f32.mrb[3].mxu0  ;;  %v538_v54 = vmax.f32 %v482_v47, 0.0 }
  0xef   : > { %v477_v53 = vadd.f32 %v2346_v45, %v476_v52  ;;  %v536_v56 = vmax.f32 %v474_v49, 0.0 }
  0xf0   : > { %v539_v55 = vmax.f32 %v485_v51, 0.0 }
  0xf1   : > { %v537_v57 = vmax.f32 %v477_v53, 0.0 }
  0xf2   : > { %v553_v60 = vpack.c.bf16 %v539_v55, %v538_v54  ;;  %v2058_v54 = vcombine.low %v786_v37, %v790_v38 }
  0xf3   : > { %v2113_v61 = vpop.f32.mrb[4].mxu0  ;;  %v552_v62 = vpack.c.bf16 %v537_v57, %v536_v56 }
  0xf4   : > { %v498_v63 = vadd.f32 %v2113_v61, %v2346_v45  ;;  %v489_v0 = vpop.f32.mrb[5].mxu0 }
  0xf5   : > { %v490_v2 = vadd.f32 %v2346_v45, %v489_v0  ;;  %2131 = vmatprep.mubr.msk.bf16.mxu1 %vm599_vm3, %v552_v62  ;;  %v2114_v3 = vpop.f32.mrb[6].mxu0  ;;  %v798_v62 = vld [vmem:[%s2658_s5 + $0x1a8] sm:$0xff] }
  0xf6   : > { %v542_v6 = vmax.f32 %v498_v63, 0.0  ;;  %v501_v7 = vadd.f32 %v2114_v3, %v2346_v45  ;;  %2132 = vmatmul.mubr.msk.bf16.vlgmr.msra.gmra.mrb[0].mxu1 %vm599_vm3, %v553_v60  ;;  %v492_v8 = vpop.f32.mrb[7].mxu0  ;;  %v794_v60 = vld [vmem:[%s2658_s5 + $0x188] sm:$0xff]  ;;  %v805_v3 = vld [vmem:[%s2658_s5 + $0x1e0] sm:$0xff] }
  0xf7   : > { %v540_v9 = vmax.f32 %v490_v2, 0.0  ;;  %v493_v10 = vadd.f32 %v2346_v45, %v492_v8  ;;  %1243 = vmatpush1.bf16.msra.mxu1 %v2018_v25  ;;  %v2066_v0 = vcombine.low %v794_v60, %v798_v62  ;;  %v801_v2 = vld [vmem:[%s2658_s5 + $0x1c0] sm:$0xff] }
  0xf8   : > { %v543_v12 = vmax.f32 %v501_v7, 0.0  ;;  %1244 = vmatprep.subr.bf16.mxu1 %v2027_v1  ;;  %v2067_v1 = vcombine.high %v794_v60, %v798_v62  ;;  %v2073_v5 = vcombine.high %v801_v2, %v805_v3  ;;  %v2072_v7 = vcombine.low %v801_v2, %v805_v3  ;;  %v772_v62 = vld [vmem:[%s2658_s5 + $0xd8] sm:$0xff] }
  0xf9   : > { %v541_v14 = vmax.f32 %v493_v10, 0.0  ;;  %v2211_v10 = vmov 0  }
  0xfa   : > { %v555_v17 = vpack.c.bf16 %v543_v12, %v542_v6  ;;  %v806_v6 = vld [vmem:[%s2658_s5 + $0x1e8] sm:$0xff]  ;;  %1161 = vmatprep.mubr.bf16.mxu0 %v2211_v10  ;;  %v751_v12 = vld [vmem:[%s2658_s5 + $0x30] sm:$0xff] }
  0xfb   : > { %v554_v18 = vpack.c.bf16 %v541_v14, %v540_v9  ;;  %v2117_v20 = vpop.f32.mrb[8].mxu0  ;;  %1245 = vmatpush1.bf16.msra.mxu1 %v2026_v11  ;;  %v2074_v8 = vcombine.low %v802_v4, %v806_v6  ;;  %v2075_v9 = vcombine.high %v802_v4, %v806_v6  ;;  %v747_v11 = vld [vmem:[%s2658_s5 + $0x10] sm:$0xff] }
  0xfc   : > { %v514_v19 = vadd.f32 %v2117_v20, %v2346_v45  ;;  %v505_v22 = vpop.f32.mrb[9].mxu0  ;;  %1246 = vmatprep.subr.bf16.mxu1 %v2035_v13  ;;  %v748_v13 = vld [vmem:[%s2658_s5 + $0x18] sm:$0xff]  ;;  %v2020_v14 = vcombine.low %v747_v11, %v751_v12  ;;  %v2021_v15 = vcombine.high %v747_v11, %v751_v12  ;;  %v2446_v20 = vld [vmem:[%s2657_s4] ss:$0 sm:$0xff] }
  0xfd   : > { %2135 = vmatprep.mubr.msk.bf16.mxu1 %vm599_vm3, %v554_v18  ;;  %v506_v24 = vadd.f32 %v2346_v45, %v505_v22  ;;  %v2118_v25 = vpop.f32.mrb[10].mxu0  ;;  %v2023_v18 = vcombine.high %v748_v13, %v752_v16 }
  0xfe   : > { %2136 = vmatmul.mubr.msk.bf16.gmra.mrb[4].mxu1 %vm599_vm3, %v555_v17  ;;  %v546_v28 = vmax.f32 %v514_v19, 0.0  ;;  %v517_v29 = vadd.f32 %v2118_v25, %v2346_v45  ;;  %v508_v30 = vpop.f32.mrb[11].mxu0  ;;  %v2022_v17 = vcombine.low %v748_v13, %v752_v16  ;;  %v783_v13 = vld [vmem:[%s2658_s5 + $0x130] sm:$0xff] }
  0xff   : > { %v544_v31 = vmax.f32 %v506_v24, 0.0  ;;  %v509_v32 = vadd.f32 %v2346_v45, %v508_v30  ;;  %1247 = vmatpush1.bf16.msra.mxu1 %v2034_v21  ;;  %v755_v30 = vld [vmem:[%s2658_s5 + $0x50] sm:$0xff] }
 0x100   : > { %v547_v34 = vmax.f32 %v517_v29, 0.0  ;;  %1248 = vmatprep.subr.bf16.mxu1 %v2043_v23 }
 0x101   : > { %v545_v36 = vmax.f32 %v509_v32, 0.0 }
 0x102   : > { %v557_v39 = vpack.c.bf16 %v547_v34, %v546_v28  ;;  %v756_v34 = vld [vmem:[%s2658_s5 + $0x58] sm:$0xff] }
 0x103   : > { %v556_v40 = vpack.c.bf16 %v545_v36, %v544_v31  ;;  %v2121_v41 = vpop.f32.mrb[12].mxu0  ;;  %1249 = vmatpush1.bf16.msra.mxu1 %v2042_v33  ;;  %v759_v33 = vld [vmem:[%s2658_s5 + $0x70] sm:$0xff] }
 0x104   : > { %v530_v43 = vadd.f32 %v2121_v41, %v2346_v45  ;;  %v521_v44 = vpop.f32.mrb[13].mxu0  ;;  %1250 = vmatprep.subr.bf16.mxu1 %v2051_v35  ;;  %v760_v35 = vld [vmem:[%s2658_s5 + $0x78] sm:$0xff] }
 0x105   : > { %2139 = vmatprep.mubr.msk.bf16.mxu1 %vm599_vm3, %v556_v40  ;;  %v522_v47 = vadd.f32 %v2346_v45, %v521_v44  ;;  %v2122_v48 = vpop.f32.mrb[14].mxu0  ;;  %v767_v44 = vld [vmem:[%s2658_s5 + $0xb0] sm:$0xff] }
 0x106   : > { %2140 = vmatmul.mubr.msk.bf16.gmra.mrb[8].mxu1 %vm599_vm3, %v557_v39  ;;  %v550_v49 = vmax.f32 %v530_v43, 0.0  ;;  %v533_v50 = vadd.f32 %v2122_v48, %v2346_v45  ;;  %v524_v51 = vpop.f32.mrb[15].mxu0  ;;  %v763_v39 = vld [vmem:[%s2658_s5 + $0x90] sm:$0xff]  ;;  %v2031_v43 = vcombine.high %v756_v34, %v760_v35 }
 0x107   : > { %v548_v52 = vmax.f32 %v522_v47, 0.0  ;;  %v525_v53 = vadd.f32 %v2346_v45, %v524_v51  ;;  %1251 = vmatpush1.bf16.msra.mxu1 %v2050_v42  ;;  %v797_v45 = vld [vmem:[%s2658_s5 + $0x1a0] sm:$0xff]  ;;  %v2029_v42 = vcombine.high %v755_v30, %v759_v33  ;;  %v768_v47 = vld [vmem:[%s2658_s5 + $0xb8] sm:$0xff]  ;;  %v2036_v3 = vcombine.low %v763_v39, %v767_v44 }
 0x108   : > { %v551_v55 = vmax.f32 %v533_v50, 0.0  ;;  %1252 = vmatprep.subr.bf16.mxu1 %v2059_v46  ;;  %v2065_v61 = vcombine.high %v793_v59, %v797_v45  ;;  %v2064_v63 = vcombine.low %v793_v59, %v797_v45  ;;  %v764_v46 = vld [vmem:[%s2658_s5 + $0x98] sm:$0xff]  ;;  %v771_v45 = vld [vmem:[%s2658_s5 + $0xd0] sm:$0xff] }
 0x109   : > { %v549_v56 = vmax.f32 %v525_v53, 0.0  ;;  %v2028_v53 = vcombine.low %v755_v30, %v759_v33  ;;  %v2038_v4 = vcombine.low %v764_v46, %v768_v47  ;;  %v788_v30 = vld [vmem:[%s2658_s5 + $0x158] sm:$0xff] }
 0x10a   : > { %v559_v57 = vpack.c.bf16 %v551_v55, %v550_v49  ;;  %1141 = vmatprep.subr.bf16.mxu0 %v2065_v61  ;;  %v775_v61 = vld [vmem:[%s2658_s5 + $0xf0] sm:$0xff] }
 0x10b   : > { %v558_v58 = vpack.c.bf16 %v549_v56, %v548_v52  ;;  %1253 = vmatpush1.bf16.msra.mxu1 %v2058_v54  ;;  %1142 = vmatpush1.bf16.msra.mxu0 %v2064_v63  ;;  %v2030_v54 = vcombine.low %v756_v34, %v760_v35  ;;  %v776_v63 = vld [vmem:[%s2658_s5 + $0xf8] sm:$0xff] }
 0x10c   : > { %1254 = vmatprep.subr.bf16.mxu1 %v2067_v1  ;;  %1143 = vmatprep.subr.bf16.mxu0 %v2073_v5 }
 0x10d   : > { %2143 = vmatprep.mubr.msk.bf16.mxu1 %vm599_vm3, %v558_v58  ;;  %v2039_v58 = vcombine.high %v764_v46, %v768_v47  ;;  %v799_v47 = vld [vmem:[%s2658_s5 + $0x1b0] sm:$0xff] }
 0x10e   : > { %2144 = vmatmul.mubr.msk.bf16.gmra.mrb[12].mxu1 %vm599_vm3, %v559_v57  ;;  %v2037_v57 = vcombine.high %v763_v39, %v767_v44 }
 0x10f   : > { %1255 = vmatpush1.bf16.msra.mxu1 %v2066_v0  ;;  %1144 = vmatpush1.bf16.msra.mxu0 %v2072_v7  ;;  %v2045_v7 = vcombine.high %v771_v45, %v775_v61 }
 0x110   : > { %1256 = vmatprep.subr.bf16.mxu1 %v2075_v9  ;;  %1274 = vmatprep.mubr.bf16.mxu1 %v2211_v10  ;;  %v779_v9 = vld [vmem:[%s2658_s5 + $0x110] sm:$0xff] }
 0x111   : > { %1355 = vmatprep.subr.bf16.mxu0 %v2021_v15  ;;  %v784_v15 = vld [vmem:[%s2658_s5 + $0x138] sm:$0xff]  ;;  %v2052_v35 = vcombine.low %v779_v9, %v783_v13 }
 0x113   : > { %1257 = vmatpush1.bf16.msra.mxu1 %v2074_v8  ;;  %v2047_v8 = vcombine.high %v772_v62, %v776_v63 }
 0x114   : > { %1468 = vmatprep.subr.bf16.mxu1 %v2023_v18 }
 0x1c9   : > { %v2133_v21 = vpop.f32.mrb[0].mxu1 }
 0x1ca   : > { %v667_v19 = vadd.f32 %v2133_v21, %v2446_v20  ;;  %v658_v22 = vpop.f32.mrb[1].mxu1 }
 0x1cb   : > { %v659_v23 = vadd.f32 %v2446_v20, %v658_v22  ;;  %v2134_v24 = vpop.f32.mrb[2].mxu1  ;;  %v2044_v22 = vcombine.low %v771_v45, %v775_v61  ;;  %v803_v45 = vld [vmem:[%s2658_s5 + $0x1d0] sm:$0xff] }
 0x1cc   : > { %v670_v25 = vadd.f32 %v2134_v24, %v2446_v20  ;;  %v661_v26 = vpop.f32.mrb[3].mxu1  ;;  %v723_v28 = vmax.f32 %v667_v19, 0.0  ;;  %v807_v61 = vld [vmem:[%s2658_s5 + $0x1f0] sm:$0xff] }
 0x1cd   : > { %v662_v27 = vadd.f32 %v2446_v20, %v661_v26  ;;  %v721_v31 = vmax.f32 %v659_v23, 0.0  ;;  %v2046_v23 = vcombine.low %v772_v62, %v776_v63  ;;  %v808_v62 = vld [vmem:[%s2658_s5 + $0x1f8] sm:$0xff] }
 0x1ce   : > { %v724_v29 = vmax.f32 %v670_v25, 0.0  ;;  %v2053_v25 = vcombine.high %v779_v9, %v783_v13 }
 0x1cf   : > { %v722_v32 = vmax.f32 %v662_v27, 0.0  ;;  %v787_v27 = vld [vmem:[%s2658_s5 + $0x150] sm:$0xff] }
 0x1d0   : > { %v2464_v36 = vpack.c.bf16 %v724_v29, %v723_v28  ;;  %v791_v29 = vld [vmem:[%s2658_s5 + $0x170] sm:$0xff] }
 0x1d1   : > { %v2466_v37 = vpack.c.bf16 %v722_v32, %v721_v31  ;;  %v2137_v38 = vpop.f32.mrb[4].mxu1  ;;  %v792_v31 = vld [vmem:[%s2658_s5 + $0x178] sm:$0xff] }
 0x1d2   : > { %v683_v40 = vadd.f32 %v2137_v38, %v2446_v20  ;;  %v674_v41 = vpop.f32.mrb[5].mxu1 }
 0x1d3   : > { %v675_v48 = vadd.f32 %v2446_v20, %v674_v41  ;;  %1162 = vmatmul.mubr.bf16.vlgmr.msra.gmra.mrb[16].mxu0 %v2466_v37  ;;  %1275 = vmatmul.mubr.bf16.vlgmr.msra.gmra.mrb[16].mxu1 %v2466_v37  ;;  %v2138_v49 = vpop.f32.mrb[6].mxu1  ;;  %v2061_v41 = vcombine.high %v787_v27, %v791_v29 }
 0x1d4   : > { %v727_v50 = vmax.f32 %v683_v40, 0.0  ;;  %1356 = vmatpush1.bf16.msra.mxu0 %v2020_v14  ;;  %1469 = vmatpush1.bf16.msra.mxu1 %v2022_v17  ;;  %v686_v51 = vadd.f32 %v2138_v49, %v2446_v20  ;;  %v677_v52 = vpop.f32.mrb[7].mxu1  ;;  %v780_v14 = vld [vmem:[%s2658_s5 + $0x118] sm:$0xff] }
 0x1d5   : > { %v725_v55 = vmax.f32 %v675_v48, 0.0  ;;  %v678_v56 = vadd.f32 %v2446_v20, %v677_v52  ;;  %1171 = vmatprep.mubr.bf16.mxu0 %v2211_v10  ;;  %1284 = vmatprep.mubr.bf16.mxu1 %v2211_v10  ;;  %v2055_v26 = vcombine.high %v780_v14, %v784_v15  ;;  %v2054_v38 = vcombine.low %v780_v14, %v784_v15  ;;  %v796_v48 = vld [vmem:[%s2658_s5 + $0x198] sm:$0xff] }
 0x1d6   : > { %v728_v59 = vmax.f32 %v686_v51, 0.0  ;;  %1357 = vmatprep.subr.bf16.mxu0 %v2029_v42  ;;  %1470 = vmatprep.subr.bf16.mxu1 %v2031_v43  ;;  %v2063_v42 = vcombine.high %v788_v30, %v792_v31  ;;  %v795_v43 = vld [vmem:[%s2658_s5 + $0x190] sm:$0xff]  ;;  %v800_v49 = vld [vmem:[%s2658_s5 + $0x1b8] sm:$0xff] }
 0x1d7   : > { %v726_v60 = vmax.f32 %v678_v56, 0.0  ;;  %v2062_v56 = vcombine.low %v788_v30, %v792_v31 }
 0x1d8   : > { %v2500_v0 = vpack.c.bf16 %v728_v59, %v727_v50  ;;  %1358 = vmatpush1.bf16.msra.mxu0 %v2028_v53  ;;  %1471 = vmatpush1.bf16.msra.mxu1 %v2030_v54  ;;  %v2071_v59 = vcombine.high %v796_v48, %v800_v49 }
 0x1d9   : > { %v2502_v1 = vpack.c.bf16 %v726_v60, %v725_v55  ;;  %v2141_v2 = vpop.f32.mrb[8].mxu1  ;;  %1359 = vmatprep.subr.bf16.mxu0 %v2037_v57  ;;  %1472 = vmatprep.subr.bf16.mxu1 %v2039_v58  ;;  %v2060_v55 = vcombine.low %v787_v27, %v791_v29  ;;  %v2069_v58 = vcombine.high %v795_v43, %v799_v47 }
 0x1da   : > { %v699_v5 = vadd.f32 %v2141_v2, %v2446_v20  ;;  %v690_v6 = vpop.f32.mrb[9].mxu1 }
 0x1db   : > { %1172 = vmatmul.mubr.bf16.gmra.mrb[20].mxu0 %v2464_v36  ;;  %1285 = vmatmul.mubr.bf16.gmra.mrb[20].mxu1 %v2464_v36  ;;  %v691_v11 = vadd.f32 %v2446_v20, %v690_v6  ;;  %v2142_v12 = vpop.f32.mrb[10].mxu1 }
 0x1dc   : > { %v731_v16 = vmax.f32 %v699_v5, 0.0  ;;  %1181 = vmatprep.mubr.bf16.mxu0 %v2211_v10  ;;  %1294 = vmatprep.mubr.bf16.mxu1 %v2211_v10  ;;  %v702_v17 = vadd.f32 %v2142_v12, %v2446_v20  ;;  %v693_v18 = vpop.f32.mrb[11].mxu1  ;;  %v2077_v5 = vcombine.high %v803_v45, %v807_v61 }
 0x1dd   : > { %v729_v21 = vmax.f32 %v691_v11, 0.0  ;;  %1360 = vmatpush1.bf16.msra.mxu0 %v2036_v3  ;;  %1473 = vmatpush1.bf16.msra.mxu1 %v2038_v4  ;;  %v694_v19 = vadd.f32 %v2446_v20, %v693_v18  ;;  %v2068_v3 = vcombine.low %v795_v43, %v799_v47  ;;  %v2070_v4 = vcombine.low %v796_v48, %v800_v49 }
 0x1de   : > { %v732_v24 = vmax.f32 %v702_v17, 0.0  ;;  %1361 = vmatprep.subr.bf16.mxu0 %v2045_v7  ;;  %1474 = vmatprep.subr.bf16.mxu1 %v2047_v8  ;;  %v2076_v7 = vcombine.low %v803_v45, %v807_v61 }
 0x1df   : > { %v730_v28 = vmax.f32 %v694_v19, 0.0 }
 0x1e0   : > { %v2536_v32 = vpack.c.bf16 %v732_v24, %v731_v16 }
 0x1e1   : > { %v2538_v33 = vpack.c.bf16 %v730_v28, %v729_v21  ;;  %1362 = vmatpush1.bf16.msra.mxu0 %v2044_v22  ;;  %1475 = vmatpush1.bf16.msra.mxu1 %v2046_v23  ;;  %v2145_v34 = vpop.f32.mrb[12].mxu1 }
 0x1e2   : > { %v715_v39 = vadd.f32 %v2145_v34, %v2446_v20  ;;  %1363 = vmatprep.subr.bf16.mxu0 %v2053_v25  ;;  %1476 = vmatprep.subr.bf16.mxu1 %v2055_v26  ;;  %v706_v40 = vpop.f32.mrb[13].mxu1 }
 0x1e3   : > { %1182 = vmatmul.mubr.bf16.gmra.mrb[24].mxu0 %v2502_v1  ;;  %1295 = vmatmul.mubr.bf16.gmra.mrb[24].mxu1 %v2502_v1  ;;  %v707_v44 = vadd.f32 %v2446_v20, %v706_v40  ;;  %v2146_v46 = vpop.f32.mrb[14].mxu1 }
 0x1e4   : > { %1191 = vmatprep.mubr.bf16.mxu0 %v2211_v10  ;;  %1304 = vmatprep.mubr.bf16.mxu1 %v2211_v10  ;;  %v735_v50 = vmax.f32 %v715_v39, 0.0  ;;  %v718_v51 = vadd.f32 %v2146_v46, %v2446_v20  ;;  %v709_v52 = vpop.f32.mrb[15].mxu1 }
 0x1e5   : > { %v733_v53 = vmax.f32 %v707_v44, 0.0  ;;  %1364 = vmatpush1.bf16.msra.mxu0 %v2052_v35  ;;  %1477 = vmatpush1.bf16.msra.mxu1 %v2054_v38  ;;  %v710_v54 = vadd.f32 %v2446_v20, %v709_v52  ;;  %v804_v20 = vld [vmem:[%s2658_s5 + $0x1d8] sm:$0xff] }
 0x1e6   : > { %v736_v57 = vmax.f32 %v718_v51, 0.0  ;;  %1365 = vmatprep.subr.bf16.mxu0 %v2061_v41  ;;  %1478 = vmatprep.subr.bf16.mxu1 %v2063_v42  ;;  %v2079_v6 = vcombine.high %v804_v20, %v808_v62  ;;  %v2078_v8 = vcombine.low %v804_v20, %v808_v62 }
 0x1e7   : > { %v734_v60 = vmax.f32 %v710_v54, 0.0 }
 0x1e8   : > { %v2572_v63 = vpack.c.bf16 %v736_v57, %v735_v50 }
 0x1e9   : > { %v743_v2 = vpack.c.bf16 %v734_v60, %v733_v53  ;;  %1366 = vmatpush1.bf16.msra.mxu0 %v2060_v55  ;;  %1479 = vmatpush1.bf16.msra.mxu1 %v2062_v56 }
 0x1ea   : > { %1367 = vmatprep.subr.bf16.mxu0 %v2069_v58  ;;  %1480 = vmatprep.subr.bf16.mxu1 %v2071_v59 }
 0x1eb   : > { %1192 = vmatmul.mubr.bf16.gmra.mrb[28].mxu0 %v2500_v0  ;;  %1305 = vmatmul.mubr.bf16.gmra.mrb[28].mxu1 %v2500_v0 }
 0x1ec   : > { %1201 = vmatprep.mubr.bf16.mxu0 %v2211_v10  ;;  %1314 = vmatprep.mubr.bf16.mxu1 %v2211_v10 }
 0x1ed   : > { %1368 = vmatpush1.bf16.msra.mxu0 %v2068_v3  ;;  %1481 = vmatpush1.bf16.msra.mxu1 %v2070_v4 }
 0x1ee   : > { %1369 = vmatprep.subr.bf16.mxu0 %v2077_v5  ;;  %1482 = vmatprep.subr.bf16.mxu1 %v2079_v6 }
 0x1f1   : > { %1370 = vmatpush1.bf16.msra.mxu0 %v2076_v7  ;;  %1483 = vmatpush1.bf16.msra.mxu1 %v2078_v8 }
 0x1f3   : > { %1202 = vmatmul.mubr.bf16.gmra.mrb[32].mxu0 %v2538_v33  ;;  %1315 = vmatmul.mubr.bf16.gmra.mrb[32].mxu1 %v2538_v33 }
 0x1f4   : > { %1211 = vmatprep.mubr.bf16.mxu0 %v2211_v10  ;;  %1324 = vmatprep.mubr.bf16.mxu1 %v2211_v10 }
 0x1fb   : > { %1212 = vmatmul.mubr.bf16.gmra.mrb[36].mxu0 %v2536_v32  ;;  %1325 = vmatmul.mubr.bf16.gmra.mrb[36].mxu1 %v2536_v32 }
 0x1fc   : > { %1221 = vmatprep.mubr.bf16.mxu0 %v2211_v10  ;;  %1334 = vmatprep.mubr.bf16.mxu1 %v2211_v10 }
 0x203   : > { %1222 = vmatmul.mubr.bf16.gmra.mrb[40].mxu0 %v743_v2  ;;  %1335 = vmatmul.mubr.bf16.gmra.mrb[40].mxu1 %v743_v2 }
 0x204   : > { %1231 = vmatprep.mubr.bf16.mxu0 %v2211_v10  ;;  %1344 = vmatprep.mubr.bf16.mxu1 %v2211_v10 }
 0x20b   : > { %1232 = vmatmul.mubr.bf16.gmra.mrb[44].mxu0 %v2572_v63  ;;  %1345 = vmatmul.mubr.bf16.gmra.mrb[44].mxu1 %v2572_v63 }
 0x20c   : > { %1387 = vmatprep.mubr.bf16.mxu0 %v2211_v10  ;;  %1500 = vmatprep.mubr.bf16.mxu1 %v2211_v10 }
 0x213   : > { %1388 = vmatmul.mubr.bf16.vlgmr.msra.gmra.mrb[48].mxu0 %v2466_v37  ;;  %1501 = vmatmul.mubr.bf16.vlgmr.msra.gmra.mrb[48].mxu1 %v2466_v37 }
 0x214   : > { %1397 = vmatprep.mubr.bf16.mxu0 %v2211_v10  ;;  %1510 = vmatprep.mubr.bf16.mxu1 %v2211_v10 }
 0x21b   : > { %1398 = vmatmul.mubr.bf16.gmra.mrb[52].mxu0 %v2464_v36  ;;  %1511 = vmatmul.mubr.bf16.gmra.mrb[52].mxu1 %v2464_v36 }
 0x21c   : > { %1407 = vmatprep.mubr.bf16.mxu0 %v2211_v10  ;;  %1520 = vmatprep.mubr.bf16.mxu1 %v2211_v10 }
 0x223   : > { %1408 = vmatmul.mubr.bf16.gmra.mrb[56].mxu0 %v2502_v1  ;;  %1521 = vmatmul.mubr.bf16.gmra.mrb[56].mxu1 %v2502_v1 }
 0x224   : > { %1417 = vmatprep.mubr.bf16.mxu0 %v2211_v10  ;;  %1530 = vmatprep.mubr.bf16.mxu1 %v2211_v10 }
 0x22b   : > { %1418 = vmatmul.mubr.bf16.gmra.mrb[60].mxu0 %v2500_v0  ;;  %1531 = vmatmul.mubr.bf16.gmra.mrb[60].mxu1 %v2500_v0 }
 0x22c   : > { %1427 = vmatprep.mubr.bf16.mxu0 %v2211_v10  ;;  %1540 = vmatprep.mubr.bf16.mxu1 %v2211_v10 }
 0x233   : > { %1428 = vmatmul.mubr.bf16.gmra.mrb[64].mxu0 %v2538_v33  ;;  %1541 = vmatmul.mubr.bf16.gmra.mrb[64].mxu1 %v2538_v33 }
 0x234   : > { %1437 = vmatprep.mubr.bf16.mxu0 %v2211_v10  ;;  %1550 = vmatprep.mubr.bf16.mxu1 %v2211_v10 }
 0x23b   : > { %1438 = vmatmul.mubr.bf16.gmra.mrb[68].mxu0 %v2536_v32  ;;  %1551 = vmatmul.mubr.bf16.gmra.mrb[68].mxu1 %v2536_v32 }
 0x23c   : > { %1447 = vmatprep.mubr.bf16.mxu0 %v2211_v10  ;;  %1560 = vmatprep.mubr.bf16.mxu1 %v2211_v10 }
 0x243   : > { %1448 = vmatmul.mubr.bf16.gmra.mrb[72].mxu0 %v743_v2  ;;  %1561 = vmatmul.mubr.bf16.gmra.mrb[72].mxu1 %v743_v2 }
 0x244   : > { %1457 = vmatprep.mubr.bf16.mxu0 %v2211_v10  ;;  %1570 = vmatprep.mubr.bf16.mxu1 %v2211_v10 }
 0x24b   : > { %1458 = vmatmul.mubr.bf16.gmra.mrb[76].mxu0 %v2572_v63  ;;  %1571 = vmatmul.mubr.bf16.gmra.mrb[76].mxu1 %v2572_v63 }
 0x2a6   : > { %v1163_v36 = vpop.f32.mrb[16].mxu0  ;;  %v1276_v37 = vpop.f32.mrb[16].mxu1 }
 0x2a7   : > { %v1165_v0 = vpop.f32.mrb[17].mxu0  ;;  %v1278_v1 = vpop.f32.mrb[17].mxu1 }
 0x2a8   : > { %v1167_v9 = vpop.f32.mrb[18].mxu0  ;;  %v1280_v11 = vpop.f32.mrb[18].mxu1 }
 0x2a9   : > { %v1581_v12 = vmax.f32 %v1163_v36, %v1167_v9  ;;  %v1623_v13 = vmax.f32 %v1276_v37, %v1280_v11  ;;  %v1169_v14 = vpop.f32.mrb[19].mxu0  ;;  %v1282_v15 = vpop.f32.mrb[19].mxu1 }
 0x2aa   : > { %v1602_v16 = vmax.f32 %v1165_v0, %v1169_v14  ;;  %v1644_v17 = vmax.f32 %v1278_v1, %v1282_v15 }
 0x2ae   : > { %v1173_v18 = vpop.f32.mrb[20].mxu0  ;;  %v1286_v21 = vpop.f32.mrb[20].mxu1 }
 0x2af   : > { %v1582_v19 = vmax.f32 %v1581_v12, %v1173_v18  ;;  %v1624_v10 = vmax.f32 %v1623_v13, %v1286_v21  ;;  %v1175_v22 = vpop.f32.mrb[21].mxu0  ;;  %v1288_v23 = vpop.f32.mrb[21].mxu1 }
 0x2b0   : > { %v1603_v24 = vmax.f32 %v1602_v16, %v1175_v22  ;;  %v1645_v25 = vmax.f32 %v1644_v17, %v1288_v23  ;;  %v1177_v26 = vpop.f32.mrb[22].mxu0  ;;  %v1290_v27 = vpop.f32.mrb[22].mxu1 }
 0x2b1   : > { %v1583_v28 = vmax.f32 %v1582_v19, %v1177_v26  ;;  %v1625_v29 = vmax.f32 %v1624_v10, %v1290_v27  ;;  %v1179_v30 = vpop.f32.mrb[23].mxu0  ;;  %v1292_v31 = vpop.f32.mrb[23].mxu1 }
 0x2b2   : > { %v1604_v32 = vmax.f32 %v1603_v24, %v1179_v30  ;;  %v1646_v33 = vmax.f32 %v1645_v25, %v1292_v31 }
 0x2b6   : > { %v1183_v34 = vpop.f32.mrb[24].mxu0  ;;  %v1296_v35 = vpop.f32.mrb[24].mxu1 }
 0x2b7   : > { %v1584_v38 = vmax.f32 %v1583_v28, %v1183_v34  ;;  %v1626_v39 = vmax.f32 %v1625_v29, %v1296_v35  ;;  %v1185_v40 = vpop.f32.mrb[25].mxu0  ;;  %v1298_v41 = vpop.f32.mrb[25].mxu1 }
 0x2b8   : > { %v1605_v42 = vmax.f32 %v1604_v32, %v1185_v40  ;;  %v1647_v43 = vmax.f32 %v1646_v33, %v1298_v41  ;;  %v1187_v44 = vpop.f32.mrb[26].mxu0  ;;  %v1300_v46 = vpop.f32.mrb[26].mxu1 }
 0x2b9   : > { %v1585_v47 = vmax.f32 %v1584_v38, %v1187_v44  ;;  %v1627_v48 = vmax.f32 %v1626_v39, %v1300_v46  ;;  %v1189_v49 = vpop.f32.mrb[27].mxu0  ;;  %v1302_v50 = vpop.f32.mrb[27].mxu1 }
 0x2ba   : > { %v1606_v51 = vmax.f32 %v1605_v42, %v1189_v49  ;;  %v1648_v52 = vmax.f32 %v1647_v43, %v1302_v50 }
 0x2be   : > { %v1193_v53 = vpop.f32.mrb[28].mxu0  ;;  %v1306_v54 = vpop.f32.mrb[28].mxu1 }
 0x2bf   : > { %v1586_v55 = vmax.f32 %v1585_v47, %v1193_v53  ;;  %v1628_v56 = vmax.f32 %v1627_v48, %v1306_v54  ;;  %v1195_v57 = vpop.f32.mrb[29].mxu0  ;;  %v1308_v58 = vpop.f32.mrb[29].mxu1 }
 0x2c0   : > { %v1607_v59 = vmax.f32 %v1606_v51, %v1195_v57  ;;  %v1649_v45 = vmax.f32 %v1648_v52, %v1308_v58  ;;  %v1197_v60 = vpop.f32.mrb[30].mxu0  ;;  %v1310_v61 = vpop.f32.mrb[30].mxu1 }
 0x2c1   : > { %v1587_v20 = vmax.f32 %v1586_v55, %v1197_v60  ;;  %v1629_v62 = vmax.f32 %v1628_v56, %v1310_v61  ;;  %v1199_v63 = vpop.f32.mrb[31].mxu0  ;;  %v1312_v2 = vpop.f32.mrb[31].mxu1 }
 0x2c2   : > { %v1608_v3 = vmax.f32 %v1607_v59, %v1199_v63  ;;  %v1650_v4 = vmax.f32 %v1649_v45, %v1312_v2 }
 0x2c6   : > { %v1203_v5 = vpop.f32.mrb[32].mxu0  ;;  %v1316_v6 = vpop.f32.mrb[32].mxu1 }
 0x2c7   : > { %v1588_v7 = vmax.f32 %v1587_v20, %v1203_v5  ;;  %v1630_v8 = vmax.f32 %v1629_v62, %v1316_v6  ;;  %v1205_v36 = vpop.f32.mrb[33].mxu0  ;;  %v1318_v37 = vpop.f32.mrb[33].mxu1 }
 0x2c8   : > { %v1609_v0 = vmax.f32 %v1608_v3, %v1205_v36  ;;  %v1651_v1 = vmax.f32 %v1650_v4, %v1318_v37  ;;  %v1207_v9 = vpop.f32.mrb[34].mxu0  ;;  %v1320_v11 = vpop.f32.mrb[34].mxu1  ;;  %v1768_v37 = vlaneseq }
 0x2c9   : > { %v1589_v12 = vmax.f32 %v1588_v7, %v1207_v9  ;;  %v1631_v13 = vmax.f32 %v1630_v8, %v1320_v11  ;;  %v1209_v14 = vpop.f32.mrb[35].mxu0  ;;  %v1322_v15 = vpop.f32.mrb[35].mxu1  ;;  %v2212_v8 = vmov 1966171168  }
 0x2ca   : > { %v1610_v16 = vmax.f32 %v1609_v0, %v1209_v14  ;;  %v1652_v17 = vmax.f32 %v1651_v1, %v1322_v15  ;;  %v1766_v36 = vunpack.c.l.s4 %v2212_v8 }
 0x2ce   : > { %v1213_v18 = vpop.f32.mrb[36].mxu0  ;;  %v1326_v21 = vpop.f32.mrb[36].mxu1 }
 0x2cf   : > { %v1590_v19 = vmax.f32 %v1589_v12, %v1213_v18  ;;  %v1632_v10 = vmax.f32 %v1631_v13, %v1326_v21  ;;  %v1215_v22 = vpop.f32.mrb[37].mxu0  ;;  %v1328_v23 = vpop.f32.mrb[37].mxu1 }
 0x2d0   : > { %v1611_v24 = vmax.f32 %v1610_v16, %v1215_v22  ;;  %v1653_v25 = vmax.f32 %v1652_v17, %v1328_v23  ;;  %v1217_v26 = vpop.f32.mrb[38].mxu0  ;;  %v1330_v27 = vpop.f32.mrb[38].mxu1 }
 0x2d1   : > { %v1591_v28 = vmax.f32 %v1590_v19, %v1217_v26  ;;  %v1633_v29 = vmax.f32 %v1632_v10, %v1330_v27  ;;  %v1219_v30 = vpop.f32.mrb[39].mxu0  ;;  %v1332_v31 = vpop.f32.mrb[39].mxu1  ;;  %v1767_v19 = vunpack.c.0.s8 %v1766_v36  ;;  %v1769_v10 = vshrl.u32 %v1768_v37, 7 }
 0x2d2   : > { %v1612_v32 = vmax.f32 %v1611_v24, %v1219_v30  ;;  %v1654_v33 = vmax.f32 %v1653_v25, %v1332_v31 }
 0x2d6   : > { %v1223_v34 = vpop.f32.mrb[40].mxu0  ;;  %v1336_v35 = vpop.f32.mrb[40].mxu1 }
 0x2d7   : > { %v1592_v38 = vmax.f32 %v1591_v28, %v1223_v34  ;;  %v1634_v39 = vmax.f32 %v1633_v29, %v1336_v35  ;;  %v1225_v40 = vpop.f32.mrb[41].mxu0  ;;  %v1338_v41 = vpop.f32.mrb[41].mxu1 }
 0x2d8   : > { %v1613_v42 = vmax.f32 %v1612_v32, %v1225_v40  ;;  %v1655_v43 = vmax.f32 %v1654_v33, %v1338_v41  ;;  %v1227_v44 = vpop.f32.mrb[42].mxu0  ;;  %v1340_v46 = vpop.f32.mrb[42].mxu1 }
 0x2d9   : > { %v1593_v47 = vmax.f32 %v1592_v38, %v1227_v44  ;;  %v1635_v48 = vmax.f32 %v1634_v39, %v1340_v46  ;;  %v1229_v49 = vpop.f32.mrb[43].mxu0  ;;  %v1342_v50 = vpop.f32.mrb[43].mxu1  ;;  %v2620_v44 = vsub.s32 %v1767_v19, %v1769_v10 }
 0x2da   : > { %v1614_v51 = vmax.f32 %v1613_v42, %v1229_v49  ;;  %v1656_v52 = vmax.f32 %v1655_v43, %v1342_v50 }
 0x2de   : > { %v1233_v53 = vpop.f32.mrb[44].mxu0  ;;  %v1346_v54 = vpop.f32.mrb[44].mxu1 }
 0x2df   : > { %v1594_v55 = vmax.f32 %v1593_v47, %v1233_v53  ;;  %v1636_v56 = vmax.f32 %v1635_v48, %v1346_v54  ;;  %v1235_v57 = vpop.f32.mrb[45].mxu0  ;;  %v1348_v58 = vpop.f32.mrb[45].mxu1 }
 0x2e0   : > { %v1615_v59 = vmax.f32 %v1614_v51, %v1235_v57  ;;  %v1657_v45 = vmax.f32 %v1656_v52, %v1348_v58  ;;  %v1237_v60 = vpop.f32.mrb[46].mxu0  ;;  %v1350_v61 = vpop.f32.mrb[46].mxu1 }
 0x2e1   : > { %v1595_v20 = vmax.f32 %v1594_v55, %v1237_v60  ;;  %v1637_v62 = vmax.f32 %v1636_v56, %v1350_v61  ;;  %v1239_v63 = vpop.f32.mrb[47].mxu0  ;;  %v1352_v2 = vpop.f32.mrb[47].mxu1 }
 0x2e2   : > { %v1616_v3 = vmax.f32 %v1615_v59, %v1239_v63  ;;  %v1658_v4 = vmax.f32 %v1657_v45, %v1352_v2 }
 0x2e3   : > { %v1596_v5 = vrot.slane %v1595_v20, 4  ;;  %v1638_v6 = vrot.slane %v1637_v62, 4 }
 0x2e4   : > { %v1617_v7 = vrot.slane %v1616_v3, 4  ;;  %v1659_v0 = vrot.slane %v1658_v4, 4 }
 0x2e5   : > { %v1597_v1 = vmax.f32 %v1595_v20, %v1596_v5  ;;  %v1639_v9 = vmax.f32 %v1637_v62, %v1638_v6 }
 0x2e6   : > { %v1618_v11 = vmax.f32 %v1616_v3, %v1617_v7  ;;  %v1660_v12 = vmax.f32 %v1658_v4, %v1659_v0  ;;  %v1389_v13 = vpop.f32.mrb[48].mxu0  ;;  %v1502_v14 = vpop.f32.mrb[48].mxu1 }
 0x2e7   : > { %v1598_v15 = vrot.slane %v1597_v1, 2  ;;  %v1640_v16 = vrot.slane %v1639_v9, 2  ;;  %v1391_v17 = vpop.f32.mrb[49].mxu0  ;;  %v1504_v18 = vpop.f32.mrb[49].mxu1 }
 0x2e8   : > { %v1619_v21 = vrot.slane %v1618_v11, 2  ;;  %v1661_v22 = vrot.slane %v1660_v12, 2  ;;  %v1393_v23 = vpop.f32.mrb[50].mxu0  ;;  %v1506_v24 = vpop.f32.mrb[50].mxu1 }
 0x2e9   : > { %v1599_v25 = vmax.f32 %v1597_v1, %v1598_v15  ;;  %v1641_v26 = vmax.f32 %v1639_v9, %v1640_v16  ;;  %v1665_v27 = vmax.f32 %v1389_v13, %v1393_v23  ;;  %v1707_v28 = vmax.f32 %v1502_v14, %v1506_v24  ;;  %v1395_v29 = vpop.f32.mrb[51].mxu0  ;;  %v1508_v30 = vpop.f32.mrb[51].mxu1 }
 0x2ea   : > { %v1620_v31 = vmax.f32 %v1618_v11, %v1619_v21  ;;  %v1662_v32 = vmax.f32 %v1660_v12, %v1661_v22  ;;  %v1686_v33 = vmax.f32 %v1391_v17, %v1395_v29  ;;  %v1728_v34 = vmax.f32 %v1504_v18, %v1508_v30 }
 0x2eb   : > { %v1600_v35 = vrot.slane %v1599_v25, 1  ;;  %v1642_v38 = vrot.slane %v1641_v26, 1 }
 0x2ec   : > { %v1621_v39 = vrot.slane %v1620_v31, 1  ;;  %v1663_v40 = vrot.slane %v1662_v32, 1 }
 0x2ed   : > { %v1601_v41 = vmax.f32 %v1599_v25, %v1600_v35  ;;  %v1643_v42 = vmax.f32 %v1641_v26, %v1642_v38 }
 0x2ee   : > { %v1622_v43 = vmax.f32 %v1620_v31, %v1621_v39  ;;  %v1664_v46 = vmax.f32 %v1662_v32, %v1663_v40  ;;  %v1399_v47 = vpop.f32.mrb[52].mxu0  ;;  %v1512_v48 = vpop.f32.mrb[52].mxu1 }
 0x2ef   : > { %v1666_v49 = vmax.f32 %v1665_v27, %v1399_v47  ;;  %v1708_v50 = vmax.f32 %v1707_v28, %v1512_v48  ;;  %v1401_v51 = vpop.f32.mrb[53].mxu0  ;;  %v1514_v52 = vpop.f32.mrb[53].mxu1 }
 0x2f0   : > { %v1761_v53 = vcombine.low %v1601_v41, %v1622_v43  ;;  %v1762_v54 = vcombine.low %v1643_v42, %v1664_v46  ;;  %v1687_v55 = vmax.f32 %v1686_v33, %v1401_v51  ;;  %v1729_v56 = vmax.f32 %v1728_v34, %v1514_v52  ;;  %v1403_v57 = vpop.f32.mrb[54].mxu0  ;;  %v1516_v58 = vpop.f32.mrb[54].mxu1 }
 0x2f1   : > { %v1667_v59 = vmax.f32 %v1666_v49, %v1403_v57  ;;  %v1709_v45 = vmax.f32 %v1708_v50, %v1516_v58  ;;  %v1405_v60 = vpop.f32.mrb[55].mxu0  ;;  %v1518_v61 = vpop.f32.mrb[55].mxu1 }
 0x2f2   : > { %v2623_v20 = vrot.slane %v1761_v53, %v2620_v44  ;;  %v2626_v62 = vrot.slane %v1762_v54, %v2620_v44  ;;  %v1688_v63 = vmax.f32 %v1687_v55, %v1405_v60  ;;  %v1730_v2 = vmax.f32 %v1729_v56, %v1518_v61 }
 0x2f4   : > { %v1793_v3 = vcombine.low %v2623_v20, %v2626_v62 }
 0x2f6   : > { %v1409_v4 = vpop.f32.mrb[56].mxu0  ;;  %v1522_v5 = vpop.f32.mrb[56].mxu1 }
 0x2f7   : > { %v1668_v6 = vmax.f32 %v1667_v59, %v1409_v4  ;;  %v1710_v7 = vmax.f32 %v1709_v45, %v1522_v5  ;;  %v1411_v8 = vpop.f32.mrb[57].mxu0  ;;  %v1524_v36 = vpop.f32.mrb[57].mxu1 }
 0x2f8   : > { %v1689_v37 = vmax.f32 %v1688_v63, %v1411_v8  ;;  %v1731_v0 = vmax.f32 %v1730_v2, %v1524_v36  ;;  %v1413_v1 = vpop.f32.mrb[58].mxu0  ;;  %v1526_v9 = vpop.f32.mrb[58].mxu1 }
 0x2f9   : > { %v1669_v11 = vmax.f32 %v1668_v6, %v1413_v1  ;;  %v1711_v12 = vmax.f32 %v1710_v7, %v1526_v9  ;;  %v1415_v13 = vpop.f32.mrb[59].mxu0  ;;  %v1528_v14 = vpop.f32.mrb[59].mxu1 }
 0x2fa   : > { %v1690_v15 = vmax.f32 %v1689_v37, %v1415_v13  ;;  %v1732_v16 = vmax.f32 %v1731_v0, %v1528_v14 }
 0x2fe   : > { %v1419_v17 = vpop.f32.mrb[60].mxu0  ;;  %v1532_v18 = vpop.f32.mrb[60].mxu1 }
 0x2ff   : > { %v1670_v21 = vmax.f32 %v1669_v11, %v1419_v17  ;;  %v1712_v19 = vmax.f32 %v1711_v12, %v1532_v18  ;;  %v1421_v10 = vpop.f32.mrb[61].mxu0  ;;  %v1534_v22 = vpop.f32.mrb[61].mxu1 }
 0x300   : > { %v1691_v23 = vmax.f32 %v1690_v15, %v1421_v10  ;;  %v1733_v24 = vmax.f32 %v1732_v16, %v1534_v22  ;;  %v1423_v25 = vpop.f32.mrb[62].mxu0  ;;  %v1536_v26 = vpop.f32.mrb[62].mxu1 }
 0x301   : > { %v1671_v27 = vmax.f32 %v1670_v21, %v1423_v25  ;;  %v1713_v28 = vmax.f32 %v1712_v19, %v1536_v26  ;;  %v1425_v29 = vpop.f32.mrb[63].mxu0  ;;  %v1538_v30 = vpop.f32.mrb[63].mxu1 }
 0x302   : > { %v1692_v31 = vmax.f32 %v1691_v23, %v1425_v29  ;;  %v1734_v32 = vmax.f32 %v1733_v24, %v1538_v30 }
 0x306   : > { %v1429_v33 = vpop.f32.mrb[64].mxu0  ;;  %v1542_v34 = vpop.f32.mrb[64].mxu1 }
 0x307   : > { %v1672_v35 = vmax.f32 %v1671_v27, %v1429_v33  ;;  %v1714_v38 = vmax.f32 %v1713_v28, %v1542_v34  ;;  %v1431_v39 = vpop.f32.mrb[65].mxu0  ;;  %v1544_v40 = vpop.f32.mrb[65].mxu1 }
 0x308   : > { %v1693_v41 = vmax.f32 %v1692_v31, %v1431_v39  ;;  %v1735_v42 = vmax.f32 %v1734_v32, %v1544_v40  ;;  %v1433_v43 = vpop.f32.mrb[66].mxu0  ;;  %v1546_v46 = vpop.f32.mrb[66].mxu1 }
 0x309   : > { %v1673_v47 = vmax.f32 %v1672_v35, %v1433_v43  ;;  %v1715_v48 = vmax.f32 %v1714_v38, %v1546_v46  ;;  %v1435_v49 = vpop.f32.mrb[67].mxu0  ;;  %v1548_v50 = vpop.f32.mrb[67].mxu1 }
 0x30a   : > { %v1694_v51 = vmax.f32 %v1693_v41, %v1435_v49  ;;  %v1736_v52 = vmax.f32 %v1735_v42, %v1548_v50 }
 0x30e   : > { %v1439_v53 = vpop.f32.mrb[68].mxu0  ;;  %v1552_v54 = vpop.f32.mrb[68].mxu1 }
 0x30f   : > { %v1674_v55 = vmax.f32 %v1673_v47, %v1439_v53  ;;  %v1716_v56 = vmax.f32 %v1715_v48, %v1552_v54  ;;  %v1441_v57 = vpop.f32.mrb[69].mxu0  ;;  %v1554_v58 = vpop.f32.mrb[69].mxu1 }
 0x310   : > { %v1695_v59 = vmax.f32 %v1694_v51, %v1441_v57  ;;  %v1737_v45 = vmax.f32 %v1736_v52, %v1554_v58  ;;  %v1443_v60 = vpop.f32.mrb[70].mxu0  ;;  %v1556_v61 = vpop.f32.mrb[70].mxu1 }
 0x311   : > { %v1675_v63 = vmax.f32 %v1674_v55, %v1443_v60  ;;  %v1717_v2 = vmax.f32 %v1716_v56, %v1556_v61  ;;  %v1445_v4 = vpop.f32.mrb[71].mxu0  ;;  %v1558_v5 = vpop.f32.mrb[71].mxu1 }
 0x312   : > { %v1696_v6 = vmax.f32 %v1695_v59, %v1445_v4  ;;  %v1738_v7 = vmax.f32 %v1737_v45, %v1558_v5 }
 0x316   : > { %v1449_v8 = vpop.f32.mrb[72].mxu0  ;;  %v1562_v36 = vpop.f32.mrb[72].mxu1 }
 0x317   : > { %v1676_v37 = vmax.f32 %v1675_v63, %v1449_v8  ;;  %v1718_v0 = vmax.f32 %v1717_v2, %v1562_v36  ;;  %v1451_v1 = vpop.f32.mrb[73].mxu0  ;;  %v1564_v9 = vpop.f32.mrb[73].mxu1  ;;  %v1801_v36 = vrot.slane %v1793_v3, %v2620_v44 }
 0x318   : > { %v1697_v11 = vmax.f32 %v1696_v6, %v1451_v1  ;;  %v1739_v12 = vmax.f32 %v1738_v7, %v1564_v9  ;;  %v1453_v13 = vpop.f32.mrb[74].mxu0  ;;  %v1566_v14 = vpop.f32.mrb[74].mxu1 }
 0x319   : > { %v1677_v15 = vmax.f32 %v1676_v37, %v1453_v13  ;;  %v1719_v16 = vmax.f32 %v1718_v0, %v1566_v14  ;;  %v1455_v17 = vpop.f32.mrb[75].mxu0  ;;  %v1568_v18 = vpop.f32.mrb[75].mxu1  ;;  %v1881_v0 = vld [vmem:[%s2659_s6] sm:$0xff] }
 0x31a   : > { %v1698_v21 = vmax.f32 %v1697_v11, %v1455_v17  ;;  %v1740_v19 = vmax.f32 %v1739_v12, %v1568_v18 }
 0x31e   : > { %v1459_v10 = vpop.f32.mrb[76].mxu0  ;;  %v1572_v22 = vpop.f32.mrb[76].mxu1 }
 0x31f   : > { %v1678_v23 = vmax.f32 %v1677_v15, %v1459_v10  ;;  %v1720_v24 = vmax.f32 %v1719_v16, %v1572_v22  ;;  %v1461_v25 = vpop.f32.mrb[77].mxu0  ;;  %v1574_v26 = vpop.f32.mrb[77].mxu1 }
 0x320   : > { %v1699_v27 = vmax.f32 %v1698_v21, %v1461_v25  ;;  %v1741_v28 = vmax.f32 %v1740_v19, %v1574_v26  ;;  %v1463_v29 = vpop.f32.mrb[78].mxu0  ;;  %v1576_v30 = vpop.f32.mrb[78].mxu1 }
 0x321   : > { %v1679_v31 = vmax.f32 %v1678_v23, %v1463_v29  ;;  %v1721_v32 = vmax.f32 %v1720_v24, %v1576_v30  ;;  %v1465_v33 = vpop.f32.mrb[79].mxu0  ;;  %v1578_v34 = vpop.f32.mrb[79].mxu1 }
 0x322   : > { %v1700_v35 = vmax.f32 %v1699_v27, %v1465_v33  ;;  %v1742_v38 = vmax.f32 %v1741_v28, %v1578_v34 }
 0x323   : > { %v1680_v39 = vrot.slane %v1679_v31, 4  ;;  %v1722_v40 = vrot.slane %v1721_v32, 4 }
 0x324   : > { %v1701_v41 = vrot.slane %v1700_v35, 4  ;;  %v1743_v42 = vrot.slane %v1742_v38, 4 }
 0x325   : > { %v1681_v43 = vmax.f32 %v1679_v31, %v1680_v39  ;;  %v1723_v46 = vmax.f32 %v1721_v32, %v1722_v40 }
 0x326   : > { %v1702_v47 = vmax.f32 %v1700_v35, %v1701_v41  ;;  %v1744_v48 = vmax.f32 %v1742_v38, %v1743_v42 }
 0x327   : > { %v1682_v49 = vrot.slane %v1681_v43, 2  ;;  %v1724_v50 = vrot.slane %v1723_v46, 2 }
 0x328   : > { %v1703_v51 = vrot.slane %v1702_v47, 2  ;;  %v1745_v52 = vrot.slane %v1744_v48, 2 }
 0x329   : > { %v1683_v53 = vmax.f32 %v1681_v43, %v1682_v49  ;;  %v1725_v54 = vmax.f32 %v1723_v46, %v1724_v50 }
 0x32a   : > { %v1704_v55 = vmax.f32 %v1702_v47, %v1703_v51  ;;  %v1746_v56 = vmax.f32 %v1744_v48, %v1745_v52 }
 0x32b   : > { %v1684_v57 = vrot.slane %v1683_v53, 1  ;;  %v1726_v58 = vrot.slane %v1725_v54, 1 }
 0x32c   : > { %v1705_v59 = vrot.slane %v1704_v55, 1  ;;  %v1747_v45 = vrot.slane %v1746_v56, 1 }
 0x32d   : > { %v1685_v60 = vmax.f32 %v1683_v53, %v1684_v57  ;;  %v1727_v61 = vmax.f32 %v1725_v54, %v1726_v58 }
 0x32e   : > { %v1706_v63 = vmax.f32 %v1704_v55, %v1705_v59  ;;  %v1748_v2 = vmax.f32 %v1746_v56, %v1747_v45 }
 0x330   : > { %v1763_v4 = vcombine.low %v1685_v60, %v1706_v63  ;;  %v1764_v5 = vcombine.low %v1727_v61, %v1748_v2 }
 0x332   : > { %v1785_v6 = vrot.slane %v1763_v4, %v2620_v44  ;;  %v1792_v7 = vrot.slane %v1764_v5, %v2620_v44 }
 0x334   : > { %v1794_v8 = vcombine.low %v1785_v6, %v1792_v7 }
 0x336   : > { %v1808_v37 = vrot.slane %v1794_v8, %v2620_v44 }
 0x338   : > { %v1809_v1 = vcombine.low %v1801_v36, %v1808_v37 }
 0x33a   : > { %v1882_v9 = vadd.f32 %v1881_v0, %v1809_v1 }
 0x33c   : > { %1883 = vst [vmem:[%s341_s21] sm:$0xff] %v1882_v9 }
 0x33d PF: > { %s17_s26 = sadd.s32 1, %s2208_s26   ;;  %s2661_s24 = smov %s2204_s25 }
 0x33e   : > { %p14_p5 = scmp.ge.s32.totalorder %s17_s26, 4   ;;  %s2662_s25 = smov %s2664_s27 }
 0x340   :  { %16 = sbr.rel (!%p14_p5) target bundleno = 2 (0x2), region = 96 }

</bundles_post_ra>
